<compile_context>
chip_gen: v7x
topology: tpu7x:2x2x1
jax: 0.10.0
libtpu: 0.0.40
codegen_flags: <defaults>
</compile_context>

<pallas_src>
import functools

import jax
import jax.numpy as jnp
from jax.experimental import pallas as pl
from jax.experimental.pallas import tpu as pltpu

VMEM_SPEC = pl.BlockSpec(memory_space=pltpu.MemorySpace.VMEM)

KS = (3, 4, 5)
CO = 100                  # conv output channels per kernel size (PyTorch Co)
FEAT = len(KS) * CO       # 300 = CNN sentence-feature size (must equal embed_size)
CO_P = 128                # lane-padded conv channels
FEAT_P = len(KS) * CO_P   # 384 = padded feature slab width
CLS = 5
CLS_P = 128               # lane-padded classifier output


# ----------------------------- Pallas kernels ------------------------------

def _cnn_all_kernel(x_ref, w3_ref, b3_ref, w4_ref, b4_ref, w5_ref, b5_ref, o_ref):
    # x: (N, W, D) embedded tokens for all B*S sentences
    # wK: (K, D, CO_P), bK: (1, CO_P)   (zero-padded channels)
    # o: (N, FEAT_P) lane-aligned feature slab [K=3 | K=4 | K=5] each 128 wide
    x = x_ref[...]
    N, W, _ = x.shape
    specs = ((3, w3_ref, b3_ref), (4, w4_ref, b4_ref), (5, w5_ref, b5_ref))
    for idx, (K, w_ref, b_ref) in enumerate(specs):
        T = W - K + 1                                   # valid conv output length
        acc = jnp.zeros((N, T, CO_P), jnp.float32)
        for k in range(K):                              # static unroll over kernel height
            acc = acc + jax.lax.dot_general(
                x[:, k:k + T, :], w_ref[k],
                (((2,), (0,)), ((), ())),
                preferred_element_type=jnp.float32)
        acc = jnp.maximum(acc + b_ref[...][None, :, :], 0.0)      # +bias, ReLU
        # max-pool over time, 128-aligned 128-wide store
        o_ref[:, idx * CO_P:(idx + 1) * CO_P] = jnp.max(acc, axis=1).astype(o_ref.dtype)


def cnn_all_sentences(x_emb, fp):
    N = x_emb.shape[0]
    return pl.pallas_call(
        _cnn_all_kernel,
        out_shape=jax.ShapeDtypeStruct((N, FEAT_P), jnp.float32),
        in_specs=[VMEM_SPEC] * 7,
        out_specs=VMEM_SPEC,
    )(x_emb, fp['conv3_w'], fp['conv3_b'], fp['conv4_w'], fp['conv4_b'],
      fp['conv5_w'], fp['conv5_b'])


def _lstm_seq_kernel(feats_ref, proj_w_ref, proj_b_ref,
                     init_h_w_ref, init_h_b_ref, init_c_w_ref, init_c_b_ref,
                     wih_ref, whh_ref, lstm_b_ref, cls_w_ref, cls_b_ref,
                     out_ref, h_sc, c_sc, *, H, S):
    # feats: (S, B, FEAT_P)  padded CNN features (padded columns are exactly 0)
    # proj_w: (FEAT_P, FEAT); init_*_w: (FEAT_P, 2H) (both directions duplicated)
    # wih: (FEAT, 8H) gate-major [i_f i_b | f_f f_b | g_f g_b | o_f o_b]
    # whh: (2H, 8H) block-diagonal gate-major; lstm_b: (1, 8H)
    # cls_w: (2H, CLS_P); out: (S, B, CLS_P); h_sc/c_sc: (B, 2H) = [dir0 | dir1]
    H2 = 2 * H
    feat0 = feats_ref[0]
    h_sc[...] = (jnp.dot(feat0, init_h_w_ref[...], preferred_element_type=jnp.float32)
                 + init_h_b_ref[...])
    c_sc[...] = (jnp.dot(feat0, init_c_w_ref[...], preferred_element_type=jnp.float32)
                 + init_c_b_ref[...])

    proj_w = proj_w_ref[...]
    proj_b = proj_b_ref[...]
    wih = wih_ref[...]
    whh = whh_ref[...]
    lb = lstm_b_ref[...]
    cls_w = cls_w_ref[...]
    cls_b = cls_b_ref[...]

    for s in range(S):                                   # static unroll (S is small)
        x = (jnp.dot(feats_ref[s], proj_w, preferred_element_type=jnp.float32)
             + proj_b)                                   # proj_input, (B, FEAT)
        gates = (jnp.dot(x, wih, preferred_element_type=jnp.float32)
                 + jnp.dot(h_sc[...], whh, preferred_element_type=jnp.float32)
                 + lb)                                   # (B, 8H) both directions fused
        i = jax.nn.sigmoid(gates[:, 0 * H2:1 * H2])
        f = jax.nn.sigmoid(gates[:, 1 * H2:2 * H2])
        g = jnp.tanh(gates[:, 2 * H2:3 * H2])
        o = jax.nn.sigmoid(gates[:, 3 * H2:4 * H2])
        c_new = f * c_sc[...] + i * g                    # (B, 2H)
        h_new = o * jnp.tanh(c_new)                      # (B, 2H) == cat(h_fwd, h_bwd)
        h_sc[...] = h_new
        c_sc[...] = c_new
        out_ref[s] = (jnp.dot(h_new, cls_w, preferred_element_type=jnp.float32)
                      + cls_b).astype(out_ref.dtype)     # classifier, lane-dense store


def lstm_sequence(feats_sbf, fp, H):
    S, B, _ = feats_sbf.shape
    return pl.pallas_call(
        functools.partial(_lstm_seq_kernel, H=H, S=S),
        out_shape=jax.ShapeDtypeStruct((S, B, CLS_P), jnp.float32),
        in_specs=[VMEM_SPEC] * 12,
        out_specs=VMEM_SPEC,
        scratch_shapes=[pltpu.VMEM((B, 2 * H), jnp.float32),   # h (both directions)
                        pltpu.VMEM((B, 2 * H), jnp.float32)],  # c (both directions)
    )(feats_sbf, fp['proj_w'], fp['proj_b'],
      fp['init_h_w'], fp['init_h_b'], fp['init_c_w'], fp['init_c_b'],
      fp['lstm_wih'], fp['lstm_whh'], fp['lstm_b'], fp['cls_w'], fp['cls_b'])


# ----------------------------- parameters -----------------------------------

def init_params(key, vocab_size, embed_size, hidden_size):
    """Logical parameters in PyTorch-like layout (used by the pure-JAX reference)."""
    assert embed_size == FEAT, "module is only consistent with embed_size == 300"
    ks = jax.random.split(key, 16)
    u = lambda k, shape, s=0.1: jax.random.uniform(k, shape, jnp.float32, -s, s)
    H = hidden_size
    p = {
        'embed': u(ks[0], (vocab_size, embed_size)),
        # conv weights stored as (K, D, Co)  (== PyTorch (Co,1,K,D) transposed)
        'conv3_w': u(ks[1], (3, embed_size, CO)),
        'conv3_b': u(ks[2], (CO,)),
        'conv4_w': u(ks[3], (4, embed_size, CO)),
        'conv4_b': u(ks[4], (CO,)),
        'conv5_w': u(ks[5], (5, embed_size, CO)),
        'conv5_b': u(ks[6], (CO,)),
        # linear layers stored as (in, out)
        'proj_w': u(ks[7], (FEAT, FEAT)),
        'proj_b': jnp.zeros((FEAT,), jnp.float32),
        'init_hidden_w': u(ks[8], (FEAT, H)),
        'init_hidden_b': jnp.zeros((H,), jnp.float32),
        'init_memory_w': u(ks[9], (FEAT, H)),
        'init_memory_b': jnp.zeros((H,), jnp.float32),
        'cls_w': u(ks[10], (2 * H, CLS)),
        'cls_b': jnp.zeros((CLS,), jnp.float32),
        # bidirectional LSTM: gate order i, f, g, o along the 4H axis; b = b_ih + b_hh
        'lstm_wih': u(ks[11], (2, FEAT, 4 * H)),
        'lstm_whh': u(ks[12], (2, H, 4 * H)),
        'lstm_b': u(ks[13], (2, 4 * H)) + u(ks[14], (2, 4 * H)),
    }
    return p


def pack_params(p, H):
    """One-time repack of weights into the lane-aligned / fused layouts the kernels use."""
    # column index of each real (300) feature inside the padded 384-wide slab
    feat_idx = jnp.concatenate([jnp.arange(CO) + i * CO_P for i in range(len(KS))])

    def pad_rows(w):  # (FEAT, X) -> (FEAT_P, X), zeros at padded feature rows
        out = jnp.zeros((FEAT_P, w.shape[1]), w.dtype)
        return out.at[feat_idx].set(w)

    def gate_major_cols(w2):  # (2, In, 4H) -> (In, 8H): [i_f i_b f_f f_b g_f g_b o_f o_b]
        cols = []
        for q in range(4):
            for d in range(2):
                cols.append(w2[d][:, q * H:(q + 1) * H])
        return jnp.concatenate(cols, axis=1)

    # block-diagonal, gate-major recurrent weights: rows [h_fwd | h_bwd]
    whh_bd = jnp.zeros((2 * H, 8 * H), jnp.float32)
    for d in range(2):
        for q in range(4):
            whh_bd = whh_bd.at[
                d * H:(d + 1) * H,
                q * 2 * H + d * H: q * 2 * H + (d + 1) * H].set(
                p['lstm_whh'][d, :, q * H:(q + 1) * H])

    fp = {'embed': p['embed']}
    for K in KS:
        fp[f'conv{K}_w'] = jnp.pad(p[f'conv{K}_w'], ((0, 0), (0, 0), (0, CO_P - CO)))
        fp[f'conv{K}_b'] = jnp.pad(p[f'conv{K}_b'], (0, CO_P - CO)).reshape(1, CO_P)
    fp['proj_w'] = pad_rows(p['proj_w'])                                   # (FEAT_P, FEAT)
    fp['proj_b'] = p['proj_b'].reshape(1, FEAT)
    fp['init_h_w'] = pad_rows(jnp.concatenate([p['init_hidden_w']] * 2, axis=1))  # (FEAT_P, 2H)
    fp['init_h_b'] = jnp.concatenate([p['init_hidden_b']] * 2).reshape(1, 2 * H)
    fp['init_c_w'] = pad_rows(jnp.concatenate([p['init_memory_w']] * 2, axis=1))
    fp['init_c_b'] = jnp.concatenate([p['init_memory_b']] * 2).reshape(1, 2 * H)
    fp['lstm_wih'] = gate_major_cols(p['lstm_wih'])                        # (FEAT, 8H)
    fp['lstm_whh'] = whh_bd                                                # (2H, 8H)
    fp['lstm_b'] = gate_major_cols(p['lstm_b'].reshape(2, 1, 4 * H))       # (1, 8H)
    fp['cls_w'] = jnp.pad(p['cls_w'], ((0, 0), (0, CLS_P - CLS)))          # (2H, CLS_P)
    fp['cls_b'] = jnp.pad(p['cls_b'], (0, CLS_P - CLS)).reshape(1, CLS_P)
    return fp


# ----------------------------- model wrapper -------------------------------

def toulmin_lstm_forward(fparams, paragraphs, hidden_size):
    # paragraphs: (B, S, W) int32  ->  (B, S, 5) float32
    B, S, W = paragraphs.shape
    # embedding gather for ALL sentences at once (XLA glue)
    x_emb = fparams['embed'][paragraphs.reshape(B * S, W)]          # (B*S, W, D)
    feats = cnn_all_sentences(x_emb, fparams)                        # (B*S, FEAT_P)
    feats_sbf = feats.reshape(B, S, FEAT_P).transpose(1, 0, 2)       # (S, B, FEAT_P)
    preds = lstm_sequence(feats_sbf, fparams, hidden_size)           # (S, B, CLS_P)
    return preds[:, :, :CLS].transpose(1, 0, 2)                      # (B, S, 5)


# ------------------------ pure-JAX reference (check) ------------------------

def _ref_forward(params, paragraphs):
    B, S, W = paragraphs.shape

    def cnn_ref(tokens):
        x = params['embed'][tokens]                       # (B, W, D)
        outs = []
        for K in KS:
            w = params[f'conv{K}_w']                      # (K, D, Co)
            b = params[f'conv{K}_b']
            T = W - K + 1
            acc = jnp.zeros((B, T, CO), jnp.float32)
            for k in range(K):
                acc = acc + jnp.einsum('btd,dc->btc', x[:, k:k + T, :], w[k])
            acc = jnp.maximum(acc + b, 0.0)
            outs.append(jnp.max(acc, axis=1))
        return jnp.concatenate(outs, axis=1)

    sent_feats = jnp.stack([cnn_ref(paragraphs[:, s, :]) for s in range(S)], axis=1)

    lin = lambda x, w, b: x @ w + b
    h0 = lin(sent_feats[:, 0, :], params['init_hidden_w'], params['init_hidden_b'])
    c0 = lin(sent_feats[:, 0, :], params['init_memory_w'], params['init_memory_b'])
    h = jnp.stack([h0, h0]); c = jnp.stack([c0, c0])
    H = h0.shape[1]

    preds = []
    for s in range(S):
        x = lin(sent_feats[:, s, :], params['proj_w'], params['proj_b'])
        hs, cs = [], []
        for d in range(2):
            g = x @ params['lstm_wih'][d] + h[d] @ params['lstm_whh'][d] + params['lstm_b'][d]
            i = jax.nn.sigmoid(g[:, 0 * H:1 * H]); f = jax.nn.sigmoid(g[:, 1 * H:2 * H])
            gg = jnp.tanh(g[:, 2 * H:3 * H]); o = jax.nn.sigmoid(g[:, 3 * H:4 * H])
            cn = f * c[d] + i * gg
            hs.append(o * jnp.tanh(cn)); cs.append(cn)
        h = jnp.stack(hs); c = jnp.stack(cs)
        preds.append(lin(jnp.concatenate([h[0], h[1]], axis=1),
                         params['cls_w'], params['cls_b']))
    return jnp.stack(preds, axis=1)


# --------------------------------- main -------------------------------------

if __name__ == "__main__":
    B, S, W = 2, 3, 8            # batch, sentences per paragraph, words per sentence
    V, D, H = 50, FEAT, 32       # vocab, embed (must be 300), hidden

    key = jax.random.PRNGKey(0)
    kp, kx = jax.random.split(key)
    params = init_params(kp, V, D, H)
    paragraphs = jax.random.randint(kx, (B, S, W), 0, V, dtype=jnp.int32)

    fparams = pack_params(params, H)               # one-time weight repack / padding

    out = toulmin_lstm_forward(fparams, paragraphs, H)
    out = jax.block_until_ready(out)
    assert out.shape == (B, S, 5), out.shape

    ref = jax.block_until_ready(_ref_forward(params, paragraphs))
    max_err = float(jnp.max(jnp.abs(out - ref)))
    assert max_err < 1e-3, f"mismatch vs reference: {max_err}"

    print("KERNEL_OK")
</pallas_src>

<mosaic_0001>
module attributes {stable_mosaic.version = 11 : i64} {
  func.func @_cnn_all_kernel(%arg0: memref<6x8x300xf32, #tpu.memory_space<vmem>>, %arg1: memref<3x300x128xf32, #tpu.memory_space<vmem>>, %arg2: memref<1x128xf32, #tpu.memory_space<vmem>>, %arg3: memref<4x300x128xf32, #tpu.memory_space<vmem>>, %arg4: memref<1x128xf32, #tpu.memory_space<vmem>>, %arg5: memref<5x300x128xf32, #tpu.memory_space<vmem>>, %arg6: memref<1x128xf32, #tpu.memory_space<vmem>>, %arg7: memref<6x384xf32, #tpu.memory_space<vmem>>) attributes {dimension_semantics = [], scalar_prefetch = 0 : i64, scratch_operands = 0 : i64, tpu.core_type = #tpu.core_type<tc>} {
    %c0 = arith.constant 0 : index
    %c0_0 = arith.constant 0 : index
    %c0_1 = arith.constant 0 : index
    %0 = vector.load %arg0[%c0, %c0_0, %c0_1] : memref<6x8x300xf32, #tpu.memory_space<vmem>>, vector<6x8x300xf32>
    %cst = arith.constant 0.000000e+00 : f32
    %1 = vector.broadcast %cst : f32 to vector<6x6x128xf32>
    %2 = vector.extract_strided_slice %0 {offsets = [0, 0, 0], sizes = [6, 6, 300], strides = [1, 1, 1]} : vector<6x8x300xf32> to vector<6x6x300xf32>
    %c0_2 = arith.constant 0 : index
    %c0_3 = arith.constant 0 : index
    %c0_4 = arith.constant 0 : index
    %3 = vector.load %arg1[%c0_2, %c0_3, %c0_4] : memref<3x300x128xf32, #tpu.memory_space<vmem>>, vector<1x300x128xf32>
    %4 = vector.shape_cast %3 : vector<1x300x128xf32> to vector<300x128xf32>
    %cst_5 = arith.constant dense<0.000000e+00> : vector<6x6x128xf32>
    %5 = tpu.matmul %2, %4, %cst_5 {dimension_numbers = #tpu.dot_dimension_numbers<[2], [0], [0, 1], [1], [0, 0, 0, 1, 1, 1], [], []>} : vector<6x6x300xf32>, vector<300x128xf32>, vector<6x6x128xf32> -> vector<6x6x128xf32>
    %6 = arith.addf %1, %5 : vector<6x6x128xf32>
    %7 = vector.extract_strided_slice %0 {offsets = [0, 1, 0], sizes = [6, 6, 300], strides = [1, 1, 1]} : vector<6x8x300xf32> to vector<6x6x300xf32>
    %c1 = arith.constant 1 : index
    %c0_6 = arith.constant 0 : index
    %c0_7 = arith.constant 0 : index
    %8 = vector.load %arg1[%c1, %c0_6, %c0_7] : memref<3x300x128xf32, #tpu.memory_space<vmem>>, vector<1x300x128xf32>
    %9 = vector.shape_cast %8 : vector<1x300x128xf32> to vector<300x128xf32>
    %cst_8 = arith.constant dense<0.000000e+00> : vector<6x6x128xf32>
    %10 = tpu.matmul %7, %9, %cst_8 {dimension_numbers = #tpu.dot_dimension_numbers<[2], [0], [0, 1], [1], [0, 0, 0, 1, 1, 1], [], []>} : vector<6x6x300xf32>, vector<300x128xf32>, vector<6x6x128xf32> -> vector<6x6x128xf32>
    %11 = arith.addf %6, %10 : vector<6x6x128xf32>
    %12 = vector.extract_strided_slice %0 {offsets = [0, 2, 0], sizes = [6, 6, 300], strides = [1, 1, 1]} : vector<6x8x300xf32> to vector<6x6x300xf32>
    %c2 = arith.constant 2 : index
    %c0_9 = arith.constant 0 : index
    %c0_10 = arith.constant 0 : index
    %13 = vector.load %arg1[%c2, %c0_9, %c0_10] : memref<3x300x128xf32, #tpu.memory_space<vmem>>, vector<1x300x128xf32>
    %14 = vector.shape_cast %13 : vector<1x300x128xf32> to vector<300x128xf32>
    %cst_11 = arith.constant dense<0.000000e+00> : vector<6x6x128xf32>
    %15 = tpu.matmul %12, %14, %cst_11 {dimension_numbers = #tpu.dot_dimension_numbers<[2], [0], [0, 1], [1], [0, 0, 0, 1, 1, 1], [], []>} : vector<6x6x300xf32>, vector<300x128xf32>, vector<6x6x128xf32> -> vector<6x6x128xf32>
    %16 = arith.addf %11, %15 : vector<6x6x128xf32>
    %c0_12 = arith.constant 0 : index
    %c0_13 = arith.constant 0 : index
    %17 = vector.load %arg2[%c0_12, %c0_13] : memref<1x128xf32, #tpu.memory_space<vmem>>, vector<1x128xf32>
    %18 = vector.shape_cast %17 : vector<1x128xf32> to vector<1x1x128xf32>
    %19 = vector.broadcast %18 : vector<1x1x128xf32> to vector<6x6x128xf32>
    %20 = arith.addf %16, %19 : vector<6x6x128xf32>
    %cst_14 = arith.constant 0.000000e+00 : f32
    %21 = vector.broadcast %cst_14 : f32 to vector<6x6x128xf32>
    %22 = arith.maximumf %20, %21 : vector<6x6x128xf32>
    %cst_15 = arith.constant dense<0xFF800000> : vector<6x128xf32>
    %23 = vector.multi_reduction <maximumf>, %22, %cst_15 [1] : vector<6x6x128xf32> to vector<6x128xf32>
    %c0_16 = arith.constant 0 : index
    %c0_17 = arith.constant 0 : index
    %24 = vector.load %arg7[%c0_16, %c0_17] : memref<6x384xf32, #tpu.memory_space<vmem>>, vector<6x128xf32>
    tpu.vector_store %arg7[%c0_16, %c0_17], %23 {strides = array<i32>} : memref<6x384xf32, #tpu.memory_space<vmem>>, vector<6x128xf32>,
    %cst_18 = arith.constant 0.000000e+00 : f32
    %25 = vector.broadcast %cst_18 : f32 to vector<6x5x128xf32>
    %26 = vector.extract_strided_slice %0 {offsets = [0, 0, 0], sizes = [6, 5, 300], strides = [1, 1, 1]} : vector<6x8x300xf32> to vector<6x5x300xf32>
    %c0_19 = arith.constant 0 : index
    %c0_20 = arith.constant 0 : index
    %c0_21 = arith.constant 0 : index
    %27 = vector.load %arg3[%c0_19, %c0_20, %c0_21] : memref<4x300x128xf32, #tpu.memory_space<vmem>>, vector<1x300x128xf32>
    %28 = vector.shape_cast %27 : vector<1x300x128xf32> to vector<300x128xf32>
    %cst_22 = arith.constant dense<0.000000e+00> : vector<6x5x128xf32>
    %29 = tpu.matmul %26, %28, %cst_22 {dimension_numbers = #tpu.dot_dimension_numbers<[2], [0], [0, 1], [1], [0, 0, 0, 1, 1, 1], [], []>} : vector<6x5x300xf32>, vector<300x128xf32>, vector<6x5x128xf32> -> vector<6x5x128xf32>
    %30 = arith.addf %25, %29 : vector<6x5x128xf32>
    %31 = vector.extract_strided_slice %0 {offsets = [0, 1, 0], sizes = [6, 5, 300], strides = [1, 1, 1]} : vector<6x8x300xf32> to vector<6x5x300xf32>
    %c1_23 = arith.constant 1 : index
    %c0_24 = arith.constant 0 : index
    %c0_25 = arith.constant 0 : index
    %32 = vector.load %arg3[%c1_23, %c0_24, %c0_25] : memref<4x300x128xf32, #tpu.memory_space<vmem>>, vector<1x300x128xf32>
    %33 = vector.shape_cast %32 : vector<1x300x128xf32> to vector<300x128xf32>
    %cst_26 = arith.constant dense<0.000000e+00> : vector<6x5x128xf32>
    %34 = tpu.matmul %31, %33, %cst_26 {dimension_numbers = #tpu.dot_dimension_numbers<[2], [0], [0, 1], [1], [0, 0, 0, 1, 1, 1], [], []>} : vector<6x5x300xf32>, vector<300x128xf32>, vector<6x5x128xf32> -> vector<6x5x128xf32>
    %35 = arith.addf %30, %34 : vector<6x5x128xf32>
    %36 = vector.extract_strided_slice %0 {offsets = [0, 2, 0], sizes = [6, 5, 300], strides = [1, 1, 1]} : vector<6x8x300xf32> to vector<6x5x300xf32>
    %c2_27 = arith.constant 2 : index
    %c0_28 = arith.constant 0 : index
    %c0_29 = arith.constant 0 : index
    %37 = vector.load %arg3[%c2_27, %c0_28, %c0_29] : memref<4x300x128xf32, #tpu.memory_space<vmem>>, vector<1x300x128xf32>
    %38 = vector.shape_cast %37 : vector<1x300x128xf32> to vector<300x128xf32>
    %cst_30 = arith.constant dense<0.000000e+00> : vector<6x5x128xf32>
    %39 = tpu.matmul %36, %38, %cst_30 {dimension_numbers = #tpu.dot_dimension_numbers<[2], [0], [0, 1], [1], [0, 0, 0, 1, 1, 1], [], []>} : vector<6x5x300xf32>, vector<300x128xf32>, vector<6x5x128xf32> -> vector<6x5x128xf32>
    %40 = arith.addf %35, %39 : vector<6x5x128xf32>
    %41 = vector.extract_strided_slice %0 {offsets = [0, 3, 0], sizes = [6, 5, 300], strides = [1, 1, 1]} : vector<6x8x300xf32> to vector<6x5x300xf32>
    %c3 = arith.constant 3 : index
    %c0_31 = arith.constant 0 : index
    %c0_32 = arith.constant 0 : index
    %42 = vector.load %arg3[%c3, %c0_31, %c0_32] : memref<4x300x128xf32, #tpu.memory_space<vmem>>, vector<1x300x128xf32>
    %43 = vector.shape_cast %42 : vector<1x300x128xf32> to vector<300x128xf32>
    %cst_33 = arith.constant dense<0.000000e+00> : vector<6x5x128xf32>
    %44 = tpu.matmul %41, %43, %cst_33 {dimension_numbers = #tpu.dot_dimension_numbers<[2], [0], [0, 1], [1], [0, 0, 0, 1, 1, 1], [], []>} : vector<6x5x300xf32>, vector<300x128xf32>, vector<6x5x128xf32> -> vector<6x5x128xf32>
    %45 = arith.addf %40, %44 : vector<6x5x128xf32>
    %c0_34 = arith.constant 0 : index
    %c0_35 = arith.constant 0 : index
    %46 = vector.load %arg4[%c0_34, %c0_35] : memref<1x128xf32, #tpu.memory_space<vmem>>, vector<1x128xf32>
    %47 = vector.shape_cast %46 : vector<1x128xf32> to vector<1x1x128xf32>
    %48 = vector.broadcast %47 : vector<1x1x128xf32> to vector<6x5x128xf32>
    %49 = arith.addf %45, %48 : vector<6x5x128xf32>
    %cst_36 = arith.constant 0.000000e+00 : f32
    %50 = vector.broadcast %cst_36 : f32 to vector<6x5x128xf32>
    %51 = arith.maximumf %49, %50 : vector<6x5x128xf32>
    %cst_37 = arith.constant dense<0xFF800000> : vector<6x128xf32>
    %52 = vector.multi_reduction <maximumf>, %51, %cst_37 [1] : vector<6x5x128xf32> to vector<6x128xf32>
    %c0_38 = arith.constant 0 : index
    %c128 = arith.constant 128 : index
    %53 = vector.load %arg7[%c0_38, %c128] : memref<6x384xf32, #tpu.memory_space<vmem>>, vector<6x128xf32>
    tpu.vector_store %arg7[%c0_38, %c128], %52 {strides = array<i32>} : memref<6x384xf32, #tpu.memory_space<vmem>>, vector<6x128xf32>,
    %cst_39 = arith.constant 0.000000e+00 : f32
    %54 = vector.broadcast %cst_39 : f32 to vector<6x4x128xf32>
    %55 = vector.extract_strided_slice %0 {offsets = [0, 0, 0], sizes = [6, 4, 300], strides = [1, 1, 1]} : vector<6x8x300xf32> to vector<6x4x300xf32>
    %c0_40 = arith.constant 0 : index
    %c0_41 = arith.constant 0 : index
    %c0_42 = arith.constant 0 : index
    %56 = vector.load %arg5[%c0_40, %c0_41, %c0_42] : memref<5x300x128xf32, #tpu.memory_space<vmem>>, vector<1x300x128xf32>
    %57 = vector.shape_cast %56 : vector<1x300x128xf32> to vector<300x128xf32>
    %cst_43 = arith.constant dense<0.000000e+00> : vector<6x4x128xf32>
    %58 = tpu.matmul %55, %57, %cst_43 {dimension_numbers = #tpu.dot_dimension_numbers<[2], [0], [0, 1], [1], [0, 0, 0, 1, 1, 1], [], []>} : vector<6x4x300xf32>, vector<300x128xf32>, vector<6x4x128xf32> -> vector<6x4x128xf32>
    %59 = arith.addf %54, %58 : vector<6x4x128xf32>
    %60 = vector.extract_strided_slice %0 {offsets = [0, 1, 0], sizes = [6, 4, 300], strides = [1, 1, 1]} : vector<6x8x300xf32> to vector<6x4x300xf32>
    %c1_44 = arith.constant 1 : index
    %c0_45 = arith.constant 0 : index
    %c0_46 = arith.constant 0 : index
    %61 = vector.load %arg5[%c1_44, %c0_45, %c0_46] : memref<5x300x128xf32, #tpu.memory_space<vmem>>, vector<1x300x128xf32>
    %62 = vector.shape_cast %61 : vector<1x300x128xf32> to vector<300x128xf32>
    %cst_47 = arith.constant dense<0.000000e+00> : vector<6x4x128xf32>
    %63 = tpu.matmul %60, %62, %cst_47 {dimension_numbers = #tpu.dot_dimension_numbers<[2], [0], [0, 1], [1], [0, 0, 0, 1, 1, 1], [], []>} : vector<6x4x300xf32>, vector<300x128xf32>, vector<6x4x128xf32> -> vector<6x4x128xf32>
    %64 = arith.addf %59, %63 : vector<6x4x128xf32>
    %65 = vector.extract_strided_slice %0 {offsets = [0, 2, 0], sizes = [6, 4, 300], strides = [1, 1, 1]} : vector<6x8x300xf32> to vector<6x4x300xf32>
    %c2_48 = arith.constant 2 : index
    %c0_49 = arith.constant 0 : index
    %c0_50 = arith.constant 0 : index
    %66 = vector.load %arg5[%c2_48, %c0_49, %c0_50] : memref<5x300x128xf32, #tpu.memory_space<vmem>>, vector<1x300x128xf32>
    %67 = vector.shape_cast %66 : vector<1x300x128xf32> to vector<300x128xf32>
    %cst_51 = arith.constant dense<0.000000e+00> : vector<6x4x128xf32>
    %68 = tpu.matmul %65, %67, %cst_51 {dimension_numbers = #tpu.dot_dimension_numbers<[2], [0], [0, 1], [1], [0, 0, 0, 1, 1, 1], [], []>} : vector<6x4x300xf32>, vector<300x128xf32>, vector<6x4x128xf32> -> vector<6x4x128xf32>
    %69 = arith.addf %64, %68 : vector<6x4x128xf32>
    %70 = vector.extract_strided_slice %0 {offsets = [0, 3, 0], sizes = [6, 4, 300], strides = [1, 1, 1]} : vector<6x8x300xf32> to vector<6x4x300xf32>
    %c3_52 = arith.constant 3 : index
    %c0_53 = arith.constant 0 : index
    %c0_54 = arith.constant 0 : index
    %71 = vector.load %arg5[%c3_52, %c0_53, %c0_54] : memref<5x300x128xf32, #tpu.memory_space<vmem>>, vector<1x300x128xf32>
    %72 = vector.shape_cast %71 : vector<1x300x128xf32> to vector<300x128xf32>
    %cst_55 = arith.constant dense<0.000000e+00> : vector<6x4x128xf32>
    %73 = tpu.matmul %70, %72, %cst_55 {dimension_numbers = #tpu.dot_dimension_numbers<[2], [0], [0, 1], [1], [0, 0, 0, 1, 1, 1], [], []>} : vector<6x4x300xf32>, vector<300x128xf32>, vector<6x4x128xf32> -> vector<6x4x128xf32>
    %74 = arith.addf %69, %73 : vector<6x4x128xf32>
    %75 = vector.extract_strided_slice %0 {offsets = [0, 4, 0], sizes = [6, 4, 300], strides = [1, 1, 1]} : vector<6x8x300xf32> to vector<6x4x300xf32>
    %c4 = arith.constant 4 : index
    %c0_56 = arith.constant 0 : index
    %c0_57 = arith.constant 0 : index
    %76 = vector.load %arg5[%c4, %c0_56, %c0_57] : memref<5x300x128xf32, #tpu.memory_space<vmem>>, vector<1x300x128xf32>
    %77 = vector.shape_cast %76 : vector<1x300x128xf32> to vector<300x128xf32>
    %cst_58 = arith.constant dense<0.000000e+00> : vector<6x4x128xf32>
    %78 = tpu.matmul %75, %77, %cst_58 {dimension_numbers = #tpu.dot_dimension_numbers<[2], [0], [0, 1], [1], [0, 0, 0, 1, 1, 1], [], []>} : vector<6x4x300xf32>, vector<300x128xf32>, vector<6x4x128xf32> -> vector<6x4x128xf32>
    %79 = arith.addf %74, %78 : vector<6x4x128xf32>
    %c0_59 = arith.constant 0 : index
    %c0_60 = arith.constant 0 : index
    %80 = vector.load %arg6[%c0_59, %c0_60] : memref<1x128xf32, #tpu.memory_space<vmem>>, vector<1x128xf32>
    %81 = vector.shape_cast %80 : vector<1x128xf32> to vector<1x1x128xf32>
    %82 = vector.broadcast %81 : vector<1x1x128xf32> to vector<6x4x128xf32>
    %83 = arith.addf %79, %82 : vector<6x4x128xf32>
    %cst_61 = arith.constant 0.000000e+00 : f32
    %84 = vector.broadcast %cst_61 : f32 to vector<6x4x128xf32>
    %85 = arith.maximumf %83, %84 : vector<6x4x128xf32>
    %cst_62 = arith.constant dense<0xFF800000> : vector<6x128xf32>
    %86 = vector.multi_reduction <maximumf>, %85, %cst_62 [1] : vector<6x4x128xf32> to vector<6x128xf32>
    %c0_63 = arith.constant 0 : index
    %c256 = arith.constant 256 : index
    %87 = vector.load %arg7[%c0_63, %c256] : memref<6x384xf32, #tpu.memory_space<vmem>>, vector<6x128xf32>
    tpu.vector_store %arg7[%c0_63, %c256], %86 {strides = array<i32>} : memref<6x384xf32, #tpu.memory_space<vmem>>, vector<6x128xf32>,
    return
  }
}

</mosaic_0001>

<bundles_post_ra>
// kernel: tpu_custom_call.1
= control target key start
LH: loop header
LB: loop body
LE: loop exit
PB: predicated region body
PF: predicated region fallthrough
CT: control target
= control target key end

     0   :  { %12 = vsyncpa [#allocation3], 0  ;;  %s13210_s0 = inlined_call_operand.hbm [shape: f32[6,8,300], index: 0, kind: input, shape index: {}]   ;;  %s13211_s1 = inlined_call_operand.vmem [shape: f32[3,300,128], index: 1, kind: input, shape index: {}]   ;;  %s13212_s2 = inlined_call_operand.vmem [shape: f32[1,128], index: 2, kind: input, shape index: {}]   ;;  %s13213_s3 = inlined_call_operand.vmem [shape: f32[4,300,128], index: 3, kind: input, shape index: {}]   ;;  %s13214_s4 = inlined_call_operand.vmem [shape: f32[1,128], index: 4, kind: input, shape index: {}]   ;;  %s13215_s5 = inlined_call_operand.vmem [shape: f32[5,300,128], index: 5, kind: input, shape index: {}]   ;;  %s13216_s6 = inlined_call_operand.hbm [shape: f32[1,128], index: 6, kind: input, shape index: {}]   ;;  %s13217_s7 = inlined_call_operand.hbm [shape: f32[6,384], index: 7, kind: output, shape index: {}]  }
   0x1   :  { %13 = vsyncpa [#allocation6], 0 }
   0x2   :  { %14 = vsyncpa [#allocation4], 0  ;;  %s8960_s24 = smov [#allocation2]   ;;  %s8888_s28 = scalar_lea.hbm %s13210_s0, 2304 }
   0x3   :  { %s20_s25 = sshll.u32 %s8960_s24, 4  ;;  %p8889_p0 = scmp.ne.s32.totalorder %s13210_s0, %s8888_s28  ;;  %s21_s25 = int_to_ptr.vmem [resolvable:$true] %s20_s25 }
   0x4   :  { %p8892_p1 = scmp.lt.u32.totalorder %s8888_s28, %s13210_s0 }
   0x6   :  { %p8894_p2 = pnand %p8892_p1, %p8889_p0 }
   0x8   :  { %8897 = shalt.err (!%p8894_p2)
}
   0x9   :  { %s8898_s10 = scalar_lea.vmem %s21_s25, 2304  ;;  %p8903_p4 = scmp.lt.s32.totalorder %s21_s25, %s21_s25 }
   0xa   :  { %p8899_p3 = scmp.ne.s32.totalorder %s21_s25, %s8898_s10  ;;  %p8904_p5 = scmp.lt.s32.totalorder %s8898_s10, %s8898_s10 }
   0xc   :  { %p8905_p6 = por %p8904_p5, %p8903_p4 }
   0xe   :  { %p8906_p7 = pnand %p8905_p6, %p8899_p3 }
  0x10   :  { %8909 = shalt.err (!%p8906_p7)
}
  0x11   :  { %s8961_s11 = smov 384   ;;  %s8962_s12 = smov 24  }
  0x12   :  { %26 = dma.hbm_to_vmem [thread:$0]  %s13210_s0, 2304, %s21_s25, [#allocation3], %s8961_s11, %s8961_s11, %s8962_s12  }
  0x13   :  { %s8963_s15 = smov [#allocation5]   ;;  %s8910_s19 = scalar_lea.hbm %s13216_s6, 16 }
  0x14   :  { %s43_s16 = sshll.u32 %s8963_s15, 4  ;;  %p8911_p8 = scmp.ne.s32.totalorder %s13216_s6, %s8910_s19  ;;  %s44_s16 = int_to_ptr.vmem [resolvable:$true] %s43_s16 }
  0x15   :  { %p8914_p9 = scmp.lt.u32.totalorder %s8910_s19, %s13216_s6 }
  0x17   :  { %p8916_p10 = pnand %p8914_p9, %p8911_p8 }
  0x19   :  { %8919 = shalt.err (!%p8916_p10)
}
  0x1a   :  { %s8920_s24 = scalar_lea.vmem %s44_s16, 16  ;;  %s8924_s0 = scalar_lea.vmem %s44_s16, 32 }
  0x1b   :  { %p8921_p11 = scmp.ne.s32.totalorder %s44_s16, %s8920_s24  ;;  %p8925_p12 = scmp.lt.s32.totalorder %s44_s16, %s44_s16 }
  0x1c   :  { %p8926_p13 = scmp.lt.s32.totalorder %s8924_s0, %s8920_s24 }
  0x1e   :  { %p8927_p0 = por %p8926_p13, %p8925_p12 }
  0x20   :  { %p8928_p1 = pnand %p8927_p0, %p8921_p11 }
  0x22   :  { %8931 = shalt.err (!%p8928_p1)
}
  0x23   :  { %46 = dma.hbm_to_vmem [thread:$0]  %s13216_s6, 16, %s44_s16, [#allocation6]  }
  0x24   :  { %8954 = dma.done.wait [#allocation3], 2304  }
  0x25   :  { %8955 = vsyncadd [#allocation3], 4294964992 }
  0x26   :  { %8956 = dma.done.wait [#allocation6], 16  }
  0x27   :  { %8957 = vsyncadd [#allocation6], 4294967280  ;;  %v13218_v0 = vmov 0.0|0.0   ;;  %vm376_vm0 = vcmask 1040384   ;;  %vm8965_vm1 = vmmov 0   ;;  %v13220_v1 = vmov 0.0  }
  0x28   :  { %8273 = vmatprep.subr.bf16.mxu1 %v13218_v0  ;;  %7995 = vmatprep.mubr.msk.f32.mxu1 %vm8965_vm1, %v13220_v1  ;;  %vm377_vm2 = vcmask 1042434   ;;  %vm379_vm4 = vcmask 1044484   ;;  %vm621_vm5 = vcmask 1043456   ;;  %v8967_v2 = vmov 1983009808   ;;  %v6860_v8 = vld [vmem:[%s13211_s1 + $0x1b0] sm:$0xff] }
  0x29   :  { %vm378_vm3 = vmor %vm376_vm0, %vm377_vm2  ;;  %v170_v3 = vunpack.c.l.s4 %v8967_v2  ;;  %v172_v4 = vlaneseq  ;;  %v8968_v6 = vmov 1966171168   ;;  %v6861_v9 = vld [vmem:[%s13211_s1 + $0x1b8] sm:$0xff]  ;;  %v6844_v10 = vld [vmem:[%s13211_s1 + $0x130] sm:$0xff]  ;;  %vm8969_vm7 = vmmov 1  }
  0x2a   :  { %vm9041_vm6 = vmor %vm378_vm3, %vm379_vm4  ;;  %v2098_v7 = vunpack.c.l.s4 %v8968_v6  ;;  %v8241_v11 = vpack.c.bf16 %v6861_v9, %v6860_v8  ;;  %v6845_v12 = vld [vmem:[%s13211_s1 + $0x138] sm:$0xff]  ;;  %v6876_v13 = vld [vmem:[%s13211_s1 + $0x230] sm:$0xff]  ;;  %vm381_vm9 = vcmask 1046534   ;;  %vm610_vm11 = vcmask 359424  }
  0x2b   :  { %v6877_v14 = vld [vmem:[%s13211_s1 + $0x238] sm:$0xff]  ;;  %vm9064_vm8 = vmpackc.low %vm621_vm5, %vm8969_vm7  ;;  %v8243_v16 = vpack.c.bf16 %v6845_v12, %v6844_v10  ;;  %v6862_v18 = vld [vmem:[%s13211_s1 + $0x1c0] sm:$0xff]  ;;  %v171_v21 = vunpack.c.0.s8 %v170_v3  ;;  %v173_v22 = vshrl.u32 %v172_v4, 7  ;;  %vm5512_vm12 = vcmask 1042432  }
  0x2c   :  { %v8274_v17 = vpack.c.bf16 %v6877_v14, %v6876_v13  ;;  %v6863_v19 = vld [vmem:[%s13211_s1 + $0x1c8] sm:$0xff]  ;;  %v6846_v20 = vld [vmem:[%s13211_s1 + $0x140] sm:$0xff]  ;;  %8242 = vmatprep.subr.bf16.mxu0 %v8241_v11  ;;  %v2099_v27 = vunpack.c.0.s8 %v2098_v7  ;;  %v6864_v30 = vld [vmem:[%s13211_s1 + $0x1d0] sm:$0xff]  ;;  %vm5513_vm13 = vcmask 1046532   ;;  %vm5979_vm15 = vcmask 1041408  }
  0x2d   :  { %v8245_v23 = vpack.c.bf16 %v6863_v19, %v6862_v18  ;;  %v6847_v24 = vld [vmem:[%s13211_s1 + $0x148] sm:$0xff]  ;;  %v6878_v25 = vld [vmem:[%s13211_s1 + $0x240] sm:$0xff]  ;;  %8244 = vmatpush3.bf16.msra.mxu0 %v8243_v16  ;;  %v6865_v31 = vld [vmem:[%s13211_s1 + $0x1d8] sm:$0xff]  ;;  %v9116_v40 = vsub.s32 %v171_v21, %v173_v22  ;;  %vm5980_vm3 = vcmask 1045508  }
  0x2e   :  { %v6879_v26 = vld [vmem:[%s13211_s1 + $0x248] sm:$0xff]  ;;  %8275 = vmatpush3.bf16.msra.mxu1 %v8274_v17  ;;  %v8247_v28 = vpack.c.bf16 %v6847_v24, %v6846_v20  ;;  %v6848_v32 = vld [vmem:[%s13211_s1 + $0x150] sm:$0xff]  ;;  %v8249_v33 = vpack.c.bf16 %v6865_v31, %v6864_v30  ;;  %v6849_v34 = vld [vmem:[%s13211_s1 + $0x158] sm:$0xff]  ;;  %v9136_v47 = vsub.s32 %v2099_v27, %v173_v22 }
  0x2f   :  { %v8277_v29 = vpack.c.bf16 %v6879_v26, %v6878_v25  ;;  %8246 = vmatprep.subr.bf16.mxu0 %v8245_v23  ;;  %8276 = vmatprep.subr.bf16.mxu1 %v13218_v0  ;;  %v6880_v35 = vld [vmem:[%s13211_s1 + $0x250] sm:$0xff]  ;;  %v6881_v36 = vld [vmem:[%s13211_s1 + $0x258] sm:$0xf]  ;;  %v6866_v37 = vld [vmem:[%s13211_s1 + $0x1e0] sm:$0xff]  ;;  %13304 = vst [vmem:[#allocation11_spill] sm:$0xff] %v9116_v40  ;;  %v8251_v42 = vpack.c.bf16 %v6849_v34, %v6848_v32 }
  0x30   :  { %v6867_v38 = vld [vmem:[%s13211_s1 + $0x1e8] sm:$0xff]  ;;  %v9114_v39 = vld [vmem:[%s13211_s1 + $0x160] sm:$0xff]  ;;  %vm9121_vm10 = vmor %vm9041_vm6, %vm381_vm9  ;;  %v8280_v43 = vpack.c.bf16 %v6881_v36, %v6880_v35  ;;  %13307 = vst [vmem:[#allocation12_spill] sm:$0xff] %v9136_v47  ;;  %vm2016_vm9 = vcmask 1045509  }
  0x31   :  { %v9128_v44 = vld [vmem:[%s13211_s1 + $0x168] sm:$0xff]  ;;  %v87_v45 = vld [vmem:[%s13211_s1 + $0x80] sm:$0xff]  ;;  %8248 = vmatpush3.bf16.msra.mxu0 %v8247_v28  ;;  %v8253_v48 = vpack.c.bf16 %v6867_v38, %v6866_v37  ;;  %v55_v53 = vld [vmem:[#allocation2 + $0x10] sm:$0xff] }
  0x32   :  { %v88_v46 = vld [vmem:[%s13211_s1 + $0x88] sm:$0xff]  ;;  %8278 = vmatpush3.bf16.msra.mxu1 %v8277_v29  ;;  %v8255_v49 = vpack.c.bf16 %v9128_v44, %v9114_v39  ;;  %v53_v51 = vld [vmem:[#allocation2] sm:$0xff]  ;;  %8250 = vmatprep.subr.bf16.mxu0 %v8249_v33  ;;  %v56_v54 = vld [vmem:[#allocation2 + $0x18] sm:$0xff]  ;;  %v9147_v59 = vcombine.high %v55_v53, %v55_v53  ;;  %v9150_v60 = vrot.slane %v55_v53, %v9116_v40 }
  0x33   :  { %v8283_v50 = vpack.c.bf16 %v88_v46, %v87_v45  ;;  %v54_v52 = vld [vmem:[#allocation2 + $0x8] sm:$0xff]  ;;  %8279 = vmatprep.subr.bf16.mxu1 %v13218_v0  ;;  %v57_v55 = vld [vmem:[#allocation2 + $0x20] sm:$0xff]  ;;  %v6868_v3 = vld [vmem:[%s13211_s1 + $0x1f0] sm:$0xff] }
  0x34   :  { %v9141_v56 = vld [vmem:[#allocation2 + $0x28] sm:$0xff]  ;;  %v9143_v57 = vcombine.low %v53_v51, %v54_v52  ;;  %v9145_v58 = vcombine.high %v53_v51, %v54_v52  ;;  %13310 = vst [vmem:[#allocation15_spill] sm:$0xff] %v9147_v59  ;;  %v9152_v61 = vcombine.low %v56_v54, %v57_v55  ;;  %v9161_v63 = vld [vmem:[%s13211_s1] sm:$0xff]  ;;  %v9171_v4 = vcombine.high %v56_v54, %v57_v55  ;;  %v6869_v9 = vld [vmem:[%s13211_s1 + $0x1f8] sm:$0xff] }
  0x35   :  { %v9156_v62 = vrot.slane %v9141_v56, %v9116_v40  ;;  %v9166_v2 = vld [vmem:[%s13211_s1 + $0x8] sm:$0xff]  ;;  %v9183_v7 = vrot.slane %v9147_v59, %v9116_v40  ;;  %v9193_v10 = vld [vmem:[%s13211_s1 + $0x170] sm:$0xff]  ;;  %v9198_v11 = vld [vmem:[%s13211_s1 + $0x178] sm:$0xff]  ;;  %8252 = vmatpush3.bf16.msra.mxu0 %v8251_v42  ;;  %v8257_v13 = vpack.c.bf16 %v6869_v9, %v6868_v3  ;;  %v9376_v35 = vcombine.high %v9141_v56, %v9141_v56 }
  0x36   :  { %13308 = vst [vmem:[#allocation13_spill] sm:$0xff] %v9143_v57  ;;  %13309 = vst [vmem:[#allocation14_spill] sm:$0xff] %v9145_v58  ;;  %v9175_v5 = vrot.slane %v9143_v57, %v9116_v40  ;;  %v9179_v6 = vrot.slane %v9145_v58, %v9116_v40  ;;  %8282 = vmatpush3.bf16.msk.msra.mxu1 %vm9064_vm8, %v8280_v43  ;;  %v9204_v12 = vrot.slane %v9152_v61, %v9116_v40  ;;  %v9211_v16 = vld [vmem:[%s13211_s1 + $0x90] sm:$0xff]  ;;  %v9216_v17 = vld [vmem:[%s13211_s1 + $0x98] sm:$0xff] }
  0x37   :  { %13311 = vst [vmem:[#allocation16_spill] sm:$0xff] %v9152_v61  ;;  %13312 = vst [vmem:[#allocation17_spill] sm:$0xff] %v9171_v4  ;;  %v8259_v14 = vpack.c.bf16 %v9198_v11, %v9193_v10  ;;  %v9221_v18 = vld [vmem:[%s13211_s1 + $0x10] sm:$0xff]  ;;  %8254 = vmatprep.subr.bf16.mxu0 %v8253_v48  ;;  %8284 = vmatprep.subr.bf16.mxu1 %v8283_v50  ;;  %v9236_v22 = vld [vmem:[%s13211_s1 + $0x18] sm:$0xff] }
  0x38   :  { %v197_v19 = vcombine.low %v9175_v5, %v9150_v60  ;;  %v9227_v20 = vcombine.high %v9175_v5, %v9150_v60  ;;  %v9231_v21 = vcombine.low %v9179_v6, %v9183_v7  ;;  %v6870_v23 = vld [vmem:[%s13211_s1 + $0x200] sm:$0xff]  ;;  %v6871_v24 = vld [vmem:[%s13211_s1 + $0x208] sm:$0xff]  ;;  %v200_v25 = vcombine.high %v9179_v6, %v9183_v7  ;;  %v6872_v45 = vld [vmem:[%s13211_s1 + $0x210] sm:$0xff]  ;;  %13314 = vst [vmem:[#allocation19_spill] sm:$0xff] %v9376_v35 }
  0x39   :  { %v232_v26 = vcombine.low %v9204_v12, %v9156_v62  ;;  %v9250_v27 = vcombine.high %v9204_v12, %v9156_v62  ;;  %v9257_v29 = vld [vmem:[%s13211_s1 + $0x180] sm:$0xff]  ;;  %v9262_v30 = vld [vmem:[%s13211_s1 + $0x188] sm:$0xff]  ;;  %8256 = vmatpush3.bf16.msra.mxu0 %v8255_v49  ;;  %v6873_v46 = vld [vmem:[%s13211_s1 + $0x218] sm:$0xff]  ;;  %v8261_v52 = vpack.c.bf16 %v6871_v24, %v6870_v23 }
  0x3a   :  { %13313 = vst [vmem:[#allocation18_spill] sm:$0xff] %v9231_v21  ;;  %v9267_v31 = vld [vmem:[%s13211_s1 + $0xa0] sm:$0xff]  ;;  %v6882_v32 = vrot.slane %v197_v19, 9  ;;  %v385_v33 = vrot.slane %v9227_v20, 7  ;;  %v388_v34 = vrot.slane %v9231_v21, 7  ;;  %v9276_v36 = vld [vmem:[%s13211_s1 + $0xa8] sm:$0xff]  ;;  %8258 = vmatprep.subr.bf16.mxu0 %v8257_v13  ;;  %v8263_v9 = vpack.c.bf16 %v9262_v30, %v9257_v29  ;;  %vm11555_vm14 = vmor %vm5512_vm12, %vm5513_vm13 }
  0x3b   :  { %v9281_v37 = vld [vmem:[%s13211_s1 + $0x20] sm:$0xff]  ;;  %v9286_v38 = vld [vmem:[%s13211_s1 + $0x28] sm:$0xff]  ;;  %v391_v39 = vrot.slane %v200_v25, 7  ;;  %v6883_v42 = vrot.slane %v232_v26, 9  ;;  %v395_v43 = vrot.slane %v9250_v27, 7  ;;  %v9300_v48 = vld [vmem:[%s13211_s1 + $0x190] sm:$0xff]  ;;  %v8265_v26 = vpack.c.bf16 %v6873_v46, %v6872_v45 }
  0x3c   :  { %v9304_v49 = vsel %vm9121_vm10, %v6882_v32, %v385_v33  ;;  %v387_v50 = vrot.slane %v385_v33, 2  ;;  %v390_v51 = vrot.slane %v388_v34, 2  ;;  %v9309_v53 = vld [vmem:[%s13211_s1 + $0x198] sm:$0xff]  ;;  %v9314_v54 = vld [vmem:[%s13211_s1 + $0xb0] sm:$0xff]  ;;  %v9344_v23 = vld [vmem:[%s13211_s1 + $0x220] sm:$0xff] }
  0x3d   :  { %v9319_v55 = vld [vmem:[%s13211_s1 + $0xb8] sm:$0xff]  ;;  %v9323_v3 = vsel %vm9121_vm10, %v6883_v42, %v395_v43  ;;  %v9334_v13 = vld [vmem:[%s13211_s1 + $0x30] sm:$0xff]  ;;  %v8267_v29 = vpack.c.bf16 %v9309_v53, %v9300_v48  ;;  %v6875_v30 = vld [vmem:[%s13211_s1 + $0x228] sm:$0xff]  ;;  %8260 = vmatpush3.bf16.msra.mxu0 %v8259_v14  ;;  %v9380_v14 = vrot.slane %v9171_v4, %v9116_v40  ;;  %v9400_v42 = vrot.slane %v9376_v35, %v9116_v40 }
  0x3e   :  { %v9339_v19 = vld [vmem:[%s13211_s1 + $0x38] sm:$0xff]  ;;  %v389_v24 = vsel %vm9121_vm10, %v387_v50, %v388_v34  ;;  %v392_v25 = vsel %vm9121_vm10, %v390_v51, %v391_v39  ;;  %v9358_v32 = vld [vmem:[%s13211_s1 + $0x1a0] sm:$0xff]  ;;  %v9363_v33 = vld [vmem:[%s13211_s1 + $0x1a8] sm:$0xff]  ;;  %8262 = vmatprep.subr.bf16.mxu0 %v8261_v52  ;;  %v8269_v51 = vpack.c.bf16 %v6875_v30, %v9344_v23  ;;  %v397_v10 = vrot.slane %v395_v43, 2 }
  0x3f   :  { %v444_v34 = vcombine.high %v9304_v49, %v389_v24  ;;  %v446_v39 = vcombine.high %v392_v25, %v9323_v3  ;;  %v59_v46 = vld [vmem:[#allocation2 + $0x30] sm:$0xff]  ;;  %v60_v48 = vld [vmem:[#allocation2 + $0x38] sm:$0xff]  ;;  %v61_v50 = vld [vmem:[#allocation2 + $0x40] sm:$0xff]  ;;  %13317 = vst [vmem:[#allocation22_spill] sm:$0xff] %v9400_v42  ;;  %v9429_v44 = vcombine.low %v9380_v14, %v9400_v42  ;;  %v445_v8 = vcombine.low %v392_v25, %v9323_v3 }
  0x40   :  { %v9385_v0 = vld [vmem:[%s13211_s1 + $0xc0] sm:$0xff]  ;;  %v9390_v52 = vld [vmem:[%s13211_s1 + $0xc8] sm:$0xff]  ;;  %v9394_v56 = vcombine.low %v59_v46, %v60_v48  ;;  %v9396_v45 = vcombine.high %v59_v46, %v60_v48  ;;  %v9402_v11 = vcombine.high %v61_v50, %v61_v50  ;;  %v9405_v53 = vrot.slane %v61_v50, %v9116_v40  ;;  %v63_v59 = vld [vmem:[#allocation2 + $0x50] sm:$0xff] }
  0x41   :  { %v460_v23 = vrot.slane %v444_v34, %v9116_v40  ;;  %v474_v30 = vrot.slane %v446_v39, %v9116_v40  ;;  %v9410_v34 = vld [vmem:[%s13211_s1 + $0x40] sm:$0xff]  ;;  %v9415_v39 = vld [vmem:[%s13211_s1 + $0x48] sm:$0xff]  ;;  %8264 = vmatpush3.bf16.msra.mxu0 %v8263_v9  ;;  %v398_v25 = vrot.slane %v9429_v44, 7  ;;  %v13323_v35 = vpack.c.bf16 %v9216_v17, %v9211_v16  ;;  %v64_v17 = vld [vmem:[#allocation2 + $0x58] sm:$0xff] }
  0x42   :  { %13315 = vst [vmem:[#allocation20_spill] sm:$0xff] %v9394_v56  ;;  %13316 = vst [vmem:[#allocation21_spill] sm:$0xff] %v9396_v45  ;;  %v9419_v48 = vrot.slane %v9394_v56, %v9116_v40  ;;  %v9423_v50 = vrot.slane %v9396_v45, %v9116_v40  ;;  %8266 = vmatprep.subr.bf16.mxu0 %v8265_v26  ;;  %v9435_v9 = vrot.slane %v9402_v11, %v9116_v40  ;;  %v6928_v28 = vld [vmem:[%s13211_s1 + $0x2e0] sm:$0xff]  ;;  %v6929_v26 = vld [vmem:[%s13211_s1 + $0x2e8] sm:$0xff]  ;;  %v13321_v45 = vmov 0.0  }
  0x43   :  { %13318 = vst [vmem:[#allocation23_spill] sm:$0xff] %v9402_v11  ;;  %v477_v46 = vcombine.low %v460_v23, %v474_v30  ;;  %v235_v23 = vcombine.high %v9380_v14, %v9400_v42  ;;  %v443_v30 = vcombine.low %v9304_v49, %v389_v24  ;;  %v9457_v24 = vld [vmem:[%s13211_s1 + $0x260] sm:$0xff]  ;;  %v13320_v11 = vpack.c.bf16 %v9166_v2, %v9161_v63  ;;  %v62_v61 = vld [vmem:[#allocation2 + $0x48] sm:$0xff]  ;;  %v6923_v41 = vld [vmem:[%s13211_s1 + $0x2b8] sm:$0xff] }
  0x44   :  { %13319 = vst [vmem:[#allocation24_spill] sm:$0xff] %v9435_v9  ;;  %v267_v43 = vcombine.low %v9419_v48, %v9405_v53  ;;  %v9449_v1 = vcombine.high %v9419_v48, %v9405_v53  ;;  %v9469_v3 = vcombine.low %v9423_v50, %v9435_v9  ;;  %v467_v2 = vrot.slane %v445_v8, %v9116_v40  ;;  %vm11782_vm6 = vmor %vm5979_vm15, %vm5980_vm3 }
  0x45   :  { %7996 = vmatmul.mubr.msk.f32.vlgmr.msra.gmra.mrb[0].mxu1 %vm610_vm11, %v477_v46  ;;  %v6913_v46 = vld [vmem:[%s13211_s1 + $0x268] sm:$0xff]  ;;  %v401_v49 = vrot.slane %v235_v23, 7  ;;  %v453_v56 = vrot.slane %v443_v30, %v9116_v40  ;;  %8268 = vmatpush3.bf16.msra.mxu0 %v8267_v29  ;;  %v9480_v58 = vsel %vm9121_vm10, %v397_v10, %v398_v25  ;;  %v400_v23 = vrot.slane %v398_v25, 2  ;;  %v9528_v25 = vld [vmem:[%s13211_s1 + $0x50] sm:$0xff]  ;;  %vm12102_vm7 = vmor %vm376_vm0, %vm379_vm4 }
  0x46   :  { %8286 = vmatpush3.bf16.msra.mxu1 %v13320_v11  ;;  %7998 = vmatprep.mubr.msk.f32.mxu1 %vm8965_vm1, %v13321_v45  ;;  %13322 = vst [vmem:[#allocation25_spill] sm:$0xff] %v9469_v3  ;;  %v6884_v4 = vrot.slane %v267_v43, 9  ;;  %v405_v63 = vrot.slane %v9449_v1, 7  ;;  %v8325_v11 = vpack.c.bf16 %v6929_v26, %v6928_v28  ;;  %v408_v30 = vrot.slane %v9469_v3, 7 }
  0x47   :  { %8288 = vmatprep.subr.bf16.mxu1 %v13323_v35  ;;  %8270 = vmatprep.subr.bf16.mxu0 %v8269_v51  ;;  %v8327_v16 = vpack.c.bf16 %v6913_v46, %v9457_v24  ;;  %v476_v8 = vcombine.high %v453_v56, %v467_v2  ;;  %v475_v28 = vcombine.low %v453_v56, %v467_v2  ;;  %v6930_v2 = vld [vmem:[%s13211_s1 + $0x2f0] sm:$0xff]  ;;  %vm1961_vm0 = vcmask 1045504  }
  0x48   :  { %v9486_v35 = vsel %vm9121_vm10, %v6884_v4, %v405_v63  ;;  %v407_v29 = vrot.slane %v405_v63, 2  ;;  %v13324_v51 = vpack.c.bf16 %v9236_v22, %v9221_v18  ;;  %v9493_v10 = vsel %vm9121_vm10, %v400_v23, %v401_v49  ;;  %v9504_v4 = vld [vmem:[%s13211_s1 + $0xd0] sm:$0xff]  ;;  %v9509_v18 = vld [vmem:[%s13211_s1 + $0xd8] sm:$0xff] }
  0x49   :  { %v270_v43 = vcombine.high %v9423_v50, %v9435_v9  ;;  %v9497_v26 = vcombine.low %v62_v61, %v63_v59  ;;  %v9499_v24 = vcombine.high %v62_v61, %v63_v59  ;;  %v13327_v22 = vpack.c.bf16 %v9276_v36, %v9267_v31  ;;  %v9533_v31 = vld [vmem:[%s13211_s1 + $0x58] sm:$0xff]  ;;  %689 = vmatprep.mubr.f32.mxu0 %v476_v8 }
  0x4a   :  { %8290 = vmatpush3.bf16.msra.mxu1 %v13324_v51  ;;  %v13328_v56 = vpack.c.bf16 %v9363_v33, %v9358_v32  ;;  %v9519_v59 = vsel %vm9121_vm10, %v407_v29, %v408_v30  ;;  %v479_v61 = vcombine.high %v9480_v58, %v9493_v10  ;;  %v9523_v49 = vcombine.high %v64_v17, %v64_v17  ;;  %v6931_v8 = vld [vmem:[%s13211_s1 + $0x2f8] sm:$0xff]  ;;  %v6914_v51 = vld [vmem:[%s13211_s1 + $0x270] sm:$0xff] }
  0x4b   :  { %13325 = vst [vmem:[#allocation26_spill] sm:$0xff] %v9497_v26  ;;  %13326 = vst [vmem:[#allocation27_spill] sm:$0xff] %v9499_v24  ;;  %8292 = vmatprep.subr.bf16.mxu1 %v13327_v22  ;;  %v410_v46 = vrot.slane %v408_v30, 2  ;;  %v481_v36 = vcombine.high %v9486_v35, %v9519_v59  ;;  %v9539_v32 = vrot.slane %v9497_v26, %v9116_v40  ;;  %v411_v63 = vrot.slane %v270_v43, 7 }
  0x4c   :  { %8272 = vmatpush3.bf16.msra.mxu0 %v13328_v56  ;;  %13329 = vst [vmem:[#allocation28_spill] sm:$0xff] %v9523_v49  ;;  %v9543_v33 = vrot.slane %v9499_v24, %v9116_v40  ;;  %v495_v23 = vrot.slane %v479_v61, %v9116_v40  ;;  %v9550_v30 = vrot.slane %v64_v17, %v9116_v40  ;;  %v6915_v17 = vld [vmem:[%s13211_s1 + $0x278] sm:$0xff]  ;;  %v65_v56 = vld [vmem:[#allocation2 + $0x60] sm:$0xff]  ;;  %v66_v61 = vld [vmem:[#allocation2 + $0x68] sm:$0xff] }
  0x4d   :  { %8326 = vmatprep.subr.bf16.mxu0 %v8325_v11  ;;  %v9554_v11 = vrot.slane %v9523_v49, %v9116_v40  ;;  %v8303_v29 = vpack.c.bf16 %v9509_v18, %v9504_v4  ;;  %v13331_v43 = vpack.c.bf16 %v9286_v38, %v9281_v37  ;;  %v509_v22 = vrot.slane %v481_v36, %v9116_v40 }
  0x4e   :  { %v9573_v4 = vsel %vm9121_vm10, %v410_v46, %v411_v63  ;;  %v13332_v49 = vpack.c.bf16 %v9319_v55, %v9314_v54  ;;  %v302_v37 = vcombine.low %v9539_v32, %v9550_v30  ;;  %v9584_v38 = vcombine.high %v9539_v32, %v9550_v30  ;;  %v67_v46 = vld [vmem:[#allocation2 + $0x70] sm:$0xff] }
  0x4f   :  { %13330 = vst [vmem:[#allocation29_spill] sm:$0xff] %v9554_v11  ;;  %8294 = vmatpush3.bf16.msra.mxu1 %v13331_v43  ;;  %690 = vmatmul.mubr.f32.vlgmr.msra.gmra.mrb[0].mxu0 %v475_v28  ;;  %v9588_v28 = vcombine.low %v9543_v33, %v9554_v11  ;;  %v512_v36 = vcombine.low %v495_v23, %v509_v22  ;;  %v68_v22 = vld [vmem:[#allocation2 + $0x78] sm:$0xff] }
  0x50   :  { %8296 = vmatprep.subr.bf16.mxu1 %v13332_v49  ;;  %8328 = vmatpush3.bf16.msra.mxu0 %v8327_v16  ;;  %v305_v63 = vcombine.high %v9543_v33, %v9554_v11  ;;  %v8329_v43 = vpack.c.bf16 %v6931_v8, %v6930_v2  ;;  %v8331_v54 = vpack.c.bf16 %v6915_v17, %v6914_v51  ;;  %v6885_v55 = vrot.slane %v302_v37, 9 }
  0x51   :  { %13333 = vst [vmem:[#allocation30_spill] sm:$0xff] %v9588_v28  ;;  %v415_v16 = vrot.slane %v9584_v38, 7  ;;  %v418_v49 = vrot.slane %v9588_v28, 7  ;;  %v9594_v18 = vcombine.low %v65_v56, %v66_v61  ;;  %v13335_v24 = vpack.c.bf16 %v9339_v19, %v9334_v13  ;;  %7999 = vmatmul.mubr.msk.f32.gmra.mrb[2].mxu1 %vm610_vm11, %v512_v36 }
  0x52   :  { %v421_v26 = vrot.slane %v305_v63, 7  ;;  %8330 = vmatprep.subr.bf16.mxu0 %v8329_v43  ;;  %v9599_v57 = vcombine.high %v65_v56, %v66_v61  ;;  %v9601_v23 = vcombine.high %v67_v46, %v67_v46  ;;  %v9604_v2 = vrot.slane %v67_v46, %v9116_v40  ;;  %8001 = vmatprep.mubr.msk.f32.mxu1 %vm8965_vm1, %v13321_v45  ;;  %v99_v43 = vld [vmem:[%s13211_s1 + $0xe0] sm:$0xff] }
  0x53   :  { %13334 = vst [vmem:[#allocation31_spill] sm:$0xff] %v9594_v18  ;;  %8298 = vmatpush3.bf16.msra.mxu1 %v13335_v24  ;;  %v13339_v8 = vpack.c.bf16 %v9390_v52, %v9385_v0  ;;  %v9612_v51 = vsel %vm9121_vm10, %v6885_v55, %v415_v16  ;;  %v417_v13 = vrot.slane %v415_v16, 2  ;;  %v420_v19 = vrot.slane %v418_v49, 2  ;;  %v69_v0 = vld [vmem:[#allocation2 + $0x80] sm:$0xff]  ;;  %v70_v52 = vld [vmem:[#allocation2 + $0x88] sm:$0xff] }
  0x54   :  { %13336 = vst [vmem:[#allocation32_spill] sm:$0xff] %v9599_v57  ;;  %13337 = vst [vmem:[#allocation33_spill] sm:$0xff] %v9601_v23  ;;  %v9616_v24 = vrot.slane %v9594_v18, %v9116_v40  ;;  %v514_v17 = vcombine.high %v9573_v4, %v9612_v51  ;;  %8332 = vmatpush3.bf16.msra.mxu0 %v8331_v54  ;;  %v9624_v56 = vrot.slane %v9599_v57, %v9116_v40  ;;  %v100_v54 = vld [vmem:[%s13211_s1 + $0xe8] sm:$0xff]  ;;  %v6916_v18 = vld [vmem:[%s13211_s1 + $0x280] sm:$0xff] }
  0x55   :  { %13338 = vst [vmem:[#allocation34_spill] sm:$0xff] %v9604_v2  ;;  %8300 = vmatprep.subr.bf16.mxu1 %v13339_v8  ;;  %v9628_v61 = vrot.slane %v9601_v23, %v9116_v40  ;;  %v9632_v37 = vsel %vm9121_vm10, %v417_v13, %v418_v49  ;;  %v9636_v46 = vsel %vm9121_vm10, %v420_v19, %v421_v26  ;;  %v83_v13 = vld [vmem:[%s13211_s1 + $0x60] sm:$0xff]  ;;  %v6933_v57 = vld [vmem:[%s13211_s1 + $0x308] sm:$0xff] }
  0x56   :  { %v337_v36 = vcombine.low %v9616_v24, %v9604_v2  ;;  %v9642_v63 = vcombine.high %v9616_v24, %v9604_v2  ;;  %v13342_v55 = vpack.c.bf16 %v9415_v39, %v9410_v34  ;;  %v516_v26 = vcombine.high %v9632_v37, %v9636_v46  ;;  %v84_v34 = vld [vmem:[%s13211_s1 + $0x68] sm:$0xff]  ;;  %v6932_v39 = vld [vmem:[%s13211_s1 + $0x300] sm:$0xff] }
  0x57   :  { %13340 = vst [vmem:[#allocation35_spill] sm:$0xff] %v9628_v61  ;;  %v530_v16 = vrot.slane %v514_v17, %v9116_v40  ;;  %v9658_v49 = vcombine.low %v9624_v56, %v9628_v61  ;;  %v340_v8 = vcombine.high %v9624_v56, %v9628_v61  ;;  %v9671_v19 = vcombine.low %v68_v22, %v69_v0 }
  0x58   :  { %13341 = vst [vmem:[#allocation36_spill] sm:$0xff] %v9642_v63  ;;  %8302 = vmatpush3.bf16.msra.mxu1 %v13342_v55  ;;  %v9674_v17 = vrot.slane %v70_v52, %v9116_v40  ;;  %v6886_v55 = vrot.slane %v337_v36, 9  ;;  %v425_v23 = vrot.slane %v9642_v63, 7  ;;  %v544_v47 = vrot.slane %v516_v26, %v9116_v40 }
  0x59   :  { %13343 = vst [vmem:[#allocation37_spill] sm:$0xff] %v9658_v49  ;;  %8304 = vmatprep.subr.bf16.mxu1 %v8303_v29  ;;  %13344 = vst [vmem:[#allocation38_spill] sm:$0xff] %v9671_v19  ;;  %v6917_v29 = vld [vmem:[%s13211_s1 + $0x288] sm:$0xff]  ;;  %v428_v11 = vrot.slane %v9658_v49, 7  ;;  %v431_v42 = vrot.slane %v340_v8, 7  ;;  %v8307_v36 = vpack.c.bf16 %v100_v54, %v99_v43  ;;  %v9690_v3 = vrot.slane %v9671_v19, %v9116_v40  ;;  %v101_v43 = vld [vmem:[%s13211_s1 + $0xf0] sm:$0xff] }
  0x5a   :  { %v9694_v21 = vsel %vm9121_vm10, %v6886_v55, %v425_v23  ;;  %v427_v2 = vrot.slane %v425_v23, 2  ;;  %v8309_v61 = vpack.c.bf16 %v84_v34, %v83_v13  ;;  %v547_v63 = vcombine.low %v530_v16, %v544_v47  ;;  %v102_v54 = vld [vmem:[%s13211_s1 + $0xf8] sm:$0xff]  ;;  %v85_v23 = vld [vmem:[%s13211_s1 + $0x70] sm:$0xff]  ;;  %v6936_v55 = vld [vmem:[%s13211_s1 + $0x320] sm:$0xff] }
  0x5b   :  { %v13345_v28 = vpack.c.bf16 %v9533_v31, %v9528_v25  ;;  %v430_v26 = vrot.slane %v428_v11, 2  ;;  %v8333_v9 = vpack.c.bf16 %v6933_v57, %v6932_v39  ;;  %v8335_v49 = vpack.c.bf16 %v6917_v29, %v6916_v18  ;;  %v86_v18 = vld [vmem:[%s13211_s1 + $0x78] sm:$0xff]  ;;  %v6937_v29 = vld [vmem:[%s13211_s1 + $0x328] sm:$0xff] }
  0x5c   :  { %v372_v47 = vcombine.low %v9690_v3, %v9674_v17  ;;  %v9712_v25 = vcombine.high %v9690_v3, %v9674_v17  ;;  %v9716_v57 = vsel %vm9121_vm10, %v427_v2, %v428_v11  ;;  %v9718_v31 = vcombine.high %v68_v22, %v69_v0  ;;  %v6935_v16 = vld [vmem:[%s13211_s1 + $0x318] sm:$0xff]  ;;  %8002 = vmatmul.mubr.msk.f32.gmra.mrb[4].mxu1 %vm610_vm11, %v547_v63 }
  0x5d   :  { %8306 = vmatpush3.bf16.msra.mxu1 %v13345_v28  ;;  %v6934_v28 = vld [vmem:[%s13211_s1 + $0x310] sm:$0xff]  ;;  %v9732_v11 = vsel %vm9121_vm10, %v430_v26, %v431_v42  ;;  %v549_v2 = vcombine.high %v9694_v21, %v9716_v57  ;;  %8334 = vmatprep.subr.bf16.mxu0 %v8333_v9  ;;  %v9736_v22 = vcombine.high %v70_v52, %v70_v52  ;;  %v6919_v9 = vld [vmem:[%s13211_s1 + $0x298] sm:$0xff] }
  0x5e   :  { %8308 = vmatprep.subr.bf16.mxu1 %v8307_v36  ;;  %13346 = vst [vmem:[#allocation39_spill] sm:$0xff] %v9718_v31  ;;  %8004 = vmatprep.mubr.msk.f32.mxu1 %vm8965_vm1, %v13321_v45  ;;  %v6887_v0 = vrot.slane %v372_v47, 9  ;;  %v435_v8 = vrot.slane %v9712_v25, 7  ;;  %v9743_v63 = vrot.slane %v9718_v31, %v9116_v40  ;;  %v8311_v13 = vpack.c.bf16 %v102_v54, %v101_v43  ;;  %v6918_v42 = vld [vmem:[%s13211_s1 + $0x290] sm:$0xff] }
  0x5f   :  { %13347 = vst [vmem:[#allocation40_spill] sm:$0xff] %v9736_v22  ;;  %8336 = vmatpush3.bf16.msra.mxu0 %v8335_v49  ;;  %v565_v52 = vrot.slane %v549_v2, %v9116_v40  ;;  %v9754_v34 = vrot.slane %v9736_v22, %v9116_v40  ;;  %v8313_v49 = vpack.c.bf16 %v86_v18, %v85_v23 }
  0x60   :  { %v8337_v39 = vpack.c.bf16 %v6935_v16, %v6934_v28  ;;  %v9764_v36 = vsel %vm9121_vm10, %v6887_v0, %v435_v8  ;;  %v437_v26 = vrot.slane %v435_v8, 2  ;;  %v9770_v43 = vrot.slane %v9175_v5, %v9116_v40 }
  0x61   :  { %8310 = vmatpush3.bf16.msra.mxu1 %v8309_v61  ;;  %v6894_v61 = vcombine.low %v9179_v6, %v9204_v12  ;;  %v551_v54 = vcombine.high %v9732_v11, %v9764_v36  ;;  %v9776_v23 = vcombine.low %v9743_v63, %v9754_v34  ;;  %v375_v47 = vcombine.high %v9743_v63, %v9754_v34 }
  0x62   :  { %8312 = vmatprep.subr.bf16.mxu1 %v8311_v13  ;;  %8338 = vmatprep.subr.bf16.mxu0 %v8337_v39  ;;  %v8339_v18 = vpack.c.bf16 %v6919_v9, %v6918_v42  ;;  %v478_v16 = vcombine.low %v9480_v58, %v9493_v10  ;;  %v480_v5 = vcombine.low %v9486_v35, %v9519_v59  ;;  %v6920_v9 = vld [vmem:[%s13211_s1 + $0x2a0] sm:$0xff]  ;;  %v6921_v58 = vld [vmem:[%s13211_s1 + $0x2a8] sm:$0xff]  ;;  %v6939_v39 = vld [vmem:[%s13211_s1 + $0x338] sm:$0xff] }
  0x63   :  { %v9781_v28 = vrot.slane %v6894_v61, %v9116_v40  ;;  %v8341_v2 = vpack.c.bf16 %v6937_v29, %v6936_v55  ;;  %v579_v0 = vrot.slane %v551_v54, %v9116_v40  ;;  %v438_v8 = vrot.slane %v9776_v23, 7 }
  0x64   :  { %v441_v13 = vrot.slane %v375_v47, 7  ;;  %8340 = vmatpush3.bf16.msra.mxu0 %v8339_v18  ;;  %v6896_v42 = vcombine.low %v9250_v27, %v9380_v14  ;;  %v488_v59 = vrot.slane %v478_v16, %v9116_v40  ;;  %v6938_v27 = vld [vmem:[%s13211_s1 + $0x330] sm:$0xff]  ;;  %v13348_v47 = vmov 0.0|0.0  }
  0x65   :  { %8314 = vmatpush3.bf16.msra.mxu1 %v8313_v49  ;;  %v837_v35 = vcombine.low %v9770_v43, %v9781_v28  ;;  %v838_v10 = vcombine.high %v9770_v43, %v9781_v28  ;;  %v502_v49 = vrot.slane %v480_v5, %v9116_v40  ;;  %8342 = vmatprep.subr.bf16.mxu0 %v8341_v2  ;;  %v440_v61 = vrot.slane %v438_v8, 2  ;;  %v9971_v43 = vld [vmem:[%s13213_s3 + $0x1b8] sm:$0xff] }
  0x66   :  { %v582_v55 = vcombine.low %v565_v52, %v579_v0  ;;  %v9811_v29 = vsel %vm9121_vm10, %v437_v26, %v438_v8  ;;  %v9814_v54 = vrot.slane %v6896_v42, %v9116_v40  ;;  %8315 = vmatprep.subr.bf16.mxu1 %v13348_v47  ;;  %v9819_v5 = vrot.slane %v9419_v48, %v9116_v40  ;;  %v9824_v52 = vld [vmem:[%s13211_s1 + $0x100] sm:$0xff]  ;;  %v9838_v42 = vld [vmem:[%s13211_s1 + $0x108] sm:$0xff] }
  0x67   :  { %v511_v18 = vcombine.high %v488_v59, %v502_v49  ;;  %v510_v16 = vcombine.low %v488_v59, %v502_v49  ;;  %v8343_v2 = vpack.c.bf16 %v6921_v58, %v6920_v9  ;;  %v9829_v26 = vsel %vm9121_vm10, %v440_v61, %v441_v13  ;;  %v6922_v9 = vld [vmem:[%s13211_s1 + $0x2b0] sm:$0xff]  ;;  %v6940_v49 = vld [vmem:[%s13211_s1 + $0x340] sm:$0xff] }
  0x68   :  { %8005 = vmatmul.mubr.msk.f32.gmra.mrb[6].mxu1 %vm610_vm11, %v582_v55  ;;  %v513_v0 = vcombine.low %v9573_v4, %v9612_v51  ;;  %v515_v8 = vcombine.low %v9632_v37, %v9636_v46  ;;  %v8345_v48 = vpack.c.bf16 %v6939_v39, %v6938_v27  ;;  %v584_v4 = vcombine.high %v9811_v29, %v9829_v26  ;;  %v6941_v27 = vld [vmem:[%s13211_s1 + $0x348] sm:$0xff] }
  0x69   :  { %8007 = vmatprep.mubr.msk.f32.mxu1 %vm8965_vm1, %v13321_v45  ;;  %694 = vmatprep.mubr.f32.mxu0 %v511_v18  ;;  %v873_v51 = vcombine.high %v9814_v54, %v9819_v5  ;;  %v872_v37 = vcombine.low %v9814_v54, %v9819_v5  ;;  %v6898_v58 = vcombine.low %v9423_v50, %v9539_v32  ;;  %vm5379_vm10 = vcmask 1044480  }
  0x6a   :  { %695 = vmatmul.mubr.f32.gmra.mrb[2].mxu0 %v510_v16  ;;  %v523_v46 = vrot.slane %v513_v0, %v9116_v40  ;;  %v537_v13 = vrot.slane %v515_v8, %v9116_v40  ;;  %v6900_v59 = vcombine.low %v9584_v38, %v9543_v33  ;;  %v598_v39 = vrot.slane %v584_v4, %v9116_v40  ;;  %v6924_v38 = vld [vmem:[%s13211_s1 + $0x2c0] sm:$0xff]  ;;  %v6925_v16 = vld [vmem:[%s13211_s1 + $0x2c8] sm:$0xff] }
  0x6b   :  { %8344 = vmatpush3.bf16.msra.mxu0 %v8343_v2  ;;  %v8316_v55 = vpack.c.bf16 %v9838_v42, %v9824_v52  ;;  %v8347_v61 = vpack.c.bf16 %v6923_v41, %v6922_v9  ;;  %v548_v18 = vcombine.low %v9694_v21, %v9716_v57  ;;  %v9878_v2 = vrot.slane %v6898_v58, %v9116_v40  ;;  %v9886_v21 = vld [vmem:[%s13211_s1 + $0x110] sm:$0xff]  ;;  %v9891_v57 = vld [vmem:[%s13211_s1 + $0x118] sm:$0xff] }
  0x6c   :  { %v546_v0 = vcombine.high %v523_v46, %v537_v13  ;;  %v545_v8 = vcombine.low %v523_v46, %v537_v13  ;;  %8346 = vmatprep.subr.bf16.mxu0 %v8345_v48  ;;  %v9881_v52 = vrot.slane %v6900_v59, %v9116_v40  ;;  %v9896_v48 = vld [vmem:[%s13211_s1 + $0x350] sm:$0xff]  ;;  %8008 = vmatmul.mubr.msk.f32.gmra.mrb[8].mxu1 %vm610_vm11, %v598_v39  ;;  %v6943_v46 = vld [vmem:[%s13211_s1 + $0x358] sm:$0xff] }
  0x6d   :  { %v550_v42 = vcombine.low %v9732_v11, %v9764_v36  ;;  %v558_v9 = vrot.slane %v548_v18, %v9116_v40  ;;  %v8349_v41 = vpack.c.bf16 %v6941_v27, %v6940_v49  ;;  %v6902_v4 = vcombine.low %v9624_v56, %v9690_v3  ;;  %v9910_v13 = vld [vmem:[%s13211_s1 + $0x2d0] sm:$0xff]  ;;  %v9915_v58 = vld [vmem:[%s13211_s1 + $0x2d8] sm:$0xff]  ;;  %1049 = vmatprep.mubr.f32.mxu1 %v838_v10 }
  0x6e   :  { %699 = vmatprep.mubr.f32.mxu0 %v546_v0  ;;  %v908_v11 = vcombine.high %v9878_v2, %v9881_v52  ;;  %v907_v36 = vcombine.low %v9878_v2, %v9881_v52  ;;  %v9923_v59 = vrot.slane %v9616_v24, %v9116_v40  ;;  %v8351_v39 = vpack.c.bf16 %v6925_v16, %v6924_v38  ;;  %v9961_v16 = vld [vmem:[%s13211_s1 + $0x368] sm:$0xff]  ;;  %v10065_v2 = vld [vmem:[%s13213_s3 + $0x1d8] sm:$0xff] }
  0x6f   :  { %700 = vmatmul.mubr.f32.gmra.mrb[4].mxu0 %v545_v8  ;;  %v572_v49 = vrot.slane %v550_v42, %v9116_v40  ;;  %v9927_v27 = vrot.slane %v6902_v4, %v9116_v40  ;;  %v583_v10 = vcombine.low %v9811_v29, %v9829_v26  ;;  %v8319_v18 = vpack.c.bf16 %v9891_v57, %v9886_v21  ;;  %v9941_v42 = vld [vmem:[%s13211_s1 + $0x120] sm:$0xff]  ;;  %v9946_v29 = vld [vmem:[%s13211_s1 + $0x128] sm:$0xf]  ;;  %v9966_v21 = vld [vmem:[%s13213_s3 + $0x1b0] sm:$0xff] }
  0x70   :  { %8348 = vmatpush3.bf16.msra.mxu0 %v8347_v61  ;;  %v8353_v0 = vpack.c.bf16 %v6943_v46, %v9896_v48  ;;  %v6904_v24 = vcombine.low %v9712_v25, %v9743_v63  ;;  %v8355_v8 = vpack.c.bf16 %v9915_v58, %v9910_v13  ;;  %v9951_v26 = vld [vmem:[%s13211_s1 + $0x360] sm:$0xff]  ;;  %1050 = vmatmul.mubr.f32.vlgmr.msra.gmra.mrb[10].mxu1 %v837_v35 }
  0x71   :  { %v581_v25 = vcombine.high %v558_v9, %v572_v49  ;;  %v580_v61 = vcombine.low %v558_v9, %v572_v49  ;;  %8350 = vmatprep.subr.bf16.mxu0 %v8349_v41  ;;  %v943_v38 = vcombine.high %v9923_v59, %v9927_v27  ;;  %1054 = vmatprep.mubr.f32.mxu1 %v873_v51  ;;  %v9994_v41 = vld [vmem:[%s13213_s3 + $0x138] sm:$0xff]  ;;  %v10012_v49 = vld [vmem:[%s13213_s3 + $0x1c0] sm:$0xff] }
  0x72   :  { %8317 = vmatpush3.bf16.msra.mxu1 %v8316_v55  ;;  %v591_v28 = vrot.slane %v583_v10, %v9116_v40  ;;  %v942_v35 = vcombine.low %v9923_v59, %v9927_v27  ;;  %v9977_v57 = vrot.slane %v6904_v24, %v9116_v40  ;;  %v8322_v48 = vpack.c.bf16 %v9946_v29, %v9941_v42  ;;  %v9989_v55 = vld [vmem:[%s13213_s3 + $0x130] sm:$0xff]  ;;  %v10017_v10 = vld [vmem:[%s13213_s3 + $0x1c8] sm:$0xff] }
  0x73   :  { %704 = vmatprep.mubr.f32.mxu0 %v581_v25  ;;  %8318 = vmatprep.subr.bf16.mxu1 %v13348_v47  ;;  %v6950_v9 = vcombine.low %v9227_v20, %v9179_v6  ;;  %v6952_v51 = vcombine.high %v9179_v6, %v9204_v12  ;;  %v8358_v20 = vpack.c.bf16 %v9961_v16, %v9951_v26  ;;  %v10034_v29 = vld [vmem:[%s13213_s3 + $0x148] sm:$0xff]  ;;  %v6946_v26 = vld [vmem:[%s13211_s1 + $0x370] sm:$0xff]  ;;  %v6947_v16 = vld [vmem:[%s13211_s1 + $0x378] sm:$0xff] }
  0x74   :  { %705 = vmatmul.mubr.f32.gmra.mrb[6].mxu0 %v580_v61  ;;  %v599_v4 = vcombine.high %v591_v28, %v591_v28  ;;  %v961_v46 = vcombine.high %v9977_v57, %v9977_v57  ;;  %v8367_v6 = vpack.c.bf16 %v9971_v43, %v9966_v21  ;;  %1055 = vmatmul.mubr.f32.gmra.mrb[12].mxu1 %v872_v37  ;;  %v10060_v21 = vld [vmem:[%s13213_s3 + $0x1d0] sm:$0xff] }
  0x75   :  { %8352 = vmatpush3.bf16.msra.mxu0 %v8351_v39  ;;  %v1313_v12 = vrot.slane %v6950_v9, %v9116_v40  ;;  %v1327_v13 = vrot.slane %v6952_v51, %v9116_v40  ;;  %v6895_v58 = vcombine.low %v9183_v7, %v9156_v62  ;;  %1059 = vmatprep.mubr.f32.mxu1 %v908_v11  ;;  %v10029_v11 = vld [vmem:[%s13213_s3 + $0x140] sm:$0xff]  ;;  %v10085_v9 = vld [vmem:[%s13213_s3 + $0x158] sm:$0xff] }
  0x76   :  { %709 = vmatprep.mubr.f32.mxu0 %v599_v4  ;;  %v822_v54 = vrot.slane %v9150_v60, %v9116_v40  ;;  %v8369_v5 = vpack.c.bf16 %v9994_v41, %v9989_v55  ;;  %v6954_v37 = vcombine.low %v9449_v1, %v9423_v50  ;;  %8320 = vmatpush3.bf16.msra.mxu1 %v8319_v18  ;;  %v13356_v55 = vld [vmem:[#allocation25_spill] sm:$0xff] }
  0x77   :  { %8354 = vmatprep.subr.bf16.mxu0 %v8353_v0  ;;  %v1335_v39 = vcombine.low %v1313_v12, %v1327_v13  ;;  %v1336_v24 = vcombine.high %v1313_v12, %v1327_v13  ;;  %v836_v42 = vrot.slane %v6895_v58, %v9116_v40  ;;  %8321 = vmatprep.subr.bf16.mxu1 %v13348_v47  ;;  %v13350_v12 = vld [vmem:[#allocation30_spill] sm:$0xff] }
  0x78   :  { %710 = vmatmul.mubr.f32.gmra.mrb[8].mxu0 %v591_v28  ;;  %v1348_v1 = vrot.slane %v9380_v14, %v9116_v40  ;;  %v1362_v18 = vrot.slane %v6954_v37, %v9116_v40  ;;  %v8371_v0 = vpack.c.bf16 %v10017_v10, %v10012_v49  ;;  %1060 = vmatmul.mubr.f32.gmra.mrb[14].mxu1 %v907_v36  ;;  %v10107_v58 = vld [vmem:[%s13213_s3 + $0x1e8] sm:$0xff]  ;;  %v10290_v49 = vld [vmem:[%s13213_s3 + $0x1a0] sm:$0xff] }
  0x79   :  { %8356 = vmatpush3.bf16.msra.mxu0 %v8355_v8  ;;  %v10048_v25 = vcombine.low %v822_v54, %v836_v42  ;;  %v6897_v61 = vcombine.high %v9156_v62, %v9429_v44  ;;  %v871_v14 = vrot.slane %v9405_v53, %v9116_v40  ;;  %1064 = vmatprep.mubr.f32.mxu1 %v943_v38  ;;  %v10080_v38 = vld [vmem:[%s13213_s3 + $0x150] sm:$0xff]  ;;  %v10119_v54 = vld [vmem:[%s13213_s3 + $0x160] sm:$0xff]  ;;  %v10124_v37 = vld [vmem:[%s13213_s3 + $0x168] sm:$0xff] }
  0x7a   :  { %1547 = vmatprep.mubr.f32.mxu0 %v1336_v24  ;;  %v1371_v44 = vcombine.high %v1348_v1, %v1362_v18  ;;  %v1370_v52 = vcombine.low %v1348_v1, %v1362_v18  ;;  %v8373_v36 = vpack.c.bf16 %v10034_v29, %v10029_v11  ;;  %8324 = vmatpush3.bf16.msk.msra.mxu1 %vm9064_vm8, %v8322_v48  ;;  %v6948_v1 = vld [vmem:[%s13211_s1 + $0x380] sm:$0xff]  ;;  %v6949_v18 = vld [vmem:[%s13211_s1 + $0x388] sm:$0xf] }
  0x7b   :  { %8357 = vmatprep.subr.bf16.mxu0 %v13348_v47  ;;  %v857_v8 = vrot.slane %v6897_v61, %v9116_v40  ;;  %v6956_v43 = vcombine.high %v9423_v50, %v9539_v32  ;;  %v1397_v28 = vrot.slane %v9543_v33, %v9116_v40  ;;  %8368 = vmatprep.subr.bf16.mxu1 %v8367_v6  ;;  %v13349_v50 = vld [vmem:[#allocation24_spill] sm:$0xff]  ;;  %v10102_v6 = vld [vmem:[%s13213_s3 + $0x1e0] sm:$0xff] }
  0x7c   :  { %1548 = vmatmul.mubr.f32.vlgmr.msra.gmra.mrb[10].mxu0 %v1335_v39  ;;  %v8361_v48 = vpack.c.bf16 %v6947_v16, %v6946_v26  ;;  %v8375_v51 = vpack.c.bf16 %v10065_v2, %v10060_v21  ;;  %v6899_v32 = vcombine.low %v13349_v50, %v9550_v30  ;;  %1065 = vmatmul.mubr.f32.gmra.mrb[16].mxu1 %v942_v35  ;;  %v13351_v35 = vld [vmem:[#allocation36_spill] sm:$0xff]  ;;  %v13363_v21 = vld [vmem:[#allocation15_spill] sm:$0xff] }
  0x7d   :  { %8359 = vmatpush3.bf16.msra.mxu0 %v8358_v20  ;;  %v10094_v33 = vcombine.low %v857_v8, %v871_v14  ;;  %v1383_v4 = vrot.slane %v6956_v43, %v9116_v40  ;;  %v6901_v13 = vcombine.high %v9550_v30, %v13350_v12  ;;  %1069 = vmatprep.mubr.f32.mxu1 %v961_v46  ;;  %v13352_v14 = vld [vmem:[#allocation35_spill] sm:$0xff]  ;;  %v10248_v8 = vld [vmem:[%s13213_s3 + $0x198] sm:$0xff] }
  0x7e   :  { %1552 = vmatprep.mubr.f32.mxu0 %v1371_v44  ;;  %v10110_v59 = vrot.slane %v6899_v32, %v9116_v40  ;;  %v6958_v20 = vcombine.low %v13351_v35, %v9624_v56  ;;  %8360 = vmatprep.subr.bf16.mxu0 %v13348_v47  ;;  %v6960_v42 = vcombine.high %v9624_v56, %v9690_v3  ;;  %v13353_v44 = vld [vmem:[#allocation34_spill] sm:$0xff]  ;;  %v10148_v56 = vld [vmem:[%s13213_s3 + $0x1f0] sm:$0xff] }
  0x7f   :  { %v1406_v46 = vcombine.high %v1383_v4, %v1397_v28  ;;  %v1405_v39 = vcombine.low %v1383_v4, %v1397_v28  ;;  %v10128_v24 = vrot.slane %v6901_v13, %v9116_v40  ;;  %v6903_v16 = vcombine.low %v13352_v14, %v9674_v17  ;;  %v10164_v32 = vld [vmem:[%s13213_s3 + $0x170] sm:$0xff]  ;;  %v10169_v4 = vld [vmem:[%s13213_s3 + $0x178] sm:$0xff] }
  0x80   :  { %1553 = vmatmul.mubr.f32.gmra.mrb[12].mxu0 %v1370_v52  ;;  %v1418_v26 = vrot.slane %v6958_v20, %v9116_v40  ;;  %v927_v3 = vrot.slane %v13353_v44, %v9116_v40  ;;  %v10153_v52 = vld [vmem:[%s13213_s3 + $0x1f8] sm:$0xff]  ;;  %1070 = vmatmul.mubr.f32.gmra.mrb[18].mxu1 %v9977_v57  ;;  %v1432_v43 = vrot.slane %v6960_v42, %v9116_v40  ;;  %v7001_v35 = vld [vmem:[%s13213_s3 + $0x230] sm:$0xff] }
  0x81   :  { %1557 = vmatprep.mubr.f32.mxu0 %v1406_v46  ;;  %8022 = vmatprep.mubr.msk.f32.mxu1 %vm8965_vm1, %v13321_v45  ;;  %v941_v57 = vrot.slane %v6903_v16, %v9116_v40  ;;  %v10176_v12 = vrot.slane %v9743_v63, %v9116_v40  ;;  %v8364_v13 = vpack.c.bf16 %v6949_v18, %v6948_v1  ;;  %v7002_v20 = vld [vmem:[%s13213_s3 + $0x238] sm:$0xff]  ;;  %v10187_v46 = vld [vmem:[%s13213_s3 + $0x200] sm:$0xff]  ;;  %v10197_v18 = vld [vmem:[%s13213_s3 + $0x208] sm:$0xff] }
  0x82   :  { %8362 = vmatpush3.bf16.msra.mxu0 %v8361_v48  ;;  %v1441_v48 = vcombine.high %v1418_v26, %v1432_v43  ;;  %v1440_v42 = vcombine.low %v1418_v26, %v1432_v43  ;;  %v6905_v1 = vcombine.high %v9674_v17, %v9776_v23  ;;  %v10202_v16 = vld [vmem:[%s13213_s3 + $0x180] sm:$0xff]  ;;  %v10207_v26 = vld [vmem:[%s13213_s3 + $0x188] sm:$0xff]  ;;  %v6953_v28 = vcombine.high %v9183_v7, %v9156_v62  ;;  %v10220_v61 = vld [vmem:[%s13213_s3 + $0x210] sm:$0xff] }
  0x83   :  { %8363 = vmatprep.subr.bf16.mxu0 %v13348_v47  ;;  %v10209_v43 = vcombine.low %v927_v3, %v941_v57  ;;  %v1459_v23 = vcombine.high %v10176_v12, %v10176_v12  ;;  %v10230_v3 = vld [vmem:[%s13213_s3 + $0x190] sm:$0xff]  ;;  %v13354_v7 = vld [vmem:[#allocation18_spill] sm:$0xff]  ;;  %v10243_v27 = vpack.c.bf16 %v7002_v20, %v7001_v35  ;;  %v8387_v35 = vpack.c.bf16 %v10197_v18, %v10187_v46  ;;  %v2047_v47 = vld [vmem:[%s13213_s3 + $0xd8] sm:$0xff] }
  0x84   :  { %1558 = vmatmul.mubr.f32.gmra.mrb[14].mxu0 %v1405_v39  ;;  %v10225_v39 = vld [vmem:[%s13213_s3 + $0x218] sm:$0xff]  ;;  %8023 = vmatmul.mubr.msk.f32.vlgmr.msra.gmra.mrb[0].mxu1 %vm610_vm11, %v10048_v25  ;;  %v10235_v62 = vrot.slane %v6905_v1, %v9116_v40  ;;  %v13355_v57 = vcombine.high %v9150_v60, %v13354_v7  ;;  %v7003_v25 = vld [vmem:[%s13213_s3 + $0x240] sm:$0xff]  ;;  %v1334_v60 = vrot.slane %v6953_v28, %v9116_v40  ;;  %v13374_v46 = vld [vmem:[#allocation19_spill] sm:$0xff] }
  0x85   :  { %1562 = vmatprep.mubr.f32.mxu0 %v1441_v48  ;;  %v7004_v48 = vld [vmem:[%s13213_s3 + $0x248] sm:$0xff]  ;;  %8370 = vmatpush3.bf16.msra.mxu1 %v8369_v5  ;;  %v8389_v20 = vpack.c.bf16 %v10207_v26, %v10202_v16  ;;  %v10269_v1 = vld [vmem:[%s13213_s3 + $0x220] sm:$0xff]  ;;  %v6955_v41 = vcombine.high %v9405_v53, %v13356_v55  ;;  %v6961_v29 = vcombine.high %v13352_v14, %v9674_v17 }
  0x86   :  { %v10241_v63 = vrot.slane %v13355_v57, %v9116_v40  ;;  %8025 = vmatprep.mubr.msk.f32.mxu1 %vm8965_vm1, %v13321_v45  ;;  %8372 = vmatprep.subr.bf16.mxu1 %v8371_v0  ;;  %v13357_v5 = vld [vmem:[#allocation22_spill] sm:$0xff]  ;;  %v13364_v14 = vcombine.low %v10110_v59, %v10128_v24  ;;  %v7006_v59 = vld [vmem:[%s13213_s3 + $0x258] sm:$0xf]  ;;  %v13366_v24 = vpack.c.bf16 %v10085_v9, %v10080_v38 }
  0x87   :  { %8366 = vmatpush3.bf16.msk.msra.mxu0 %vm9064_vm8, %v8364_v13  ;;  %v1355_v28 = vrot.slane %v13357_v5, %v9116_v40  ;;  %v10285_v57 = vld [vmem:[%s13213_s3 + $0x228] sm:$0xff]  ;;  %v10301_v13 = vpack.c.bf16 %v7004_v48, %v7003_v25  ;;  %v1369_v55 = vrot.slane %v6955_v41, %v9116_v40  ;;  %v6957_v5 = vcombine.high %v13349_v50, %v9550_v30  ;;  %v13361_v50 = vld [vmem:[#allocation13_spill] sm:$0xff] }
  0x88   :  { %v10295_v53 = vld [vmem:[%s13213_s3 + $0x1a8] sm:$0xff]  ;;  %1563 = vmatmul.mubr.f32.gmra.mrb[16].mxu0 %v1440_v42  ;;  %v1337_v10 = vcombine.low %v10241_v63, %v1334_v60  ;;  %8400 = vmatprep.subr.bf16.mxu0 %v10243_v27  ;;  %v13358_v42 = vld [vmem:[#allocation29_spill] sm:$0xff]  ;;  %v13377_v0 = vpack.c.bf16 %v10225_v39, %v10220_v61 }
  0x89   :  { %8026 = vmatmul.mubr.msk.f32.gmra.mrb[2].mxu1 %vm610_vm11, %v10094_v33  ;;  %1567 = vmatprep.mubr.f32.mxu0 %v1459_v23  ;;  %v1404_v7 = vrot.slane %v13358_v42, %v9116_v40  ;;  %v13359_v23 = vld [vmem:[#allocation37_spill] sm:$0xff]  ;;  %v1372_v30 = vcombine.low %v1355_v28, %v1369_v55  ;;  %v1390_v11 = vrot.slane %v6957_v5, %v9116_v40  ;;  %v8882_v42 = vld.sshfl [vmem:[#allocation2 + $0x10] sm:$0xff pattern:$0x75316420]  ;;  %v10345_v17 = vld [vmem:[%s13213_s3 + $0x88] sm:$0xff] }
  0x8a   :  { %8374 = vmatpush3.bf16.msra.mxu1 %v8373_v36  ;;  %8028 = vmatprep.mubr.msk.f32.mxu1 %vm8965_vm1, %v13321_v45  ;;  %v6959_v25 = vcombine.high %v13353_v44, %v13359_v23  ;;  %v13360_v36 = vld [vmem:[#allocation12_spill] sm:$0xff]  ;;  %v13362_v44 = vld [vmem:[#allocation14_spill] sm:$0xff]  ;;  %v10356_v28 = vrot.slane %v6961_v29, %v9116_v40  ;;  %v13367_v29 = vpack.c.bf16 %v10107_v58, %v10102_v6 }
  0x8b   :  { %8376 = vmatprep.subr.bf16.mxu1 %v8375_v51  ;;  %v2103_v48 = vrot.slane %v13361_v50, %v13360_v36  ;;  %v2110_v41 = vrot.slane %v13362_v44, %v13360_v36  ;;  %v2124_v2 = vrot.slane %v13363_v21, %v13360_v36  ;;  %v10340_v51 = vld [vmem:[%s13213_s3 + $0x80] sm:$0xff]  ;;  %v13365_v55 = vld [vmem:[#allocation16_spill] sm:$0xff]  ;;  %v8883_v63 = vld.sshfl [vmem:[#allocation2 + $0x28] sm:$0xff pattern:$0x75316420]  ;;  %v2186_v18 = vrot.slane %v13374_v46, %v13360_v36 }
  0x8c   :  { %1568 = vmatmul.mubr.f32.gmra.mrb[18].mxu0 %v10176_v12  ;;  %v10331_v60 = vrot.slane %v6959_v25, %v9116_v40  ;;  %v10353_v12 = vcombine.low %v1390_v11, %v1404_v7  ;;  %v2165_v5 = vrot.slane %v13365_v55, %v13360_v36  ;;  %v7005_v23 = vld [vmem:[%s13213_s3 + $0x250] sm:$0xff]  ;;  %v10381_v38 = vld [vmem:[%s13213_s3] sm:$0xff]  ;;  %v10386_v9 = vld [vmem:[%s13213_s3 + $0x8] sm:$0xff] }
  0x8d   :  { %8029 = vmatmul.mubr.msk.f32.gmra.mrb[4].mxu1 %vm610_vm11, %v13364_v14  ;;  %8049 = vmatprep.mubr.msk.f32.mxu0 %vm8965_vm1, %v13321_v45  ;;  %v2125_v7 = vcombine.low %v2103_v48, %v8882_v42  ;;  %v2126_v25 = vcombine.high %v2103_v48, %v8882_v42  ;;  %v2127_v11 = vcombine.low %v2110_v41, %v2124_v2 }
  0x8e   :  { %8378 = vmatpush3.bf16.msra.mxu1 %v13366_v24  ;;  %8031 = vmatprep.mubr.msk.f32.mxu1 %vm8965_vm1, %v13321_v45  ;;  %v1442_v14 = vcombine.low %v10331_v60, %v10356_v28  ;;  %v2128_v33 = vcombine.high %v2110_v41, %v2124_v2  ;;  %v8407_v41 = vpack.c.bf16 %v7006_v59, %v7005_v23  ;;  %v10407_v24 = vld [vmem:[%s13213_s3 + $0x90] sm:$0xff]  ;;  %v10531_v60 = vld [vmem:[%s13213_s3 + $0xa0] sm:$0xff]  ;;  %v10536_v28 = vld [vmem:[%s13213_s3 + $0xa8] sm:$0xff] }
  0x8f   :  { %8380 = vmatprep.subr.bf16.mxu1 %v13367_v29  ;;  %v10390_v6 = vrot.slane %v2125_v7, %v13360_v36  ;;  %v10393_v58 = vrot.slane %v2127_v11, %v13360_v36  ;;  %v10396_v48 = vrot.slane %v2126_v25, %v13360_v36  ;;  %v2187_v2 = vcombine.low %v2165_v5, %v8883_v63  ;;  %v10412_v7 = vld [vmem:[%s13213_s3 + $0x98] sm:$0xff]  ;;  %v2052_v11 = vld [vmem:[%s13213_s3 + $0x100] sm:$0xff] }
  0x90   :  { %8050 = vmatmul.mubr.msk.f32.vlgmr.msra.gmra.mrb[20].mxu0 %vm610_vm11, %v1337_v10  ;;  %v10402_v42 = vrot.slane %v2128_v33, %v13360_v36  ;;  %v2188_v10 = vcombine.high %v2165_v5, %v8883_v63  ;;  %v10428_v5 = vld [vmem:[%s13213_s3 + $0x10] sm:$0xff]  ;;  %v1458_v25 = vrot.slane %v9754_v34, %v9116_v40  ;;  %v8421_v34 = vpack.c.bf16 %v10536_v28, %v10531_v60 }
  0x91   :  { %8032 = vmatmul.mubr.msk.f32.gmra.mrb[6].mxu1 %vm610_vm11, %v10209_v43  ;;  %8402 = vmatpush3.bf16.msra.mxu0 %v10243_v27  ;;  %v13368_v43 = vpack.c.bf16 %v10124_v37, %v10119_v54  ;;  %v2157_v27 = vcombine.high %v10390_v6, %v10390_v6  ;;  %v2158_v63 = vcombine.high %v10396_v48, %v10396_v48  ;;  %v10433_v54 = vld [vmem:[%s13213_s3 + $0x18] sm:$0xff]  ;;  %v13386_v28 = vld [vmem:[#allocation27_spill] sm:$0xff] }
  0x92   :  { %8034 = vmatprep.mubr.msk.f32.mxu1 %vm8965_vm1, %v13321_v45  ;;  %v13369_v37 = vpack.c.bf16 %v10153_v52, %v10148_v56  ;;  %8052 = vmatprep.mubr.msk.f32.mxu0 %vm8965_vm1, %v13321_v45  ;;  %v10441_v23 = vrot.slane %v2187_v2, %v13360_v36  ;;  %v10444_v59 = vrot.slane %v2188_v10, %v13360_v36  ;;  %v2053_v56 = vld [vmem:[%s13213_s3 + $0x108] sm:$0xff] }
  0x93   :  { %8382 = vmatpush3.bf16.msra.mxu1 %v13368_v43  ;;  %8404 = vmatprep.subr.bf16.mxu0 %v10301_v13  ;;  %v2469_v52 = vcombine.low %v10396_v48, %v2157_v27  ;;  %v2470_v29 = vcombine.low %v2158_v63, %v10393_v58  ;;  %v13371_v27 = vpack.c.bf16 %v10169_v4, %v10164_v32  ;;  %v13373_v32 = vld [vmem:[#allocation17_spill] sm:$0xff] }
  0x94   :  { %8384 = vmatprep.subr.bf16.mxu1 %v13369_v37  ;;  %13370 = vst [vmem:[#allocation24_spill] sm:$0xff] %v10444_v59  ;;  %8053 = vmatmul.mubr.msk.f32.gmra.mrb[22].mxu0 %vm610_vm11, %v1372_v30  ;;  %v2471_v10 = vcombine.low %v10402_v42, %v10444_v59  ;;  %v7007_v30 = vcombine.high %v10441_v23, %v10444_v59 }
  0x95   :  { %8035 = vmatmul.mubr.msk.f32.gmra.mrb[8].mxu1 %vm610_vm11, %v10235_v62  ;;  %8055 = vmatprep.mubr.msk.f32.mxu0 %vm8965_vm1, %v13321_v45  ;;  %v2479_v62 = vrot.slane %v2469_v52, %v13360_v36  ;;  %v10476_v63 = vrot.slane %v2470_v29, %v13360_v36  ;;  %v10478_v37 = vpack.c.bf16 %v2053_v56, %v2052_v11 }
  0x96   :  { %8406 = vmatpush3.bf16.msra.mxu0 %v10301_v13  ;;  %v2493_v2 = vrot.slane %v2471_v10, %v13360_v36  ;;  %v2500_v43 = vrot.slane %v7007_v30, %v13360_v36  ;;  %v2172_v4 = vrot.slane %v13373_v32, %v13360_v36  ;;  %v13376_v10 = vld [vmem:[#allocation21_spill] sm:$0xff] }
  0x97   :  { %8386 = vmatpush3.bf16.msra.mxu1 %v13371_v27  ;;  %13372 = vst [vmem:[#allocation30_spill] sm:$0xff] %v10476_v63  ;;  %8409 = vmatprep.subr.msk.bf16.mxu0 %vm9064_vm8, %v8407_v41  ;;  %v2501_v13 = vcombine.low %v2479_v62, %v10476_v63  ;;  %v2502_v11 = vcombine.high %v2479_v62, %v10476_v63  ;;  %v8884_v27 = vld.sshfl [vmem:[#allocation2 + $0x40] sm:$0xff pattern:$0x75316420] }
  0x98   :  { %8388 = vmatprep.subr.bf16.mxu1 %v8387_v35  ;;  %8056 = vmatmul.mubr.msk.f32.gmra.mrb[24].mxu0 %vm610_vm11, %v10353_v12  ;;  %v13375_v35 = vld [vmem:[#allocation20_spill] sm:$0xff]  ;;  %v2503_v52 = vcombine.low %v2493_v2, %v2500_v43  ;;  %v2504_v29 = vcombine.high %v2493_v2, %v2500_v43  ;;  %v2234_v30 = vrot.slane %v13376_v10, %v13360_v36 }
  0x99   :  { %v2227_v56 = vrot.slane %v13375_v35, %v13360_v36  ;;  %8058 = vmatprep.mubr.msk.f32.mxu0 %vm8965_vm1, %v13321_v45  ;;  %v2518_v12 = vrot.slane %v2502_v11, %v13360_v36  ;;  %v2511_v62 = vrot.slane %v2501_v13, %v13360_v36  ;;  %v2189_v33 = vcombine.low %v2172_v4, %v2186_v18 }
  0x9a   :  { %8412 = vmatpush3.bf16.msk.msra.mxu0 %vm9064_vm8, %v8407_v41  ;;  %v2532_v2 = vrot.slane %v2504_v29, %v13360_v36  ;;  %v2525_v43 = vrot.slane %v2503_v52, %v13360_v36  ;;  %v2190_v16 = vcombine.high %v2172_v4, %v2186_v18  ;;  %v10550_v29 = vld [vmem:[%s13213_s3 + $0x20] sm:$0xff] }
  0x9b   :  { %8390 = vmatpush3.bf16.msra.mxu1 %v8389_v20  ;;  %8446 = vmatprep.subr.bf16.mxu0 %v10478_v37  ;;  %v10519_v26 = vrot.slane %v2189_v33, %v13360_v36  ;;  %v13378_v20 = vld [vmem:[#allocation23_spill] sm:$0xff]  ;;  %v2249_v61 = vcombine.low %v2227_v56, %v8884_v27  ;;  %v2250_v39 = vcombine.high %v2227_v56, %v8884_v27 }
  0x9c   :  { %8392 = vmatprep.subr.bf16.mxu1 %v13377_v0  ;;  %8059 = vmatmul.mubr.msk.f32.gmra.mrb[26].mxu0 %vm610_vm11, %v1442_v14  ;;  %v2248_v41 = vrot.slane %v13378_v20, %v13360_v36  ;;  %v2535_v0 = vcombine.low %v2518_v12, %v2532_v2  ;;  %v2533_v13 = vcombine.low %v2511_v62, %v2525_v43  ;;  %v10555_v27 = vld [vmem:[%s13213_s3 + $0x28] sm:$0xff]  ;;  %v2028_v20 = vld [vmem:[%s13213_s3 + $0x40] sm:$0xff] }
  0x9d   :  { %8061 = vmatprep.mubr.msk.f32.mxu0 %vm8965_vm1, %v13321_v45  ;;  %v2534_v11 = vcombine.high %v2511_v62, %v2525_v43  ;;  %v10526_v4 = vrot.slane %v2190_v16, %v13360_v36  ;;  %v13379_v14 = vpack.c.bf16 %v10248_v8, %v10230_v3  ;;  %v10542_v56 = vrot.slane %v2249_v61, %v13360_v36  ;;  %v2054_v8 = vld [vmem:[%s13213_s3 + $0x110] sm:$0xff]  ;;  %v8885_v62 = vld.sshfl [vmem:[#allocation2 + $0x58] sm:$0xff pattern:$0x75316420] }
  0x9e   :  { %v2251_v33 = vcombine.low %v2234_v30, %v2248_v41  ;;  %v2252_v18 = vcombine.high %v2234_v30, %v2248_v41  ;;  %v10545_v52 = vrot.slane %v2250_v39, %v13360_v36  ;;  %v13380_v3 = vpack.c.bf16 %v10285_v57, %v10269_v1  ;;  %2811 = vmatprep.mubr.f32.mxu1 %v2535_v0  ;;  %v13381_v30 = vld [vmem:[#allocation26_spill] sm:$0xff]  ;;  %v2055_v43 = vld [vmem:[%s13213_s3 + $0x118] sm:$0xff]  ;;  %v10573_v16 = vld [vmem:[%s13213_s3 + $0xb0] sm:$0xff] }
  0x9f   :  { %8394 = vmatpush3.bf16.msra.mxu1 %v13379_v14  ;;  %v2289_v12 = vrot.slane %v13381_v30, %v13360_v36  ;;  %v2536_v2 = vcombine.low %v10519_v26, %v10526_v4  ;;  %v10578_v1 = vld [vmem:[%s13213_s3 + $0xb8] sm:$0xff]  ;;  %v2281_v61 = vcombine.high %v10542_v56, %v10542_v56  ;;  %v10607_v40 = vpack.c.bf16 %v2055_v43, %v2054_v8  ;;  %v10624_v8 = vld [vmem:[%s13213_s3 + $0x30] sm:$0xff] }
  0xa0   :  { %8396 = vmatprep.subr.bf16.mxu1 %v13380_v3  ;;  %8062 = vmatmul.mubr.msk.f32.gmra.mrb[28].mxu0 %vm610_vm11, %v1458_v25  ;;  %v10585_v57 = vrot.slane %v2251_v33, %v13360_v36  ;;  %v10588_v41 = vrot.slane %v2252_v18, %v13360_v36  ;;  %v2282_v39 = vcombine.high %v10545_v52, %v10545_v52  ;;  %v13392_v45 = vld [vmem:[#allocation33_spill] sm:$0xff] }
  0xa1   :  { %8076 = vmatprep.mubr.msk.f32.mxu0 %vm610_vm11, %v2534_v11  ;;  %v2312_v0 = vcombine.high %v2289_v12, %v8885_v62  ;;  %v10596_v14 = vrot.slane %v2536_v2, %v13360_v36  ;;  %v8423_v25 = vpack.c.bf16 %v10555_v27, %v10550_v29  ;;  %v13383_v33 = vpack.c.bf16 %v10295_v53, %v10290_v49  ;;  %v13387_v53 = vld [vmem:[#allocation28_spill] sm:$0xff] }
  0xa2   :  { %v2537_v18 = vcombine.low %v10545_v52, %v2281_v61  ;;  %v2538_v3 = vcombine.low %v2282_v39, %v10585_v57  ;;  %v13384_v2 = vpack.c.bf16 %v10345_v17, %v10340_v51  ;;  %v2296_v49 = vrot.slane %v13386_v28, %v13360_v36  ;;  %v10629_v51 = vld [vmem:[%s13213_s3 + $0x38] sm:$0xff]  ;;  %v13389_v61 = vld [vmem:[#allocation31_spill] sm:$0xff] }
  0xa3   :  { %13382 = vst [vmem:[#allocation36_spill] sm:$0xff] %v10596_v14  ;;  %8398 = vmatpush3.bf16.msra.mxu1 %v13383_v33  ;;  %v10615_v60 = vrot.slane %v2312_v0, %v13360_v36  ;;  %v2310_v29 = vrot.slane %v13387_v53, %v13360_v36  ;;  %v2311_v27 = vcombine.low %v2289_v12, %v8885_v62  ;;  %v13390_v12 = vld [vmem:[#allocation32_spill] sm:$0xff]  ;;  %v8887_v28 = vld.sshfl [vmem:[#allocation2 + $0x88] sm:$0xff pattern:$0x75316420] }
  0xa4   :  { %8414 = vmatprep.subr.bf16.mxu1 %v13384_v2  ;;  %v10632_v17 = vrot.slane %v2537_v18, %v13360_v36  ;;  %v10635_v43 = vrot.slane %v2538_v3, %v13360_v36  ;;  %v2351_v39 = vrot.slane %v13389_v61, %v13360_v36  ;;  %v2358_v62 = vrot.slane %v13390_v12, %v13360_v36  ;;  %v8886_v61 = vld.sshfl [vmem:[#allocation2 + $0x70] sm:$0xff pattern:$0x75316420] }
  0xa5   :  { %13385 = vst [vmem:[#allocation35_spill] sm:$0xff] %v10615_v60  ;;  %v2539_v0 = vcombine.low %v10588_v41, %v10615_v60  ;;  %v2313_v33 = vcombine.low %v2296_v49, %v2310_v29  ;;  %v2314_v2 = vcombine.high %v2296_v49, %v2310_v29  ;;  %v10644_v11 = vrot.slane %v2311_v27, %v13360_v36 }
  0xa6   :  { %13388 = vst [vmem:[#allocation34_spill] sm:$0xff] %v10635_v43  ;;  %2812 = vmatmul.mubr.f32.vlgmr.msra.gmra.mrb[20].mxu1 %v2533_v13  ;;  %v13391_v18 = vpack.c.bf16 %v10386_v9, %v10381_v38  ;;  %v2568_v3 = vcombine.low %v10596_v14, %v10632_v17  ;;  %v2372_v12 = vrot.slane %v13392_v45, %v13360_v36 }
  0xa7   :  { %v8427_v13 = vpack.c.bf16 %v10629_v51, %v10624_v8  ;;  %v13393_v49 = vpack.c.bf16 %v10412_v7, %v10407_v24  ;;  %v10659_v29 = vrot.slane %v2539_v0, %v13360_v36  ;;  %v10662_v38 = vrot.slane %v2313_v33, %v13360_v36 }
  0xa8   :  { %8416 = vmatpush3.bf16.msra.mxu1 %v13391_v18  ;;  %v10665_v9 = vrot.slane %v2314_v2, %v13360_v36  ;;  %v7008_v27 = vcombine.high %v10644_v11, %v10615_v60  ;;  %v10670_v18 = vrot.slane %v2568_v3, %v13360_v36  ;;  %v2373_v8 = vcombine.low %v2351_v39, %v8886_v61  ;;  %v2056_v2 = vld [vmem:[%s13213_s3 + $0x120] sm:$0xff] }
  0xa9   :  { %8418 = vmatprep.subr.bf16.mxu1 %v13393_v49  ;;  %v2374_v51 = vcombine.high %v2351_v39, %v8886_v61  ;;  %v2375_v45 = vcombine.low %v2358_v62, %v2372_v12  ;;  %v2570_v24 = vcombine.low %v10635_v43, %v10659_v29  ;;  %v2376_v33 = vcombine.high %v2358_v62, %v2372_v12  ;;  %v2057_v62 = vld [vmem:[%s13213_s3 + $0x128] sm:$0xf] }
  0xaa   :  { %v2604_v7 = vcombine.low %v10662_v38, %v10665_v9  ;;  %v10677_v0 = vrot.slane %v7008_v27, %v13360_v36  ;;  %v13394_v3 = vpack.c.bf16 %v10433_v54, %v10428_v5  ;;  %v10686_v61 = vrot.slane %v2373_v8, %v13360_v36  ;;  %v2044_v5 = vld [vmem:[%s13213_s3 + $0xc0] sm:$0xff]  ;;  %v2045_v54 = vld [vmem:[%s13213_s3 + $0xc8] sm:$0xff] }
  0xab   :  { %v10689_v39 = vrot.slane %v2375_v45, %v13360_v36  ;;  %v10692_v49 = vrot.slane %v2374_v51, %v13360_v36  ;;  %v2413_v12 = vrot.slane %v9671_v19, %v13360_v36  ;;  %v10706_v45 = vrot.slane %v2570_v24, %v13360_v36 }
  0xac   :  { %8420 = vmatpush3.bf16.msra.mxu1 %v13394_v3  ;;  %v10709_v27 = vrot.slane %v2604_v7, %v13360_v36  ;;  %v10712_v8 = vrot.slane %v2376_v33, %v13360_v36  ;;  %v2420_v51 = vrot.slane %v9718_v31, %v13360_v36  ;;  %v2405_v3 = vcombine.high %v10686_v61, %v10686_v61 }
  0xad   :  { %8422 = vmatprep.subr.bf16.mxu1 %v8421_v34  ;;  %v2406_v19 = vcombine.high %v10692_v49, %v10692_v49  ;;  %v2434_v24 = vrot.slane %v9736_v22, %v13360_v36  ;;  %v2601_v34 = vcombine.high %v10670_v18, %v10706_v45  ;;  %v8453_v33 = vpack.c.bf16 %v2057_v62, %v2056_v2  ;;  %v2029_v22 = vld [vmem:[%s13213_s3 + $0x48] sm:$0xff] }
  0xae   :  { %13395 = vst [vmem:[#allocation18_spill] sm:$0xff] %v10709_v27  ;;  %v2635_v7 = vcombine.low %v10677_v0, %v10709_v27  ;;  %v8429_v30 = vpack.c.bf16 %v2045_v54, %v2044_v5  ;;  %v2605_v31 = vcombine.low %v10692_v49, %v2405_v3  ;;  %v2435_v35 = vcombine.low %v2413_v12, %v8887_v28 }
  0xaf   :  { %v2606_v10 = vcombine.low %v2406_v19, %v10689_v39  ;;  %v2436_v53 = vcombine.high %v2413_v12, %v8887_v28  ;;  %8077 = vmatmul.mubr.msk.f32.vlgmr.msra.gmra.mrb[30].mxu0 %vm610_vm11, %v2601_v34  ;;  %v13396_v2 = vpack.c.bf16 %v10578_v1, %v10573_v16  ;;  %v2437_v19 = vcombine.low %v2420_v51, %v2434_v24 }
  0xb0   :  { %8424 = vmatpush3.bf16.msra.mxu1 %v8423_v25  ;;  %v10739_v25 = vrot.slane %v2635_v7, %v13360_v36  ;;  %v2438_v62 = vcombine.high %v2420_v51, %v2434_v24  ;;  %8448 = vmatpush3.bf16.msra.mxu0 %v10478_v37  ;;  %v10743_v28 = vrot.slane %v2605_v31, %v13360_v36 }
  0xb1   :  { %8426 = vmatprep.subr.bf16.mxu1 %v13396_v2  ;;  %v10746_v12 = vrot.slane %v2606_v10, %v13360_v36  ;;  %v10749_v5 = vrot.slane %v2435_v35, %v13360_v36  ;;  %v10752_v54 = vrot.slane %v2436_v53, %v13360_v36  ;;  %8450 = vmatprep.subr.bf16.mxu0 %v10607_v40 }
  0xb2   :  { %v10756_v16 = vrot.slane %v2437_v19, %v13360_v36  ;;  %v10759_v1 = vrot.slane %v2438_v62, %v13360_v36  ;;  %v8431_v37 = vpack.c.bf16 %v2029_v22, %v2028_v20  ;;  %v2219_v31 = vcombine.high %v10441_v23, %v10441_v23 }
  0xb3   :  { %13397 = vst [vmem:[#allocation25_spill] sm:$0xff] %v10746_v12  ;;  %13398 = vst [vmem:[#allocation22_spill] sm:$0xff] %v10752_v54  ;;  %v2637_v10 = vcombine.low %v10743_v28, %v10746_v12  ;;  %v2670_v35 = vcombine.low %v10712_v8, %v10752_v54  ;;  %v7009_v53 = vcombine.high %v10749_v5, %v10752_v54 }
  0xb4   :  { %13399 = vst [vmem:[#allocation29_spill] sm:$0xff] %v10759_v1  ;;  %8428 = vmatpush3.bf16.msra.mxu1 %v8427_v13  ;;  %v2917_v51 = vcombine.low %v10390_v6, %v10396_v48  ;;  %v2672_v3 = vcombine.low %v10756_v16, %v10759_v1  ;;  %v7015_v22 = vcombine.high %v10390_v6, %v10396_v48 }
  0xb5   :  { %8430 = vmatprep.subr.bf16.mxu1 %v8429_v30  ;;  %v2919_v20 = vcombine.low %v10393_v58, %v10441_v23  ;;  %v2920_v13 = vcombine.low %v10444_v59, %v2219_v31  ;;  %8452 = vmatpush3.bf16.msra.mxu0 %v10607_v40  ;;  %v10780_v24 = vrot.slane %v2637_v10, %v13360_v36 }
  0xb6   :  { %v10783_v34 = vrot.slane %v2670_v35, %v13360_v36  ;;  %v10786_v7 = vrot.slane %v7009_v53, %v13360_v36  ;;  %v10789_v30 = vrot.slane %v2917_v51, %v13360_v36  ;;  %v10792_v6 = vrot.slane %v2672_v3, %v13360_v36  ;;  %8455 = vmatprep.subr.msk.bf16.mxu0 %vm9064_vm8, %v8453_v33 }
  0xb7   :  { %v10797_v40 = vrot.slane %v7015_v22, %v13360_v36  ;;  %v10800_v48 = vrot.slane %v2919_v20, %v13360_v36  ;;  %v10803_v2 = vrot.slane %v2920_v13, %v13360_v36  ;;  %v2668_v19 = vcombine.high %v10739_v25, %v10780_v24  ;;  %v7040_v22 = vld [vmem:[%s13213_s3 + $0x2e8] sm:$0xff] }
  0xb8   :  { %v2694_v62 = vcombine.low %v10783_v34, %v10786_v7  ;;  %8432 = vmatpush3.bf16.msra.mxu1 %v8431_v37  ;;  %v2220_v31 = vcombine.high %v10444_v59, %v10444_v59  ;;  %v2985_v10 = vcombine.low %v10542_v56, %v10545_v52  ;;  %v10815_v35 = vrot.slane %v10792_v6, %v13360_v36  ;;  %v7039_v37 = vld [vmem:[%s13213_s3 + $0x2e0] sm:$0xff] }
  0xb9   :  { %v2949_v53 = vcombine.low %v10789_v30, %v10797_v40  ;;  %v2951_v51 = vcombine.low %v10800_v48, %v10803_v2  ;;  %v7016_v3 = vcombine.high %v10542_v56, %v10545_v52  ;;  %8079 = vmatprep.mubr.msk.f32.mxu0 %vm610_vm11, %v2668_v19  ;;  %8458 = vmatpush3.bf16.msk.msra.mxu0 %vm9064_vm8, %v8453_v33  ;;  %v7023_v33 = vld [vmem:[%s13213_s3 + $0x260] sm:$0xff] }
  0xba   :  { %v10831_v20 = vrot.slane %v2694_v62, %v13360_v36  ;;  %v2984_v13 = vcombine.low %v2220_v31, %v10519_v26  ;;  %v2987_v56 = vcombine.low %v10585_v57, %v10644_v11  ;;  %v10845_v21 = vrot.slane %v2985_v10, %v13360_v36  ;;  %v7024_v62 = vld [vmem:[%s13213_s3 + $0x268] sm:$0xff] }
  0xbb   :  { %v10839_v52 = vrot.slane %v2949_v53, %v13360_v36  ;;  %v10842_v46 = vrot.slane %v2951_v51, %v13360_v36  ;;  %v10848_v19 = vrot.slane %v7016_v3, %v13360_v36  ;;  %v8459_v51 = vpack.c.bf16 %v7040_v22, %v7039_v37  ;;  %v2046_v3 = vld [vmem:[%s13213_s3 + $0xd0] sm:$0xff]  ;;  %v2031_v22 = vld [vmem:[%s13213_s3 + $0x58] sm:$0xff] }
  0xbc   :  { %v2726_v31 = vcombine.high %v10831_v20, %v10815_v35  ;;  %v10859_v53 = vrot.slane %v2984_v13, %v13360_v36  ;;  %v10862_v10 = vrot.slane %v2987_v56, %v13360_v36  ;;  %v2569_v55 = vcombine.high %v10596_v14, %v10632_v17  ;;  %v2030_v37 = vld [vmem:[%s13213_s3 + $0x50] sm:$0xff] }
  0xbd   :  { %v2982_v32 = vcombine.high %v10839_v52, %v10842_v46  ;;  %v2571_v13 = vcombine.high %v10635_v43, %v10659_v29  ;;  %8460 = vmatprep.subr.bf16.mxu0 %v8459_v51  ;;  %v8461_v17 = vpack.c.bf16 %v7024_v62, %v7023_v33  ;;  %v2600_v63 = vcombine.low %v10670_v18, %v10706_v45 }
  0xbe   :  { %8080 = vmatmul.mubr.msk.f32.gmra.mrb[32].mxu0 %vm610_vm11, %v2726_v31  ;;  %v3016_v56 = vcombine.low %v10859_v53, %v10845_v21  ;;  %v3018_v44 = vcombine.low %v10848_v19, %v10862_v10  ;;  %v2585_v29 = vrot.slane %v2569_v55, %v13360_v36  ;;  %v8433_v43 = vpack.c.bf16 %v2047_v47, %v2046_v3 }
  0xbf   :  { %8094 = vmatprep.mubr.msk.f32.mxu0 %vm610_vm11, %v2982_v32  ;;  %v2599_v50 = vrot.slane %v2571_v13, %v13360_v36  ;;  %v8435_v59 = vpack.c.bf16 %v2031_v22, %v2030_v37  ;;  %v2343_v33 = vcombine.high %v10644_v11, %v10644_v11  ;;  %v2344_v55 = vcombine.high %v10615_v60, %v10615_v60 }
  0xc0   :  { %v10893_v31 = vrot.slane %v3016_v56, %v13360_v36  ;;  %v10896_v14 = vrot.slane %v3018_v44, %v13360_v36  ;;  %8434 = vmatprep.subr.bf16.mxu1 %v8433_v43  ;;  %v3053_v32 = vcombine.low %v10686_v61, %v10692_v49  ;;  %v7017_v47 = vcombine.high %v10686_v61, %v10692_v49  ;;  %v7041_v43 = vld [vmem:[%s13213_s3 + $0x2f0] sm:$0xff]  ;;  %v7042_v61 = vld [vmem:[%s13213_s3 + $0x2f8] sm:$0xff] }
  0xc1   :  { %v2602_v62 = vcombine.low %v2585_v29, %v2599_v50  ;;  %8436 = vmatpush3.bf16.msra.mxu1 %v8435_v59  ;;  %v3051_v44 = vcombine.low %v10615_v60, %v2343_v33  ;;  %v2467_v45 = vcombine.high %v10749_v5, %v10749_v5  ;;  %v2468_v50 = vcombine.high %v10752_v54, %v10752_v54  ;;  %v7025_v56 = vld [vmem:[%s13213_s3 + $0x270] sm:$0xff]  ;;  %v7026_v29 = vld [vmem:[%s13213_s3 + $0x278] sm:$0xff] }
  0xc2   :  { %v3049_v18 = vcombine.high %v10893_v31, %v10896_v14  ;;  %v3052_v49 = vcombine.low %v2344_v55, %v10662_v38  ;;  %v10921_v59 = vrot.slane %v3053_v32, %v13360_v36  ;;  %v10924_v51 = vrot.slane %v7017_v47, %v13360_v36  ;;  %v2048_v32 = vld [vmem:[%s13213_s3 + $0xe0] sm:$0xff]  ;;  %v2049_v47 = vld [vmem:[%s13213_s3 + $0xe8] sm:$0xff]  ;;  %v2034_v60 = vld [vmem:[%s13213_s3 + $0x70] sm:$0xff] }
  0xc3   :  { %2816 = vmatprep.mubr.f32.mxu1 %v2602_v62  ;;  %v3118_v3 = vcombine.low %v10689_v39, %v10749_v5  ;;  %v10930_v13 = vrot.slane %v3051_v44, %v13360_v36  ;;  %v3119_v37 = vcombine.low %v10752_v54, %v2467_v45  ;;  %v3120_v22 = vcombine.low %v2468_v50, %v10756_v16 }
  0xc4   :  { %8095 = vmatmul.mubr.msk.f32.vlgmr.msra.gmra.mrb[30].mxu0 %vm610_vm11, %v3049_v18  ;;  %2817 = vmatmul.mubr.f32.gmra.mrb[22].mxu1 %v2600_v63  ;;  %v10941_v33 = vrot.slane %v3052_v49, %v13360_v36  ;;  %v3085_v63 = vcombine.low %v10921_v59, %v10924_v51  ;;  %v8463_v55 = vpack.c.bf16 %v7042_v61, %v7041_v43  ;;  %v2033_v43 = vld [vmem:[%s13213_s3 + $0x68] sm:$0xff]  ;;  %v7043_v61 = vld [vmem:[%s13213_s3 + $0x300] sm:$0xff] }
  0xc5   :  { %8462 = vmatpush3.bf16.msra.mxu0 %v8461_v17  ;;  %v10946_v62 = vrot.slane %v3118_v3, %v13360_v36  ;;  %v2032_v17 = vld [vmem:[%s13213_s3 + $0x60] sm:$0xff]  ;;  %v10958_v18 = vrot.slane %v3119_v37, %v13360_v36  ;;  %v10961_v44 = vrot.slane %v3120_v22, %v13360_v36  ;;  %v2636_v45 = vcombine.high %v10677_v0, %v10709_v27  ;;  %v7044_v49 = vld [vmem:[%s13213_s3 + $0x308] sm:$0xff] }
  0xc6   :  { %v2638_v50 = vcombine.high %v10743_v28, %v10746_v12  ;;  %v3083_v3 = vcombine.low %v10930_v13, %v10941_v33  ;;  %v10979_v0 = vrot.slane %v3085_v63, %v13360_v36  ;;  %8464 = vmatprep.subr.bf16.mxu0 %v8463_v55  ;;  %v8465_v28 = vpack.c.bf16 %v7026_v29, %v7025_v56  ;;  %v7027_v63 = vld [vmem:[%s13213_s3 + $0x280] sm:$0xff]  ;;  %v7028_v56 = vld [vmem:[%s13213_s3 + $0x288] sm:$0xff] }
  0xc7   :  { %v2667_v37 = vcombine.low %v10739_v25, %v10780_v24  ;;  %v3142_v22 = vcombine.low %v10946_v62, %v10958_v18  ;;  %v10987_v12 = vrot.slane %v10961_v44, %v13360_v36  ;;  %v2652_v27 = vrot.slane %v2636_v45, %v13360_v36  ;;  %v2050_v45 = vld [vmem:[%s13213_s3 + $0xf0] sm:$0xff] }
  0xc8   :  { %v2666_v54 = vrot.slane %v2638_v50, %v13360_v36  ;;  %v10998_v25 = vrot.slane %v3083_v3, %v13360_v36  ;;  %v8437_v24 = vpack.c.bf16 %v2049_v47, %v2048_v32  ;;  %v8439_v29 = vpack.c.bf16 %v2033_v43, %v2032_v17  ;;  %v2051_v50 = vld [vmem:[%s13213_s3 + $0xf8] sm:$0xff]  ;;  %v7045_v43 = vld [vmem:[%s13213_s3 + $0x310] sm:$0xff] }
  0xc9   :  { %8466 = vmatpush3.bf16.msra.mxu0 %v8465_v28  ;;  %v8467_v55 = vpack.c.bf16 %v7044_v49, %v7043_v61  ;;  %v11010_v1 = vrot.slane %v3142_v22, %v13360_v36  ;;  %v2695_v32 = vcombine.high %v10783_v34, %v10786_v7  ;;  %v2696_v47 = vcombine.high %v10792_v6, %v10792_v6  ;;  %v2035_v17 = vld [vmem:[%s13213_s3 + $0x78] sm:$0xff]  ;;  %v7029_v22 = vld [vmem:[%s13213_s3 + $0x290] sm:$0xff] }
  0xca   :  { %v2669_v3 = vcombine.low %v2652_v27, %v2666_v54  ;;  %v7046_v61 = vld [vmem:[%s13213_s3 + $0x318] sm:$0xff]  ;;  %v3116_v27 = vcombine.high %v10998_v25, %v10979_v0  ;;  %8438 = vmatprep.subr.bf16.mxu1 %v8437_v24  ;;  %v8469_v54 = vpack.c.bf16 %v7028_v56, %v7027_v63  ;;  %v2725_v34 = vcombine.low %v10831_v20, %v10815_v35  ;;  %v7047_v24 = vld [vmem:[%s13213_s3 + $0x320] sm:$0xff] }
  0xcb   :  { %8468 = vmatprep.subr.bf16.mxu0 %v8467_v55  ;;  %v3174_v7 = vcombine.high %v11010_v1, %v10987_v12  ;;  %8440 = vmatpush3.bf16.msra.mxu1 %v8439_v29  ;;  %v2710_v49 = vrot.slane %v2695_v32, %v13360_v36  ;;  %v2724_v28 = vrot.slane %v2696_v47, %v13360_v36  ;;  %v7030_v63 = vld [vmem:[%s13213_s3 + $0x298] sm:$0xff]  ;;  %v7048_v29 = vld [vmem:[%s13213_s3 + $0x328] sm:$0xff] }
  0xcc   :  { %2821 = vmatprep.mubr.f32.mxu1 %v2669_v3  ;;  %8097 = vmatprep.mubr.msk.f32.mxu0 %vm610_vm11, %v3116_v27  ;;  %v8441_v35 = vpack.c.bf16 %v2051_v50, %v2050_v45  ;;  %v8443_v20 = vpack.c.bf16 %v2035_v17, %v2034_v60  ;;  %v8471_v56 = vpack.c.bf16 %v7046_v61, %v7045_v43  ;;  %v7055_v45 = vld [vmem:[%s13213_s3 + $0x360] sm:$0xff]  ;;  %v7056_v50 = vld [vmem:[%s13213_s3 + $0x368] sm:$0xff]  ;;  %v11080_v43 = vld [vmem:[%s13213_s3 + $0x2b0] sm:$0xff] }
  0xcd   :  { %2822 = vmatmul.mubr.f32.gmra.mrb[24].mxu1 %v2667_v37  ;;  %v2981_v55 = vcombine.low %v10839_v52, %v10842_v46  ;;  %8098 = vmatmul.mubr.msk.f32.gmra.mrb[32].mxu0 %vm610_vm11, %v3174_v7  ;;  %v2727_v3 = vcombine.low %v2710_v49, %v2724_v28  ;;  %v2950_v37 = vcombine.high %v10789_v30, %v10797_v40  ;;  %v11087_v7 = vld [vmem:[%s13213_s3 + $0x2b8] sm:$0xff]  ;;  %v7057_v49 = vld [vmem:[%s13213_s3 + $0x370] sm:$0xff] }
  0xce   :  { %v2952_v60 = vcombine.high %v10800_v48, %v10803_v2  ;;  %8470 = vmatpush3.bf16.msra.mxu0 %v8469_v54  ;;  %8442 = vmatprep.subr.bf16.mxu1 %v8441_v35  ;;  %v8473_v46 = vpack.c.bf16 %v7030_v63, %v7029_v22  ;;  %v3017_v52 = vcombine.high %v10859_v53, %v10845_v21  ;;  %v7031_v48 = vld [vmem:[%s13213_s3 + $0x2a0] sm:$0xff]  ;;  %v7032_v2 = vld [vmem:[%s13213_s3 + $0x2a8] sm:$0xff]  ;;  %v7049_v21 = vld [vmem:[%s13213_s3 + $0x330] sm:$0xff] }
  0xcf   :  { %v3019_v30 = vcombine.high %v10848_v19, %v10862_v10  ;;  %2826 = vmatprep.mubr.f32.mxu1 %v2727_v3  ;;  %8444 = vmatpush3.bf16.msra.mxu1 %v8443_v20  ;;  %v2966_v32 = vrot.slane %v2950_v37, %v13360_v36  ;;  %v8475_v17 = vpack.c.bf16 %v7048_v29, %v7047_v24  ;;  %v7050_v10 = vld [vmem:[%s13213_s3 + $0x338] sm:$0xff]  ;;  %v7051_v20 = vld [vmem:[%s13213_s3 + $0x340] sm:$0xff]  ;;  %v7060_v37 = vld [vmem:[%s13213_s3 + $0x388] sm:$0xf] }
  0xd0   :  { %v2980_v47 = vrot.slane %v2952_v60, %v13360_v36  ;;  %8472 = vmatprep.subr.bf16.mxu0 %v8471_v56  ;;  %v3033_v61 = vrot.slane %v3017_v52, %v13360_v36  ;;  %v8491_v54 = vpack.c.bf16 %v7056_v50, %v7055_v45  ;;  %v7058_v28 = vld [vmem:[%s13213_s3 + $0x378] sm:$0xff]  ;;  %v8477_v22 = vpack.c.bf16 %v7032_v2, %v7031_v48  ;;  %v7052_v56 = vld [vmem:[%s13213_s3 + $0x348] sm:$0xff]  ;;  %v11108_v24 = vld [vmem:[%s13213_s3 + $0x2c0] sm:$0xff] }
  0xd1   :  { %2827 = vmatmul.mubr.f32.gmra.mrb[26].mxu1 %v2725_v34  ;;  %v3047_v27 = vrot.slane %v3019_v30, %v13360_v36  ;;  %v3048_v63 = vcombine.low %v10893_v31, %v10896_v14  ;;  %v3084_v35 = vcombine.high %v10930_v13, %v10941_v33  ;;  %v8479_v14 = vpack.c.bf16 %v7050_v10, %v7049_v21  ;;  %v11115_v13 = vld [vmem:[%s13213_s3 + $0x2c8] sm:$0xff]  ;;  %v7059_v3 = vld [vmem:[%s13213_s3 + $0x380] sm:$0xff]  ;;  %v11136_v48 = vld [vmem:[%s13213_s3 + $0x350] sm:$0xff] }
  0xd2   :  { %v2983_v34 = vcombine.low %v2966_v32, %v2980_v47  ;;  %8474 = vmatpush3.bf16.msra.mxu0 %v8473_v46  ;;  %8492 = vmatprep.subr.bf16.mxu1 %v8491_v54  ;;  %v3086_v31 = vcombine.high %v10921_v59, %v10924_v51  ;;  %v8481_v59 = vpack.c.bf16 %v11087_v7, %v11080_v43 }
  0xd3   :  { %v3050_v29 = vcombine.low %v3033_v61, %v3047_v27  ;;  %8476 = vmatprep.subr.bf16.mxu0 %v8475_v17  ;;  %v3100_v60 = vrot.slane %v3084_v35, %v13360_v36  ;;  %v8495_v45 = vpack.c.bf16 %v7058_v28, %v7057_v49  ;;  %v3115_v46 = vcombine.low %v10998_v25, %v10979_v0  ;;  %v11153_v25 = vld [vmem:[%s13213_s3 + $0x2d8] sm:$0xff]  ;;  %v7085_v27 = vld [vmem:[%s13213_s3 + $0x410] sm:$0xff] }
  0xd4   :  { %3259 = vmatprep.mubr.f32.mxu1 %v2983_v34  ;;  %v3114_v50 = vrot.slane %v3086_v31, %v13360_v36  ;;  %v3143_v52 = vcombine.high %v10946_v62, %v10958_v18  ;;  %v3144_v30 = vcombine.high %v10961_v44, %v10961_v44  ;;  %v8483_v2 = vpack.c.bf16 %v7052_v56, %v7051_v20  ;;  %v11148_v18 = vld [vmem:[%s13213_s3 + $0x2d0] sm:$0xff]  ;;  %v7102_v20 = vld [vmem:[%s13213_s3 + $0x498] sm:$0xff] }
  0xd5   :  { %3260 = vmatmul.mubr.f32.vlgmr.msra.gmra.mrb[28].mxu1 %v2981_v55  ;;  %v11141_v55 = vld [vmem:[%s13213_s3 + $0x358] sm:$0xff]  ;;  %v8485_v0 = vpack.c.bf16 %v11115_v13, %v11108_v24  ;;  %v8499_v62 = vpack.c.bf16 %v7060_v37, %v7059_v3  ;;  %v3173_v21 = vcombine.low %v11010_v1, %v10987_v12  ;;  %v3638_v43 = vcombine.low %v10393_v58, %v10402_v42  ;;  %v7101_v35 = vld [vmem:[%s13213_s3 + $0x490] sm:$0xff] }
  0xd6   :  { %3264 = vmatprep.mubr.f32.mxu1 %v3050_v29  ;;  %8494 = vmatpush3.bf16.msra.mxu1 %v8491_v54  ;;  %v3117_v32 = vcombine.low %v3100_v60, %v3114_v50  ;;  %v3158_v47 = vrot.slane %v3143_v52, %v13360_v36  ;;  %v3172_v17 = vrot.slane %v3144_v30, %v13360_v36  ;;  %v7086_v54 = vld [vmem:[%s13213_s3 + $0x418] sm:$0xff]  ;;  %v7088_v50 = vld [vmem:[%s13213_s3 + $0x428] sm:$0xff] }
  0xd7   :  { %8478 = vmatpush3.bf16.msra.mxu0 %v8477_v22  ;;  %8496 = vmatprep.subr.bf16.mxu1 %v8495_v45  ;;  %v8487_v10 = vpack.c.bf16 %v11141_v55, %v11136_v48  ;;  %v7061_v61 = vcombine.high %v10393_v58, %v10441_v23  ;;  %v8489_v12 = vpack.c.bf16 %v11153_v25, %v11148_v18  ;;  %v11180_v23 = vld [vmem:[%s13213_s3 + $0x390] sm:$0xff]  ;;  %v11227_v30 = vld [vmem:[%s13213_s3 + $0x3a8] sm:$0xff] }
  0xd8   :  { %8480 = vmatprep.subr.bf16.mxu0 %v8479_v14  ;;  %v3175_v7 = vcombine.low %v3158_v47, %v3172_v17  ;;  %v3633_v1 = vcombine.high %v10519_v26, %v10519_v26  ;;  %v3690_v49 = vcombine.low %v10585_v57, %v10588_v41  ;;  %v3646_v28 = vrot.slane %v3638_v43, %v13360_v36  ;;  %v11232_v48 = vld [vmem:[%s13213_s3 + $0x430] sm:$0xff] }
  0xd9   :  { %3265 = vmatmul.mubr.f32.gmra.mrb[30].mxu1 %v3048_v63  ;;  %v3653_v34 = vrot.slane %v7061_v61, %v13360_v36  ;;  %v7062_v22 = vcombine.high %v10585_v57, %v10644_v11  ;;  %v11189_v63 = vld [vmem:[%s13213_s3 + $0x398] sm:$0xff]  ;;  %v8505_v56 = vpack.c.bf16 %v7086_v54, %v7085_v27  ;;  %v11245_v47 = vld [vmem:[%s13213_s3 + $0x3b0] sm:$0xff] }
  0xda   :  { %3269 = vmatprep.mubr.f32.mxu1 %v3117_v32  ;;  %8498 = vmatpush3.bf16.msra.mxu1 %v8495_v45  ;;  %v3689_v11 = vcombine.low %v10526_v4, %v3633_v1  ;;  %v3705_v24 = vrot.slane %v3690_v49, %v13360_v36  ;;  %v3654_v29 = vcombine.low %v10797_v40, %v3646_v28  ;;  %v7087_v45 = vld [vmem:[%s13213_s3 + $0x420] sm:$0xff]  ;;  %v11240_v32 = vld [vmem:[%s13213_s3 + $0x438] sm:$0xff] }
  0xdb   :  { %8482 = vmatpush3.bf16.msra.mxu0 %v8481_v59  ;;  %8501 = vmatprep.subr.msk.bf16.mxu1 %vm9064_vm8, %v8499_v62  ;;  %v3656_v14 = vcombine.low %v3653_v34, %v10859_v53  ;;  %v3712_v31 = vrot.slane %v7062_v22, %v13360_v36  ;;  %v3655_v13 = vcombine.high %v10797_v40, %v3646_v28  ;;  %v11273_v22 = vld [vmem:[%s13213_s3 + $0x440] sm:$0xff] }
  0xdc   :  { %8484 = vmatprep.subr.bf16.mxu0 %v8483_v2  ;;  %v3698_v3 = vrot.slane %v3689_v11, %v13360_v36  ;;  %v8507_v37 = vpack.c.bf16 %v11189_v63, %v11180_v23  ;;  %v3657_v60 = vcombine.high %v3653_v34, %v10859_v53  ;;  %v8537_v59 = vpack.c.bf16 %v7102_v20, %v7101_v35  ;;  %v11222_v53 = vld [vmem:[%s13213_s3 + $0x3a0] sm:$0xff]  ;;  %v11278_v63 = vld [vmem:[%s13213_s3 + $0x448] sm:$0xff] }
  0xdd   :  { %3270 = vmatmul.mubr.f32.gmra.mrb[32].mxu1 %v3115_v46  ;;  %v3664_v40 = vrot.slane %v3654_v29, %v13360_v36  ;;  %v3678_v46 = vrot.slane %v3656_v14, %v13360_v36  ;;  %v3715_v52 = vcombine.low %v3705_v24, %v3712_v31  ;;  %v3671_v2 = vrot.slane %v3655_v13, %v13360_v36  ;;  %v7103_v23 = vld [vmem:[%s13213_s3 + $0x4a0] sm:$0xff]  ;;  %v7105_v14 = vld [vmem:[%s13213_s3 + $0x4b0] sm:$0xff] }
  0xde   :  { %3274 = vmatprep.mubr.f32.mxu1 %v3175_v7  ;;  %8504 = vmatpush3.bf16.msk.msra.mxu1 %vm9064_vm8, %v8499_v62  ;;  %v3713_v55 = vcombine.low %v3698_v3, %v10848_v19  ;;  %v3685_v62 = vrot.slane %v3657_v60, %v13360_v36  ;;  %v8509_v27 = vpack.c.bf16 %v7088_v50, %v7087_v45  ;;  %v11288_v11 = vld [vmem:[%s13213_s3 + $0x3c0] sm:$0xff] }
  0xdf   :  { %8486 = vmatpush3.bf16.msra.mxu0 %v8485_v0  ;;  %8506 = vmatprep.subr.bf16.mxu1 %v8505_v56  ;;  %v11250_v0 = vld [vmem:[%s13213_s3 + $0x3b8] sm:$0xff]  ;;  %v3686_v17 = vcombine.low %v3664_v40, %v3678_v46  ;;  %v3687_v43 = vcombine.high %v3664_v40, %v3678_v46  ;;  %v3737_v61 = vrot.slane %v3715_v52, %v13360_v36 }
  0xe0   :  { %8488 = vmatprep.subr.bf16.mxu0 %v8487_v10  ;;  %v3723_v54 = vrot.slane %v3713_v55, %v13360_v36  ;;  %v3688_v7 = vcombine.low %v3671_v2, %v3685_v62  ;;  %v3714_v1 = vcombine.high %v3698_v3, %v10848_v19  ;;  %v3716_v49 = vcombine.high %v3705_v24, %v3712_v31  ;;  %v7104_v10 = vld [vmem:[%s13213_s3 + $0x4a8] sm:$0xff]  ;;  %v7106_v31 = vld [vmem:[%s13213_s3 + $0x4b8] sm:$0xf] }
  0xe1   :  { %3275 = vmatmul.mubr.f32.gmra.mrb[34].mxu1 %v3173_v21  ;;  %v8511_v28 = vpack.c.bf16 %v11227_v30, %v11222_v53  ;;  %v8513_v21 = vpack.c.bf16 %v11240_v32, %v11232_v48  ;;  %v8515_v19 = vpack.c.bf16 %v11250_v0, %v11245_v47  ;;  %v3635_v34 = vcombine.high %v10662_v38, %v10662_v38  ;;  %v11293_v24 = vld [vmem:[%s13213_s3 + $0x3c8] sm:$0xff]  ;;  %v13400_v52 = vld [vmem:[#allocation29_spill] sm:$0xff] }
  0xe2   :  { %8112 = vmatprep.mubr.msk.f32.mxu1 %vm610_vm11, %v3687_v43  ;;  %v3746_v35 = vcombine.high %v3723_v54, %v3737_v61  ;;  %3932 = vmatprep.mubr.f32.mxu0 %v3688_v7  ;;  %v3730_v20 = vrot.slane %v3714_v1, %v13360_v36  ;;  %v3744_v56 = vrot.slane %v3716_v49, %v13360_v36  ;;  %v7094_v43 = vld [vmem:[%s13213_s3 + $0x458] sm:$0xff] }
  0xe3   :  { %8490 = vmatpush3.bf16.msra.mxu0 %v8489_v12  ;;  %v3745_v29 = vcombine.low %v3723_v54, %v3737_v61  ;;  %v8541_v18 = vpack.c.bf16 %v7104_v10, %v7103_v23  ;;  %v3748_v25 = vcombine.low %v10665_v9, %v3635_v34  ;;  %v3749_v12 = vcombine.low %v10689_v39, %v10712_v8  ;;  %v7135_v10 = vld [vmem:[%s13215_s5 + $0x1b0] sm:$0xff] }
  0xe4   :  { %8538 = vmatprep.subr.bf16.mxu0 %v8537_v59  ;;  %v3747_v13 = vcombine.low %v3730_v20, %v3744_v56  ;;  %v8517_v3 = vpack.c.bf16 %v11278_v63, %v11273_v22  ;;  %v3637_v60 = vcombine.high %v10756_v16, %v10756_v16  ;;  %v7063_v45 = vcombine.high %v10689_v39, %v10749_v5  ;;  %v7077_v20 = vld [vmem:[%s13213_s3 + $0x3d0] sm:$0xff]  ;;  %v7078_v56 = vld [vmem:[%s13213_s3 + $0x3d8] sm:$0xff] }
  0xe5   :  { %8113 = vmatmul.mubr.msk.f32.vlgmr.msra.gmra.mrb[36].mxu1 %vm610_vm11, %v3746_v35  ;;  %v3756_v50 = vrot.slane %v3748_v25, %v13360_v36  ;;  %v3763_v40 = vrot.slane %v3749_v12, %v13360_v36  ;;  %v8519_v46 = vpack.c.bf16 %v11293_v24, %v11288_v11  ;;  %v8545_v48 = vpack.c.bf16 %v7106_v31, %v7105_v14  ;;  %v13401_v24 = vld [vmem:[#allocation24_spill] sm:$0xff] }
  0xe6   :  { %8508 = vmatpush3.bf16.msra.mxu1 %v8507_v37  ;;  %3933 = vmatmul.mubr.f32.vlgmr.msra.gmra.mrb[34].mxu0 %v3686_v17  ;;  %v3800_v53 = vcombine.low %v13400_v52, %v3637_v60  ;;  %v3807_v30 = vrot.slane %v7063_v45, %v13360_v36  ;;  %v7093_v17 = vld [vmem:[%s13213_s3 + $0x450] sm:$0xff]  ;;  %v3632_v11 = vcombine.high %v10393_v58, %v10393_v58  ;;  %v7096_v58 = vld [vmem:[%s13213_s3 + $0x468] sm:$0xff] }
  0xe7   :  { %8510 = vmatprep.subr.bf16.mxu1 %v8509_v27  ;;  %8540 = vmatpush3.bf16.msra.mxu0 %v8537_v59  ;;  %v3765_v5 = vcombine.high %v10941_v33, %v3756_v50  ;;  %v3767_v37 = vcombine.high %v10924_v51, %v3763_v40  ;;  %v3764_v55 = vcombine.low %v10941_v33, %v3756_v50  ;;  %v13403_v60 = vld [vmem:[#allocation36_spill] sm:$0xff] }
  0xe8   :  { %3937 = vmatprep.mubr.f32.mxu0 %v3747_v13  ;;  %8542 = vmatprep.subr.bf16.mxu0 %v8541_v18  ;;  %v3766_v2 = vcombine.low %v10924_v51, %v3763_v40  ;;  %v3814_v62 = vrot.slane %v3800_v53, %v13360_v36  ;;  %v3815_v32 = vcombine.low %v3807_v30, %v10961_v44  ;;  %v13404_v53 = vld [vmem:[#allocation34_spill] sm:$0xff] }
  0xe9   :  { %v3816_v59 = vcombine.high %v3807_v30, %v10961_v44  ;;  %v3781_v33 = vrot.slane %v3765_v5, %v13360_v36  ;;  %v3795_v51 = vrot.slane %v3767_v37, %v13360_v36  ;;  %v3774_v61 = vrot.slane %v3764_v55, %v13360_v36  ;;  %v7080_v30 = vld [vmem:[%s13213_s3 + $0x3e8] sm:$0xff]  ;;  %v7097_v55 = vld [vmem:[%s13213_s3 + $0x470] sm:$0xff] }
  0xea   :  { %8512 = vmatpush3.bf16.msra.mxu1 %v8511_v28  ;;  %3938 = vmatmul.mubr.f32.gmra.mrb[36].mxu0 %v3745_v29  ;;  %v3788_v44 = vrot.slane %v3766_v2, %v13360_v36  ;;  %v3824_v27 = vrot.slane %v3815_v32, %v13360_v36  ;;  %v3838_v54 = vrot.slane %v3814_v62, %v13360_v36  ;;  %v7136_v28 = vld [vmem:[%s13215_s5 + $0x1b8] sm:$0xff] }
  0xeb   :  { %8514 = vmatprep.subr.bf16.mxu1 %v8513_v21  ;;  %8544 = vmatpush3.bf16.msra.mxu0 %v8541_v18  ;;  %v3798_v7 = vcombine.low %v3781_v33, %v3795_v51  ;;  %v3817_v1 = vcombine.high %v3814_v62, %v3814_v62  ;;  %v3831_v49 = vrot.slane %v3816_v59, %v13360_v36  ;;  %v7095_v18 = vld [vmem:[%s13213_s3 + $0x460] sm:$0xff]  ;;  %v7098_v2 = vld [vmem:[%s13213_s3 + $0x478] sm:$0xff]  ;;  %v7119_v59 = vld [vmem:[%s13215_s5 + $0x130] sm:$0xff] }
  0xec   :  { %8547 = vmatprep.subr.msk.bf16.mxu0 %vm9064_vm8, %v8545_v48  ;;  %v8521_v23 = vpack.c.bf16 %v7094_v43, %v7093_v17  ;;  %v3796_v21 = vcombine.low %v3774_v61, %v3788_v44  ;;  %v3797_v34 = vcombine.high %v3774_v61, %v3788_v44  ;;  %v3847_v22 = vcombine.high %v3824_v27, %v3838_v54  ;;  %v7120_v17 = vld [vmem:[%s13215_s5 + $0x138] sm:$0xff]  ;;  %v7137_v43 = vld [vmem:[%s13215_s5 + $0x1c0] sm:$0xff]  ;;  %v7138_v61 = vld [vmem:[%s13215_s5 + $0x1c8] sm:$0xff] }
  0xed   :  { %v3846_v63 = vcombine.low %v3824_v27, %v3838_v54  ;;  %3942 = vmatprep.mubr.f32.mxu0 %v3798_v7  ;;  %v3845_v35 = vrot.slane %v3817_v1, %v13360_v36  ;;  %v7107_v29 = vcombine.high %v10402_v42, %v13401_v24  ;;  %v8551_v47 = vpack.c.bf16 %v7136_v28, %v7135_v10  ;;  %v7081_v44 = vld [vmem:[%s13213_s3 + $0x3f0] sm:$0xff]  ;;  %v7082_v27 = vld [vmem:[%s13213_s3 + $0x3f8] sm:$0xff]  ;;  %v7099_v10 = vld [vmem:[%s13213_s3 + $0x480] sm:$0xff] }
  0xee   :  { %8516 = vmatpush3.bf16.msra.mxu1 %v8515_v19  ;;  %3943 = vmatmul.mubr.f32.gmra.mrb[38].mxu0 %v3796_v21  ;;  %v3634_v0 = vcombine.high %v10585_v57, %v10585_v57  ;;  %v7108_v19 = vcombine.high %v10519_v26, %v10526_v4  ;;  %v4341_v12 = vcombine.low %v10402_v42, %v3632_v11  ;;  %v13402_v57 = vld [vmem:[#allocation35_spill] sm:$0xff]  ;;  %v7140_v11 = vld [vmem:[%s13215_s5 + $0x1d8] sm:$0xff] }
  0xef   :  { %8115 = vmatprep.mubr.msk.f32.mxu1 %vm610_vm11, %v3797_v34  ;;  %8518 = vmatprep.subr.bf16.mxu1 %v8517_v3  ;;  %v3848_v25 = vcombine.low %v3831_v49, %v3845_v35  ;;  %v4356_v14 = vrot.slane %v7107_v29, %v13360_v36  ;;  %v8523_v26 = vpack.c.bf16 %v7078_v56, %v7077_v20  ;;  %v7100_v28 = vld [vmem:[%s13213_s3 + $0x488] sm:$0xff]  ;;  %v7139_v56 = vld [vmem:[%s13215_s5 + $0x1d0] sm:$0xff]  ;;  %v7083_v29 = vld [vmem:[%s13213_s3 + $0x400] sm:$0xff] }
  0xf0   :  { %8116 = vmatmul.mubr.msk.f32.gmra.mrb[38].mxu1 %vm610_vm11, %v3847_v22  ;;  %8550 = vmatpush3.bf16.msk.msra.mxu0 %vm9064_vm8, %v8545_v48  ;;  %v4393_v4 = vcombine.low %v10588_v41, %v3634_v0  ;;  %v7109_v31 = vcombine.high %v10588_v41, %v13402_v57  ;;  %v11379_v13 = vrot.slane %v7108_v19, %v13360_v36  ;;  %v13405_v48 = vld [vmem:[#allocation30_spill] sm:$0xff]  ;;  %v7124_v57 = vld [vmem:[%s13215_s5 + $0x158] sm:$0xff] }
  0xf1   :  { %3947 = vmatprep.mubr.f32.mxu0 %v3848_v25  ;;  %v4349_v3 = vrot.slane %v4341_v12, %v13360_v36  ;;  %v4359_v42 = vcombine.low %v4356_v14, %v13403_v60  ;;  %v8525_v45 = vpack.c.bf16 %v7096_v58, %v7095_v18  ;;  %8552 = vmatprep.subr.bf16.mxu0 %v8551_v47  ;;  %v7122_v35 = vld [vmem:[%s13215_s5 + $0x148] sm:$0xff]  ;;  %v13406_v25 = vld [vmem:[#allocation13_spill] sm:$0xff] }
  0xf2   :  { %8520 = vmatpush3.bf16.msra.mxu1 %v8519_v46  ;;  %3948 = vmatmul.mubr.f32.gmra.mrb[40].mxu0 %v3846_v63  ;;  %v11384_v50 = vrot.slane %v4393_v4, %v13360_v36  ;;  %v11387_v40 = vrot.slane %v7109_v31, %v13360_v36  ;;  %v4416_v41 = vcombine.low %v11379_v13, %v13404_v53  ;;  %v7079_v46 = vld [vmem:[%s13213_s3 + $0x3e0] sm:$0xff]  ;;  %v7084_v47 = vld [vmem:[%s13213_s3 + $0x408] sm:$0xff]  ;;  %v7157_v12 = vrot.slane %v13406_v25, 9  ;;  %v7123_v4 = vld [vmem:[%s13215_s5 + $0x150] sm:$0xff] }
  0xf3   :  { %8522 = vmatprep.subr.bf16.mxu1 %v8521_v23  ;;  %v4357_v5 = vcombine.low %v13405_v48, %v4349_v3  ;;  %v11399_v37 = vrot.slane %v4359_v42, %v13360_v36  ;;  %v8527_v51 = vpack.c.bf16 %v7080_v30, %v7079_v46  ;;  %v8529_v7 = vpack.c.bf16 %v7098_v2, %v7097_v55  ;;  %v7121_v23 = vld [vmem:[%s13215_s5 + $0x140] sm:$0xff]  ;;  %v7151_v46 = vld [vmem:[%s13215_s5 + $0x230] sm:$0xff]  ;;  %v7152_v30 = vld [vmem:[%s13215_s5 + $0x238] sm:$0xff] }
  0xf4   :  { %v4418_v62 = vcombine.low %v11384_v50, %v11387_v40  ;;  %v11410_v32 = vrot.slane %v4416_v41, %v13360_v36  ;;  %v8553_v49 = vpack.c.bf16 %v7120_v17, %v7119_v59  ;;  %v4358_v21 = vcombine.high %v13405_v48, %v4349_v3  ;;  %v7141_v42 = vld [vmem:[%s13215_s5 + $0x1e0] sm:$0xff]  ;;  %v13409_v55 = vld [vmem:[#allocation16_spill] sm:$0xff] }
  0xf5   :  { %v11422_v33 = vrot.slane %v4357_v5, %v13360_v36  ;;  %v4360_v34 = vcombine.high %v4356_v14, %v13403_v60  ;;  %v8555_v63 = vpack.c.bf16 %v7138_v61, %v7137_v43  ;;  %v8531_v20 = vpack.c.bf16 %v7082_v27, %v7081_v44  ;;  %v13408_v48 = vld [vmem:[#allocation22_spill] sm:$0xff]  ;;  %v13410_v59 = vld [vmem:[#allocation17_spill] sm:$0xff] }
  0xf6   :  { %8524 = vmatpush3.bf16.msra.mxu1 %v8523_v26  ;;  %v11434_v54 = vrot.slane %v4418_v62, %v13360_v36  ;;  %v4417_v24 = vcombine.high %v11379_v13, %v13404_v53  ;;  %v4374_v0 = vrot.slane %v4358_v21, %v13360_v36  ;;  %v4419_v18 = vcombine.high %v11384_v50, %v11387_v40  ;;  %v13407_v13 = vld [vmem:[#allocation14_spill] sm:$0xff] }
  0xf7   :  { %8526 = vmatprep.subr.bf16.mxu1 %v8525_v45  ;;  %v4390_v1 = vcombine.high %v11422_v33, %v11399_v37  ;;  %v4388_v19 = vrot.slane %v4360_v34, %v13360_v36  ;;  %v8533_v58 = vpack.c.bf16 %v7100_v28, %v7099_v10  ;;  %v8557_v14 = vpack.c.bf16 %v7122_v35, %v7121_v23  ;;  %v7142_v45 = vld [vmem:[%s13215_s5 + $0x1e8] sm:$0xff]  ;;  %v7125_v61 = vld [vmem:[%s13215_s5 + $0x160] sm:$0xff] }
  0xf8   :  { %v4449_v22 = vcombine.high %v11410_v32, %v11434_v54  ;;  %v8559_v26 = vpack.c.bf16 %v7140_v11, %v7139_v56  ;;  %v5517_v3 = vrot.slane %v13407_v13, 5  ;;  %v8535_v60 = vpack.c.bf16 %v7084_v47, %v7083_v29  ;;  %v7153_v23 = vld [vmem:[%s13215_s5 + $0x240] sm:$0xff]  ;;  %v7154_v10 = vld [vmem:[%s13215_s5 + $0x248] sm:$0xff] }
  0xf9   :  { %8130 = vmatprep.mubr.msk.f32.mxu0 %vm610_vm11, %v4390_v1  ;;  %v4391_v31 = vcombine.low %v4374_v0, %v4388_v19  ;;  %v4433_v50 = vrot.slane %v4417_v24, %v13360_v36  ;;  %v3636_v40 = vcombine.high %v10689_v39, %v10689_v39  ;;  %v7110_v53 = vcombine.high %v10662_v38, %v10665_v9  ;;  %v13413_v35 = vld [vmem:[#allocation25_spill] sm:$0xff] }
  0xfa   :  { %8528 = vmatpush3.bf16.msra.mxu1 %v8527_v51  ;;  %8131 = vmatmul.mubr.msk.f32.vlgmr.msra.gmra.mrb[42].mxu0 %vm610_vm11, %v4449_v22  ;;  %v4447_v41 = vrot.slane %v4419_v18, %v13360_v36  ;;  %v7111_v5 = vcombine.high %v10712_v8, %v13408_v48  ;;  %v7112_v39 = vcombine.high %v10756_v16, %v13400_v52  ;;  %v7159_v38 = vrot.slane %v13409_v55, 9  ;;  %v7126_v16 = vld [vmem:[%s13215_s5 + $0x168] sm:$0xff]  ;;  %v7128_v18 = vld [vmem:[%s13215_s5 + $0x178] sm:$0xff] }
  0xfb   :  { %8530 = vmatprep.subr.bf16.mxu1 %v8529_v7  ;;  %8554 = vmatpush3.bf16.msra.mxu0 %v8553_v49  ;;  %v8561_v9 = vpack.c.bf16 %v7124_v57, %v7123_v4  ;;  %v4452_v2 = vcombine.low %v10712_v8, %v3636_v40  ;;  %v4459_v62 = vrot.slane %v7110_v53, %v13360_v36  ;;  %v5525_v17 = vrot.slane %v13410_v59, 5  ;;  %v7143_v8 = vld [vmem:[%s13215_s5 + $0x1f0] sm:$0xff]  ;;  %v13411_v7 = vld [vmem:[#allocation18_spill] sm:$0xff] }
  0xfc   :  { %8556 = vmatprep.subr.bf16.mxu0 %v8555_v63  ;;  %4635 = vmatprep.mubr.f32.mxu1 %v4391_v31  ;;  %v4389_v43 = vcombine.low %v11422_v33, %v11399_v37  ;;  %v8563_v51 = vpack.c.bf16 %v7142_v45, %v7141_v42  ;;  %v4510_v52 = vrot.slane %v7111_v5, %v13360_v36  ;;  %v7144_v37 = vld [vmem:[%s13215_s5 + $0x1f8] sm:$0xff]  ;;  %v13412_v63 = vmov 0.0|0.0   ;;  %v7146_v4 = vld [vmem:[%s13215_s5 + $0x208] sm:$0xff]  ;;  %v7129_v40 = vld [vmem:[%s13215_s5 + $0x180] sm:$0xff] }
  0xfd   :  { %v4517_v44 = vrot.slane %v7112_v39, %v13360_v36  ;;  %v8584_v33 = vpack.c.bf16 %v7152_v30, %v7151_v46  ;;  %v4466_v27 = vrot.slane %v4452_v2, %v13360_v36  ;;  %v4468_v1 = vcombine.high %v13411_v7, %v4459_v62  ;;  %v7155_v53 = vld [vmem:[%s13215_s5 + $0x250] sm:$0xff]  ;;  %v7130_v5 = vld [vmem:[%s13215_s5 + $0x188] sm:$0xff] }
  0xfe   :  { %8532 = vmatpush3.bf16.msra.mxu1 %v8531_v20  ;;  %v4467_v49 = vcombine.low %v13411_v7, %v4459_v62  ;;  %v4450_v28 = vcombine.low %v4433_v50, %v4447_v41  ;;  %v4518_v21 = vcombine.low %v4510_v52, %v10792_v6  ;;  %v4519_v34 = vcombine.high %v4510_v52, %v10792_v6  ;;  %v7127_v6 = vld [vmem:[%s13215_s5 + $0x170] sm:$0xff]  ;;  %v7156_v41 = vld [vmem:[%s13215_s5 + $0x258] sm:$0xf] }
  0xff   :  { %8534 = vmatprep.subr.bf16.mxu1 %v8533_v58  ;;  %8558 = vmatpush3.bf16.msra.mxu0 %v8557_v14  ;;  %v4520_v22 = vcombine.high %v4517_v44, %v4517_v44  ;;  %v4470_v20 = vcombine.high %v13413_v35, %v4466_v27  ;;  %v4484_v56 = vrot.slane %v4468_v1, %v13360_v36  ;;  %v13416_v2 = vld [vmem:[#allocation15_spill] sm:$0xff] }
 0x100   :  { %8560 = vmatprep.subr.bf16.mxu0 %v8559_v26  ;;  %v4469_v11 = vcombine.low %v13413_v35, %v4466_v27  ;;  %v4477_v24 = vrot.slane %v4467_v49, %v13360_v36  ;;  %v8565_v29 = vpack.c.bf16 %v7126_v16, %v7125_v61  ;;  %v8567_v47 = vpack.c.bf16 %v7144_v37, %v7143_v8  ;;  %v11613_v16 = vld [vmem:[#allocation2 + $0x28] sm:$0xff]  ;;  %v7131_v49 = vld [vmem:[%s13215_s5 + $0x190] sm:$0xff]  ;;  %v7149_v35 = vld [vmem:[%s13215_s5 + $0x220] sm:$0xff] }
 0x101   :  { %v4448_v0 = vcombine.low %v11410_v32, %v11434_v54  ;;  %v8587_v19 = vpack.c.bf16 %v7154_v10, %v7153_v23  ;;  %v4498_v58 = vrot.slane %v4470_v20, %v13360_v36  ;;  %v11551_v26 = vrot.slane %v4517_v44, %v13360_v36  ;;  %v7145_v54 = vld [vmem:[%s13215_s5 + $0x200] sm:$0xff]  ;;  %v13417_v52 = vld [vmem:[#allocation19_spill] sm:$0xff]  ;;  %v7132_v23 = vld [vmem:[%s13215_s5 + $0x198] sm:$0xff] }
 0x102   :  { %8536 = vmatpush3.bf16.msra.mxu1 %v8535_v60  ;;  %v4491_v14 = vrot.slane %v4469_v11, %v13360_v36  ;;  %v11566_v57 = vrot.slane %v4518_v21, %v13360_v36  ;;  %v4534_v31 = vrot.slane %v4519_v34, %v13360_v36  ;;  %v4548_v60 = vrot.slane %v4520_v22, %v13360_v36  ;;  %v13418_v34 = vld [vmem:[#allocation23_spill] sm:$0xff] }
 0x103   :  { %8583 = vmatprep.subr.bf16.mxu1 %v13412_v63  ;;  %8562 = vmatpush3.bf16.msra.mxu0 %v8561_v9  ;;  %v4501_v42 = vcombine.low %v4484_v56, %v4498_v58  ;;  %v8569_v50 = vpack.c.bf16 %v7128_v18, %v7127_v6  ;;  %v11586_v46 = vsel %vm11555_vm14, %v7157_v12, %v5517_v3  ;;  %v5451_v9 = vld [vmem:[%s13215_s5 + $0x80] sm:$0xff]  ;;  %v5452_v12 = vld [vmem:[%s13215_s5 + $0x88] sm:$0xff]  ;;  %v11601_v3 = vld [vmem:[#allocation2 + $0x10] sm:$0xff]  ;;  %v5521_v62 = vrot.slane %v13416_v2, 5 }
 0x104   :  { %8564 = vmatprep.subr.bf16.mxu0 %v8563_v51  ;;  %v4500_v45 = vcombine.high %v4477_v24, %v4491_v14  ;;  %v11590_v30 = vsel %vm11555_vm14, %v7159_v38, %v5525_v17  ;;  %v8571_v48 = vpack.c.bf16 %v7146_v4, %v7145_v54  ;;  %v4499_v39 = vcombine.low %v4477_v24, %v4491_v14  ;;  %v7148_v51 = vld [vmem:[%s13215_s5 + $0x218] sm:$0xff]  ;;  %v7150_v20 = vld [vmem:[%s13215_s5 + $0x228] sm:$0xff]  ;;  %v7133_v4 = vld [vmem:[%s13215_s5 + $0x1a0] sm:$0xff] }
 0x105   :  { %4636 = vmatmul.mubr.f32.vlgmr.msra.gmra.mrb[40].mxu1 %v4389_v43  ;;  %v7158_v38 = vrot.slane %v11601_v3, 9  ;;  %v4550_v17 = vcombine.high %v11566_v57, %v11551_v26  ;;  %v7147_v43 = vld [vmem:[%s13215_s5 + $0x210] sm:$0xff]  ;;  %v4551_v61 = vcombine.low %v4534_v31, %v4548_v60  ;;  %v7160_v8 = vrot.slane %v11613_v16, 9  ;;  %v11644_v24 = vld [vmem:[#allocation2 + $0x58] sm:$0xff]  ;;  %v5436_v6 = vld [vmem:[%s13215_s5 + $0x8] sm:$0xff] }
 0x106   :  { %4640 = vmatprep.mubr.f32.mxu1 %v4450_v28  ;;  %8585 = vmatpush3.bf16.msra.mxu1 %v8584_v33  ;;  %v5529_v44 = vrot.slane %v13417_v52, 5  ;;  %v8590_v37 = vpack.c.bf16 %v7156_v41, %v7155_v53  ;;  %v5564_v33 = vcombine.high %v11586_v46, %v11590_v30  ;;  %v8573_v27 = vpack.c.bf16 %v7130_v5, %v7129_v40  ;;  %v11629_v28 = vld [vmem:[#allocation2 + $0x40] sm:$0xff]  ;;  %v13420_v18 = vld [vmem:[#allocation20_spill] sm:$0xff] }
 0x107   :  { %8586 = vmatprep.subr.bf16.mxu1 %v13412_v63  ;;  %8566 = vmatpush3.bf16.msra.mxu0 %v8565_v29  ;;  %v8593_v7 = vpack.c.bf16 %v5452_v12, %v5451_v9  ;;  %v8575_v1 = vpack.c.bf16 %v7148_v51, %v7147_v43  ;;  %v4549_v10 = vcombine.low %v11566_v57, %v11551_v26  ;;  %v7162_v21 = vrot.slane %v11629_v28, 9  ;;  %v13421_v14 = vld [vmem:[#allocation21_spill] sm:$0xff]  ;;  %v5453_v57 = vld [vmem:[%s13215_s5 + $0x90] sm:$0xff]  ;;  %v13422_v60 = vld [vmem:[#allocation26_spill] sm:$0xff] }
 0x108   :  { %8568 = vmatprep.subr.bf16.mxu0 %v8567_v47  ;;  %8133 = vmatprep.mubr.msk.f32.mxu0 %vm610_vm11, %v4500_v45  ;;  %v5537_v22 = vrot.slane %v13418_v34, 5  ;;  %v5522_v56 = vsel %vm11555_vm14, %v7158_v38, %v5521_v62  ;;  %v5530_v11 = vsel %vm11555_vm14, %v7160_v8, %v5529_v44  ;;  %v7164_v29 = vrot.slane %v11644_v24, 9  ;;  %v13419_v47 = vld [vmem:[#allocation28_spill] sm:$0xff]  ;;  %v13423_v45 = vld [vmem:[#allocation27_spill] sm:$0xff]  ;;  %v13424_v12 = vld [vmem:[#allocation33_spill] sm:$0xff] }
 0x109   :  { %4641 = vmatmul.mubr.f32.gmra.mrb[42].mxu1 %v4448_v0  ;;  %8134 = vmatmul.mubr.msk.f32.gmra.mrb[44].mxu0 %vm610_vm11, %v4550_v17  ;;  %v5545_v0 = vrot.slane %v13419_v47, 5  ;;  %v7161_v58 = vrot.slane %v13420_v18, 9  ;;  %v5533_v26 = vrot.slane %v13421_v14, 5  ;;  %v8577_v54 = vpack.c.bf16 %v7132_v23, %v7131_v49  ;;  %v5454_v31 = vld [vmem:[%s13215_s5 + $0x98] sm:$0xff]  ;;  %v11669_v40 = vld [vmem:[#allocation2 + $0x70] sm:$0xff]  ;;  %v7200_v9 = vld [vmem:[%s13215_s5 + $0x2e8] sm:$0xff] }
 0x10a   :  { %4645 = vmatprep.mubr.f32.mxu1 %v4501_v42  ;;  %8588 = vmatpush3.bf16.msra.mxu1 %v8587_v19  ;;  %v5435_v19 = vld [vmem:[%s13215_s5] sm:$0xff]  ;;  %v7163_v42 = vrot.slane %v13422_v60, 9  ;;  %v7166_v53 = vrot.slane %v11669_v40, 9  ;;  %v8579_v41 = vpack.c.bf16 %v7150_v20, %v7149_v35  ;;  %v5565_v5 = vcombine.low %v5522_v56, %v5530_v11  ;;  %v11682_v62 = vld [vmem:[#allocation2 + $0x88] sm:$0xff]  ;;  %v13426_v44 = vld [vmem:[#allocation40_spill] sm:$0xff] }
 0x10b   :  { %8589 = vmatprep.subr.bf16.mxu1 %v13412_v63  ;;  %8570 = vmatpush3.bf16.msra.mxu0 %v8569_v50  ;;  %v5541_v50 = vrot.slane %v13423_v45, 5  ;;  %v5553_v38 = vrot.slane %v13424_v12, 5  ;;  %v7168_v17 = vrot.slane %v11682_v62, 9  ;;  %v13425_v43 = vmov 0.0   ;;  %v13428_v23 = vld [vmem:[#allocation32_spill] sm:$0xff]  ;;  %v7183_v35 = vld [vmem:[%s13215_s5 + $0x260] sm:$0xff] }
 0x10c   :  { %8572 = vmatprep.subr.bf16.mxu0 %v8571_v48  ;;  %5651 = vmatprep.mubr.f32.mxu0 %v5564_v33  ;;  %v7134_v48 = vld [vmem:[%s13215_s5 + $0x1a8] sm:$0xff]  ;;  %v8595_v51 = vpack.c.bf16 %v5436_v6, %v5435_v19  ;;  %v5546_v8 = vsel %vm11555_vm14, %v7164_v29, %v5545_v0  ;;  %v8597_v33 = vpack.c.bf16 %v5454_v31, %v5453_v57  ;;  %v5455_v20 = vld [vmem:[%s13215_s5 + $0xa0] sm:$0xff]  ;;  %v5988_v36 = vrot.slane %v13416_v2, 6 }
 0x10d   :  { %4646 = vmatmul.mubr.f32.gmra.mrb[44].mxu1 %v4499_v39  ;;  %v7199_v39 = vld [vmem:[%s13215_s5 + $0x2e0] sm:$0xff]  ;;  %v5456_v56 = vld [vmem:[%s13215_s5 + $0xa8] sm:$0xff]  ;;  %v11723_v31 = vsel %vm11555_vm14, %v7161_v58, %v5533_v26  ;;  %v5563_v58 = vcombine.low %v11586_v46, %v11590_v30  ;;  %v5457_v46 = vld [vmem:[%s13215_s5 + $0xb0] sm:$0xff] }
 0x10e   :  { %4650 = vmatprep.mubr.f32.mxu1 %v4551_v61  ;;  %8592 = vmatpush3.bf16.msk.msra.mxu1 %vm9064_vm8, %v8590_v37  ;;  %v5538_v61 = vsel %vm11555_vm14, %v7162_v21, %v5537_v22  ;;  %v5561_v37 = vrot.slane %v13426_v44, 5  ;;  %v8581_v21 = vpack.c.bf16 %v7134_v48, %v7133_v4  ;;  %v8635_v22 = vpack.c.bf16 %v7200_v9, %v7199_v39  ;;  %v13429_v11 = vld [vmem:[#allocation38_spill] sm:$0xff]  ;;  %v13430_v0 = vld [vmem:[#allocation39_spill] sm:$0xff]  ;;  %v7202_v4 = vld [vmem:[%s13215_s5 + $0x2f8] sm:$0xff] }
 0x10f   :  { %8574 = vmatpush3.bf16.msra.mxu0 %v8573_v27  ;;  %8594 = vmatprep.subr.bf16.mxu1 %v8593_v7  ;;  %v5437_v27 = vld [vmem:[%s13215_s5 + $0x10] sm:$0xff]  ;;  %v5438_v7 = vld [vmem:[%s13215_s5 + $0x18] sm:$0xff]  ;;  %v7167_v29 = vrot.slane %v13429_v11, 9  ;;  %v5557_v19 = vrot.slane %v13430_v0, 5  ;;  %v7184_v6 = vld [vmem:[%s13215_s5 + $0x268] sm:$0xff]  ;;  %v5568_v57 = vcombine.low %v5538_v61, %v5546_v8  ;;  %v8601_v26 = vpack.c.bf16 %v5456_v56, %v5455_v20 }
 0x110   :  { %8576 = vmatprep.subr.bf16.mxu0 %v8575_v1  ;;  %v13427_v1 = vld [vmem:[#allocation31_spill] sm:$0xff]  ;;  %v8599_v48 = vpack.c.bf16 %v5438_v7, %v5437_v27  ;;  %v5562_v39 = vsel %vm11555_vm14, %v7168_v17, %v5561_v37  ;;  %v7221_v9 = vrot.slane %v13406_v25, 10  ;;  %v5458_v30 = vld [vmem:[%s13215_s5 + $0xb8] sm:$0xff]  ;;  %v7223_v61 = vrot.slane %v13409_v55, 10 }
 0x111   :  { %4651 = vmatmul.mubr.f32.gmra.mrb[46].mxu1 %v4549_v10  ;;  %v7165_v49 = vrot.slane %v13427_v1, 9  ;;  %v5549_v10 = vrot.slane %v13428_v23, 5  ;;  %v7185_v8 = vld [vmem:[%s13215_s5 + $0x270] sm:$0xff]  ;;  %v7186_v37 = vld [vmem:[%s13215_s5 + $0x278] sm:$0xff]  ;;  %v5558_v7 = vsel %vm11555_vm14, %v7167_v29, %v5557_v19  ;;  %v7204_v20 = vld [vmem:[%s13215_s5 + $0x308] sm:$0xff]  ;;  %v8605_v29 = vpack.c.bf16 %v5458_v30, %v5457_v46 }
 0x112   :  { %8148 = vmatprep.mubr.msk.f32.mxu1 %vm8965_vm1, %v13425_v43  ;;  %v11774_v56 = vld [vmem:[#allocation2 + $0x8] sm:$0xff]  ;;  %v5441_v19 = vld [vmem:[%s13215_s5 + $0x30] sm:$0xff] }
 0x113   :  { %8578 = vmatpush3.bf16.msra.mxu0 %v8577_v54  ;;  %v7201_v54 = vld [vmem:[%s13215_s5 + $0x2f0] sm:$0xff]  ;;  %v5550_v27 = vsel %vm11555_vm14, %v7165_v49, %v5549_v10  ;;  %v11776_v49 = vld [vmem:[#allocation2 + $0x20] sm:$0xff] }
 0x114   :  { %8580 = vmatprep.subr.bf16.mxu0 %v8579_v41  ;;  %v11727_v41 = vsel %vm11555_vm14, %v7163_v42, %v5541_v50  ;;  %v5439_v42 = vld [vmem:[%s13215_s5 + $0x20] sm:$0xff]  ;;  %v5440_v50 = vld [vmem:[%s13215_s5 + $0x28] sm:$0xff]  ;;  %v8639_v17 = vpack.c.bf16 %v7202_v4, %v7201_v54  ;;  %v7174_v32 = vcombine.low %v11774_v56, %v11776_v49  ;;  %v8641_v4 = vpack.c.bf16 %v7186_v37, %v7185_v8 }
 0x115   :  { %8149 = vmatmul.mubr.msk.f32.vlgmr.msra.gmra.mrb[48].mxu1 %vm610_vm11, %v5565_v5  ;;  %v5554_v5 = vsel %vm11555_vm14, %v7166_v53, %v5553_v38  ;;  %v5984_v53 = vrot.slane %v13407_v13, 6  ;;  %v8637_v38 = vpack.c.bf16 %v7184_v6, %v7183_v35  ;;  %v7203_v35 = vld [vmem:[%s13215_s5 + $0x300] sm:$0xff]  ;;  %v5442_v6 = vld [vmem:[%s13215_s5 + $0x38] sm:$0xff]  ;;  %v5566_v54 = vcombine.low %v11723_v31, %v11727_v41 }
 0x116   :  { %8596 = vmatpush3.bf16.msra.mxu1 %v8595_v51  ;;  %8151 = vmatprep.mubr.msk.f32.mxu1 %vm8965_vm1, %v13425_v43  ;;  %v5567_v51 = vcombine.high %v11723_v31, %v11727_v41  ;;  %v7188_v31 = vld [vmem:[%s13215_s5 + $0x288] sm:$0xff]  ;;  %v5569_v46 = vcombine.low %v5550_v27, %v5558_v7 }
 0x117   :  { %8598 = vmatprep.subr.bf16.mxu1 %v8597_v33  ;;  %8582 = vmatpush3.bf16.msra.mxu0 %v8581_v21  ;;  %v5571_v33 = vcombine.low %v5554_v5, %v5562_v39  ;;  %v5992_v21 = vrot.slane %v13410_v59, 6  ;;  %v5570_v5 = vcombine.high %v5550_v27, %v5558_v7  ;;  %v8643_v39 = vpack.c.bf16 %v7204_v20, %v7203_v35  ;;  %v7190_v27 = vld [vmem:[%s13215_s5 + $0x298] sm:$0xff]  ;;  %v5445_v20 = vld [vmem:[%s13215_s5 + $0x50] sm:$0xff] }
 0x118   :  { %8636 = vmatprep.subr.bf16.mxu0 %v8635_v22  ;;  %v8603_v22 = vpack.c.bf16 %v5440_v50, %v5439_v42  ;;  %v11809_v41 = vsel %vm11782_vm6, %v7221_v9, %v5984_v53  ;;  %v8607_v42 = vpack.c.bf16 %v5442_v6, %v5441_v19  ;;  %v7205_v50 = vld [vmem:[%s13215_s5 + $0x310] sm:$0xff]  ;;  %v5443_v9 = vld [vmem:[%s13215_s5 + $0x40] sm:$0xff]  ;;  %v5444_v53 = vld [vmem:[%s13215_s5 + $0x48] sm:$0xff] }
 0x119   :  { %8152 = vmatmul.mubr.msk.f32.gmra.mrb[50].mxu1 %vm610_vm11, %v5568_v57  ;;  %v5459_v57 = vld [vmem:[%s13215_s5 + $0xc0] sm:$0xff]  ;;  %v8611_v7 = vpack.c.bf16 %v5444_v53, %v5443_v9  ;;  %v5464_v6 = vld [vmem:[%s13215_s5 + $0xe8] sm:$0xff]  ;;  %v5465_v53 = vld [vmem:[%s13215_s5 + $0xf0] sm:$0xff] }
 0x11a   :  { %8600 = vmatpush3.bf16.msra.mxu1 %v8599_v48  ;;  %8154 = vmatprep.mubr.msk.f32.mxu1 %vm8965_vm1, %v13425_v43  ;;  %v5460_v48 = vld [vmem:[%s13215_s5 + $0xc8] sm:$0xff]  ;;  %v5463_v19 = vld [vmem:[%s13215_s5 + $0xe0] sm:$0xff] }
 0x11b   :  { %5652 = vmatmul.mubr.f32.vlgmr.msra.gmra.mrb[46].mxu0 %v5563_v58  ;;  %8602 = vmatprep.subr.bf16.mxu1 %v8601_v26  ;;  %v7187_v58 = vld [vmem:[%s13215_s5 + $0x280] sm:$0xff]  ;;  %v11813_v26 = vsel %vm11782_vm6, %v7223_v61, %v5992_v21  ;;  %v5462_v61 = vld [vmem:[%s13215_s5 + $0xd8] sm:$0xff] }
 0x11c   :  { %8638 = vmatpush3.bf16.msra.mxu0 %v8637_v38  ;;  %5656 = vmatprep.mubr.f32.mxu0 %v5567_v51  ;;  %v7206_v38 = vld [vmem:[%s13215_s5 + $0x318] sm:$0xff]  ;;  %v8645_v30 = vpack.c.bf16 %v7188_v31, %v7187_v58  ;;  %v5461_v51 = vld [vmem:[%s13215_s5 + $0xd0] sm:$0xff]  ;;  %v6031_v8 = vcombine.high %v11809_v41, %v11813_v26  ;;  %v7207_v21 = vld [vmem:[%s13215_s5 + $0x320] sm:$0xff] }
 0x11d   :  { %8640 = vmatprep.subr.bf16.mxu0 %v8639_v17  ;;  %8155 = vmatmul.mubr.msk.f32.gmra.mrb[52].mxu1 %vm610_vm11, %v5571_v33  ;;  %v8609_v17 = vpack.c.bf16 %v5460_v48, %v5459_v57  ;;  %v8647_v37 = vpack.c.bf16 %v7206_v38, %v7205_v50  ;;  %v7189_v33 = vld [vmem:[%s13215_s5 + $0x290] sm:$0xff]  ;;  %v8613_v35 = vpack.c.bf16 %v5462_v61, %v5461_v51  ;;  %v7192_v57 = vld [vmem:[%s13215_s5 + $0x2a8] sm:$0xff]  ;;  %v7210_v58 = vld [vmem:[%s13215_s5 + $0x338] sm:$0xff] }
 0x11e   :  { %8604 = vmatpush3.bf16.msra.mxu1 %v8603_v22  ;;  %5835 = vmatprep.mubr.f32.mxu1 %v7174_v32  ;;  %v7208_v22 = vld [vmem:[%s13215_s5 + $0x328] sm:$0xff]  ;;  %v5446_v32 = vld [vmem:[%s13215_s5 + $0x58] sm:$0xff]  ;;  %v5447_v50 = vld [vmem:[%s13215_s5 + $0x60] sm:$0xff] }
 0x11f   :  { %8606 = vmatprep.subr.bf16.mxu1 %v8605_v29  ;;  %5657 = vmatmul.mubr.f32.gmra.mrb[48].mxu0 %v5566_v54  ;;  %v8649_v29 = vpack.c.bf16 %v7190_v27, %v7189_v33  ;;  %v8651_v54 = vpack.c.bf16 %v7208_v22, %v7207_v21  ;;  %v5448_v38 = vld [vmem:[%s13215_s5 + $0x68] sm:$0xff]  ;;  %v7193_v51 = vld [vmem:[%s13215_s5 + $0x2b0] sm:$0xff]  ;;  %v7194_v61 = vld [vmem:[%s13215_s5 + $0x2b8] sm:$0xff] }
 0x120   :  { %8642 = vmatpush3.bf16.msra.mxu0 %v8641_v4  ;;  %5661 = vmatprep.mubr.f32.mxu0 %v5570_v5  ;;  %v7191_v4 = vld [vmem:[%s13215_s5 + $0x2a0] sm:$0xff]  ;;  %v8615_v5 = vpack.c.bf16 %v5446_v32, %v5445_v20  ;;  %v7212_v33 = vld [vmem:[%s13215_s5 + $0x348] sm:$0xff]  ;;  %v5450_v21 = vld [vmem:[%s13215_s5 + $0x78] sm:$0xff]  ;;  %v8657_v22 = vpack.c.bf16 %v7194_v61, %v7193_v51 }
 0x121   :  { %8644 = vmatprep.subr.bf16.mxu0 %v8643_v39  ;;  %v7209_v39 = vld [vmem:[%s13215_s5 + $0x330] sm:$0xff]  ;;  %v8653_v9 = vpack.c.bf16 %v7192_v57, %v7191_v4  ;;  %v7195_v20 = vld [vmem:[%s13215_s5 + $0x2c0] sm:$0xff]  ;;  %v7196_v32 = vld [vmem:[%s13215_s5 + $0x2c8] sm:$0xff] }
 0x122   :  { %8608 = vmatpush3.bf16.msra.mxu1 %v8607_v42  ;;  %v7375_v48 = vpop.f32.mrb[0].mxu0  ;;  %v8617_v42 = vpack.c.bf16 %v5464_v6, %v5463_v19  ;;  %v7213_v19 = vld [vmem:[%s13215_s5 + $0x350] sm:$0xff]  ;;  %v7214_v6 = vld [vmem:[%s13215_s5 + $0x358] sm:$0xff]  ;;  %v5468_v4 = vld [vmem:[%s13215_s5 + $0x108] sm:$0xff]  ;;  %v8661_v57 = vpack.c.bf16 %v7196_v32, %v7195_v20 }
 0x123   :  { %8610 = vmatprep.subr.bf16.mxu1 %v8609_v17  ;;  %5662 = vmatmul.mubr.f32.gmra.mrb[50].mxu0 %v5569_v46  ;;  %v7376_v31 = vpop.f32.mrb[1].mxu0  ;;  %v5466_v46 = vld [vmem:[%s13215_s5 + $0xf8] sm:$0xff]  ;;  %v11939_v51 = vld [vmem:[#allocation2 + $0x50] sm:$0xff]  ;;  %v7215_v32 = vld [vmem:[%s13215_s5 + $0x360] sm:$0xff] }
 0x124   :  { %8646 = vmatpush3.bf16.msra.mxu0 %v8645_v30  ;;  %6118 = vmatprep.mubr.f32.mxu0 %v6031_v8  ;;  %v11877_v17 = vadd.f32 %v7376_v31, %v7375_v48  ;;  %v8655_v30 = vpack.c.bf16 %v7210_v58, %v7209_v39  ;;  %v8619_v8 = vpack.c.bf16 %v5448_v38, %v5447_v50  ;;  %v7225_v48 = vrot.slane %v13420_v18, 10  ;;  %v11923_v58 = vld [vmem:[#allocation2] sm:$0xff]  ;;  %v11925_v31 = vld [vmem:[#allocation2 + $0x18] sm:$0xff]  ;;  %v7197_v50 = vld [vmem:[%s13215_s5 + $0x2d0] sm:$0xff] }
 0x125   :  { %8648 = vmatprep.subr.bf16.mxu0 %v8647_v37  ;;  %v7211_v37 = vld [vmem:[%s13215_s5 + $0x340] sm:$0xff]  ;;  %v8621_v27 = vpack.c.bf16 %v5466_v46, %v5465_v53  ;;  %v8663_v39 = vpack.c.bf16 %v7214_v6, %v7213_v19  ;;  %v7198_v38 = vld [vmem:[%s13215_s5 + $0x2d8] sm:$0xff]  ;;  %v6008_v53 = vrot.slane %v13423_v45, 6 }
 0x126   :  { %8612 = vmatpush3.bf16.msra.mxu1 %v8611_v7  ;;  %v5449_v7 = vld [vmem:[%s13215_s5 + $0x70] sm:$0xff] }
 0x127   :  { %8614 = vmatprep.subr.bf16.mxu1 %v8613_v35  ;;  %v8659_v35 = vpack.c.bf16 %v7212_v33, %v7211_v37  ;;  %v5470_v37 = vld [vmem:[%s13215_s5 + $0x118] sm:$0xff]  ;;  %v8665_v33 = vpack.c.bf16 %v7198_v38, %v7197_v50  ;;  %v6030_v50 = vcombine.low %v11809_v41, %v11813_v26  ;;  %v11992_v26 = vld [vmem:[#allocation2 + $0x60] sm:$0xff] }
 0x128   :  { %8650 = vmatpush3.bf16.msra.mxu0 %v8649_v29  ;;  %v8623_v29 = vpack.c.bf16 %v5450_v21, %v5449_v7  ;;  %v6016_v7 = vrot.slane %v13428_v23, 6  ;;  %v7231_v21 = vrot.slane %v13429_v11, 10  ;;  %v7254_v41 = vld [vmem:[%s13215_s5 + $0x418] sm:$0xff]  ;;  %13435 = vst [vmem:[#allocation24_spill] sm:$0xff] %v11992_v26 }
 0x129   :  { %8652 = vmatprep.subr.bf16.mxu0 %v8651_v54  ;;  %v5467_v54 = vld [vmem:[%s13215_s5 + $0x100] sm:$0xff] }
 0x12a   :  { %8616 = vmatpush3.bf16.msra.mxu1 %v8615_v5  ;;  %v6000_v5 = vrot.slane %v13421_v14, 6  ;;  %v8626_v46 = vpack.c.bf16 %v5468_v4, %v5467_v54  ;;  %v6024_v54 = vrot.slane %v13430_v0, 6 }
 0x12b   :  { %8618 = vmatprep.subr.bf16.mxu1 %v8617_v42  ;;  %v7173_v42 = vcombine.low %v11923_v58, %v11925_v31 }
 0x12c   :  { %8654 = vmatpush3.bf16.msra.mxu0 %v8653_v9  ;;  %v7227_v9 = vrot.slane %v13422_v60, 10  ;;  %v6001_v19 = vsel %vm11782_vm6, %v7225_v48, %v6000_v5  ;;  %v5471_v48 = vld [vmem:[%s13215_s5 + $0x120] sm:$0xff]  ;;  %v5472_v5 = vld [vmem:[%s13215_s5 + $0x128] sm:$0xf] }
 0x12d   :  { %8656 = vmatprep.subr.bf16.mxu0 %v8655_v30  ;;  %v11937_v30 = vld [vmem:[#allocation2 + $0x38] sm:$0xff] }
 0x12e   :  { %8620 = vmatpush3.bf16.msra.mxu1 %v8619_v8  ;;  %v7176_v61 = vcombine.low %v11937_v30, %v11939_v51  ;;  %v5469_v8 = vld [vmem:[%s13215_s5 + $0x110] sm:$0xff]  ;;  %v6009_v6 = vsel %vm11782_vm6, %v7227_v9, %v6008_v53 }
 0x12f   :  { %8622 = vmatprep.subr.bf16.mxu1 %v8621_v27  ;;  %v7229_v27 = vrot.slane %v13427_v1, 10  ;;  %v8629_v4 = vpack.c.bf16 %v5470_v37, %v5469_v8  ;;  %v6034_v9 = vcombine.high %v6001_v19, %v6009_v6  ;;  %v7253_v53 = vld [vmem:[%s13215_s5 + $0x410] sm:$0xff]  ;;  %v7218_v37 = vld [vmem:[%s13215_s5 + $0x378] sm:$0xff] }
 0x130   :  { %8658 = vmatpush3.bf16.msra.mxu0 %v8657_v22  ;;  %v11953_v22 = vld [vmem:[#allocation2 + $0x30] sm:$0xff] }
 0x131   :  { %8660 = vmatprep.subr.bf16.mxu0 %v8659_v35  ;;  %v11955_v35 = vld [vmem:[#allocation2 + $0x48] sm:$0xff]  ;;  %v7217_v8 = vld [vmem:[%s13215_s5 + $0x370] sm:$0xff] }
 0x132   :  { %8624 = vmatpush3.bf16.msra.mxu1 %v8623_v29  ;;  %v7175_v20 = vcombine.low %v11953_v22, %v11955_v35  ;;  %v7216_v29 = vld [vmem:[%s13215_s5 + $0x368] sm:$0xff] }
 0x133   :  { %8625 = vmatprep.subr.bf16.mxu1 %v13412_v63  ;;  %v8668_v38 = vpack.c.bf16 %v7216_v29, %v7215_v32  ;;  %v8632_v32 = vpack.c.bf16 %v5472_v5, %v5471_v48  ;;  %v7222_v29 = vrot.slane %v11601_v3, 10  ;;  %v7219_v48 = vld [vmem:[%s13215_s5 + $0x380] sm:$0xff]  ;;  %v7220_v5 = vld [vmem:[%s13215_s5 + $0x388] sm:$0xf] }
 0x134   :  { %8662 = vmatpush3.bf16.msra.mxu0 %v8661_v57  ;;  %v11970_v57 = vld [vmem:[#allocation2 + $0x68] sm:$0xff] }
 0x135   :  { %8664 = vmatprep.subr.bf16.mxu0 %v8663_v39  ;;  %5836 = vmatmul.mubr.f32.vlgmr.msra.gmra.mrb[54].mxu1 %v7173_v42  ;;  %13433 = vst [vmem:[#allocation37_spill] sm:$0xff] %v11970_v57  ;;  %v11972_v39 = vld [vmem:[#allocation2 + $0x80] sm:$0xff] }
 0x136   :  { %8627 = vmatpush3.bf16.msra.mxu1 %v8626_v46  ;;  %5840 = vmatprep.mubr.f32.mxu1 %v7176_v61  ;;  %13434 = vst [vmem:[#allocation29_spill] sm:$0xff] %v11972_v39  ;;  %v7178_v42 = vcombine.low %v11970_v57, %v11972_v39  ;;  %v11994_v46 = vld [vmem:[#allocation2 + $0x78] sm:$0xff]  ;;  %v7232_v39 = vrot.slane %v11682_v62, 10 }
 0x137   :  { %8628 = vmatprep.subr.bf16.mxu1 %v13412_v63  ;;  %13436 = vst [vmem:[#allocation35_spill] sm:$0xff] %v11994_v46  ;;  %v7177_v61 = vcombine.low %v11992_v26, %v11994_v46  ;;  %v6033_v26 = vcombine.low %v6001_v19, %v6009_v6  ;;  %v8677_v46 = vpack.c.bf16 %v7254_v41, %v7253_v53  ;;  %v7255_v6 = vld [vmem:[%s13215_s5 + $0x420] sm:$0xff]  ;;  %v7242_v57 = vld [vmem:[%s13215_s5 + $0x3b8] sm:$0xff] }
 0x138   :  { %8666 = vmatpush3.bf16.msra.mxu0 %v8665_v33  ;;  %v12006_v33 = vsel %vm11782_vm6, %v7229_v27, %v6016_v7  ;;  %v7237_v27 = vld [vmem:[%s13215_s5 + $0x390] sm:$0xff]  ;;  %v7238_v7 = vld [vmem:[%s13215_s5 + $0x398] sm:$0xff] }
 0x139   :  { %8667 = vmatprep.subr.bf16.mxu0 %v13412_v63  ;;  %5841 = vmatmul.mubr.f32.gmra.mrb[56].mxu1 %v7175_v20  ;;  %v12010_v20 = vsel %vm11782_vm6, %v7231_v21, %v6024_v54  ;;  %v7224_v21 = vrot.slane %v11613_v16, 10  ;;  %v5996_v54 = vrot.slane %v13417_v52, 6  ;;  %v8679_v41 = vpack.c.bf16 %v7238_v7, %v7237_v27  ;;  %v7257_v27 = vld [vmem:[%s13215_s5 + $0x430] sm:$0xff]  ;;  %v7258_v7 = vld [vmem:[%s13215_s5 + $0x438] sm:$0xff] }
 0x13a   :  { %8630 = vmatpush3.bf16.msra.mxu1 %v8629_v4  ;;  %5845 = vmatprep.mubr.f32.mxu1 %v7178_v42  ;;  %v8671_v4 = vpack.c.bf16 %v7218_v37, %v7217_v8  ;;  %v6037_v19 = vcombine.high %v12006_v33, %v12010_v20  ;;  %v7256_v42 = vld [vmem:[%s13215_s5 + $0x428] sm:$0xff]  ;;  %v6036_v53 = vcombine.low %v12006_v33, %v12010_v20  ;;  %v7277_v8 = vrot.slane %v13409_v55, 11  ;;  %v7239_v33 = vld [vmem:[%s13215_s5 + $0x3a0] sm:$0xff] }
 0x13b   :  { %6119 = vmatmul.mubr.f32.vlgmr.msra.gmra.mrb[52].mxu0 %v6030_v50  ;;  %8631 = vmatprep.subr.bf16.mxu1 %v13412_v63  ;;  %v5749_v50 = vcombine.low %v11601_v3, %v11613_v16  ;;  %v12052_v37 = vsel %vm11782_vm6, %v7222_v29, %v5988_v36  ;;  %v8674_v36 = vpack.c.bf16 %v7220_v5, %v7219_v48  ;;  %v7228_v20 = vrot.slane %v11644_v24, 10  ;;  %v7241_v5 = vld [vmem:[%s13215_s5 + $0x3b0] sm:$0xff] }
 0x13c   :  { %8669 = vmatpush3.bf16.msra.mxu0 %v8668_v38  ;;  %6123 = vmatprep.mubr.f32.mxu0 %v6034_v9  ;;  %v7226_v38 = vrot.slane %v11629_v28, 10  ;;  %v7275_v9 = vrot.slane %v13406_v25, 11  ;;  %v12056_v25 = vsel %vm11782_vm6, %v7224_v21, %v5996_v54  ;;  %v6012_v29 = vrot.slane %v13419_v47, 6  ;;  %v7269_v54 = vld [vmem:[%s13215_s5 + $0x490] sm:$0xff] }
 0x13d   :  { %8670 = vmatprep.subr.bf16.mxu0 %v13412_v63  ;;  %5846 = vmatmul.mubr.f32.gmra.mrb[58].mxu1 %v7177_v61  ;;  %v6271_v61 = vrot.slane %v13407_v13, 7  ;;  %v7240_v13 = vld [vmem:[%s13215_s5 + $0x3a8] sm:$0xff]  ;;  %v7378_v55 = vpop.f32.mrb[2].mxu0 }
 0x13e   :  { %8634 = vmatpush3.bf16.msk.msra.mxu1 %vm9064_vm8, %v8632_v32  ;;  %8169 = vmatprep.mubr.msk.f32.mxu1 %vm8965_vm1, %v13425_v43  ;;  %v8681_v32 = vpack.c.bf16 %v7256_v42, %v7255_v6  ;;  %v7379_v21 = vpop.f32.mrb[3].mxu0  ;;  %v6020_v6 = vrot.slane %v13424_v12, 6  ;;  %v8683_v48 = vpack.c.bf16 %v7240_v13, %v7239_v33 }
 0x13f   :  { %6124 = vmatmul.mubr.f32.gmra.mrb[54].mxu0 %v6033_v26  ;;  %8678 = vmatprep.subr.bf16.mxu1 %v8677_v46  ;;  %v6279_v26 = vrot.slane %v13410_v59, 7  ;;  %v6004_v46 = vrot.slane %v13418_v34, 6  ;;  %v5752_v59 = vcombine.low %v11629_v28, %v11644_v24  ;;  %v12086_v42 = vadd.f32 %v7379_v21, %v7378_v55 }
 0x140   :  { %8672 = vmatpush3.bf16.msra.mxu0 %v8671_v4  ;;  %6128 = vmatprep.mubr.f32.mxu0 %v6037_v19  ;;  %v7270_v4 = vld [vmem:[%s13215_s5 + $0x498] sm:$0xff]  ;;  %v7230_v19 = vrot.slane %v11669_v40, 10  ;;  %v6028_v55 = vrot.slane %v13426_v44, 6  ;;  %v12109_v33 = vsel %vm12102_vm7, %v7275_v9, %v6271_v61  ;;  %v7259_v9 = vld [vmem:[%s13215_s5 + $0x440] sm:$0xff]  ;;  %v7260_v61 = vld [vmem:[%s13215_s5 + $0x448] sm:$0xff] }
 0x141   :  { %8673 = vmatprep.subr.bf16.mxu0 %v13412_v63  ;;  %8170 = vmatmul.mubr.msk.f32.vlgmr.msra.gmra.mrb[48].mxu1 %vm610_vm11, %v5749_v50  ;;  %v6032_v50 = vcombine.low %v12052_v37, %v12056_v25  ;;  %v8685_v37 = vpack.c.bf16 %v7258_v7, %v7257_v27  ;;  %v7276_v25 = vrot.slane %v11601_v3, 11  ;;  %v12113_v13 = vsel %vm12102_vm7, %v7277_v8, %v6279_v26  ;;  %v7271_v26 = vld [vmem:[%s13215_s5 + $0x4a0] sm:$0xff] }
 0x142   :  { %8680 = vmatpush3.bf16.msra.mxu1 %v8679_v41  ;;  %8172 = vmatprep.mubr.msk.f32.mxu1 %vm8965_vm1, %v13425_v43  ;;  %v8710_v21 = vpack.c.bf16 %v7270_v4, %v7269_v54  ;;  %v6013_v3 = vsel %vm11782_vm6, %v7228_v20, %v6012_v29  ;;  %v6275_v8 = vrot.slane %v13416_v2, 7  ;;  %v12142_v2 = vsel %vm11782_vm6, %v7230_v19, %v6020_v6  ;;  %v7243_v20 = vld [vmem:[%s13215_s5 + $0x3c0] sm:$0xff] }
 0x143   :  { %6129 = vmatmul.mubr.f32.gmra.mrb[56].mxu0 %v6036_v53  ;;  %8682 = vmatprep.subr.bf16.mxu1 %v8681_v32  ;;  %v6005_v53 = vsel %vm11782_vm6, %v7226_v38, %v6004_v46  ;;  %v7381_v32 = vpop.f32.mrb[4].mxu0  ;;  %v5755_v38 = vcombine.low %v11669_v40, %v11682_v62  ;;  %v8687_v46 = vpack.c.bf16 %v7242_v57, %v7241_v5  ;;  %v7278_v29 = vrot.slane %v11613_v16, 11  ;;  %v7244_v57 = vld [vmem:[%s13215_s5 + $0x3c8] sm:$0xff]  ;;  %v12165_v16 = vld [vmem:[%s13215_s5 + $0x458] sm:$0xff]  ;;  %v7433_v4 = vpop.f32.mrb[10].mxu1 }
 0x144   :  { %8676 = vmatpush3.bf16.msk.msra.mxu0 %vm9064_vm8, %v8674_v36  ;;  %8190 = vmatprep.mubr.msk.f32.mxu0 %vm8965_vm1, %v13425_v43  ;;  %v7272_v36 = vld [vmem:[%s13215_s5 + $0x4a8] sm:$0xff]  ;;  %v7382_v27 = vpop.f32.mrb[5].mxu0  ;;  %v12152_v7 = vsel %vm11782_vm6, %v7232_v39, %v6028_v55  ;;  %v6283_v54 = vrot.slane %v13417_v52, 7  ;;  %v6318_v39 = vcombine.high %v12109_v33, %v12113_v13  ;;  %v6035_v19 = vcombine.low %v6005_v53, %v6013_v3  ;;  %v7273_v52 = vld [vmem:[%s13215_s5 + $0x4b0] sm:$0xff]  ;;  %v7274_v55 = vld [vmem:[%s13215_s5 + $0x4b8] sm:$0xf] }
 0x145   :  { %8709 = vmatprep.subr.bf16.mxu0 %v13412_v63  ;;  %8173 = vmatmul.mubr.msk.f32.gmra.mrb[50].mxu1 %vm610_vm11, %v5752_v59  ;;  %v12160_v59 = vld [vmem:[%s13215_s5 + $0x450] sm:$0xff]  ;;  %v12168_v10 = vadd.f32 %v7382_v27, %v7381_v32  ;;  %v8689_v6 = vpack.c.bf16 %v7260_v61, %v7259_v9  ;;  %v8713_v5 = vpack.c.bf16 %v7272_v36, %v7271_v26  ;;  %v7308_v53 = vld [vmem:[%s13215_s5 + $0x548] sm:$0xff]  ;;  %v12196_v9 = vld [vmem:[%s13215_s5 + $0x4c0] sm:$0xff] }
 0x146   :  { %8684 = vmatpush3.bf16.msra.mxu1 %v8683_v48  ;;  %8175 = vmatprep.mubr.msk.f32.mxu1 %vm8965_vm1, %v13425_v43  ;;  %v7434_v48 = vpop.f32.mrb[11].mxu1  ;;  %v8693_v3 = vpack.c.bf16 %v12165_v16, %v12160_v59  ;;  %v12204_v26 = vsel %vm12102_vm7, %v7278_v29, %v6283_v54  ;;  %v12209_v36 = vld [vmem:[%s13215_s5 + $0x4c8] sm:$0xff]  ;;  %v7263_v27 = vld [vmem:[%s13215_s5 + $0x460] sm:$0xff]  ;;  %v6291_v16 = vrot.slane %v13418_v34, 7  ;;  %v8716_v54 = vpack.c.bf16 %v7274_v55, %v7273_v52  ;;  %v12249_v52 = vld [vmem:[%s13215_s5 + $0x4d0] sm:$0xff] }
 0x147   :  { %8191 = vmatmul.mubr.msk.f32.vlgmr.msra.gmra.mrb[58].mxu0 %vm610_vm11, %v6032_v50  ;;  %8686 = vmatprep.subr.bf16.mxu1 %v8685_v37  ;;  %v7435_v32 = vadd.f32 %v7434_v48, %v7433_v4  ;;  %v6038_v50 = vcombine.low %v12142_v2, %v12152_v7  ;;  %v8691_v37 = vpack.c.bf16 %v7244_v57, %v7243_v20  ;;  %v7384_v61 = vpop.f32.mrb[6].mxu0  ;;  %v7245_v2 = vld [vmem:[%s13215_s5 + $0x3d0] sm:$0xff]  ;;  %v7436_v20 = vpop.f32.mrb[12].mxu1  ;;  %v7264_v7 = vld [vmem:[%s13215_s5 + $0x468] sm:$0xff]  ;;  %v7310_v48 = vld [vmem:[%s13215_s5 + $0x558] sm:$0xff] }
 0x148   :  { %8711 = vmatpush3.bf16.msra.mxu0 %v8710_v21  ;;  %8193 = vmatprep.mubr.msk.f32.mxu0 %vm8965_vm1, %v13425_v43  ;;  %v7307_v21 = vld [vmem:[%s13215_s5 + $0x540] sm:$0xff]  ;;  %v7437_v57 = vpop.f32.mrb[13].mxu1 }
 0x149   :  { %8712 = vmatprep.subr.bf16.mxu0 %v13412_v63  ;;  %8176 = vmatmul.mubr.msk.f32.gmra.mrb[52].mxu1 %vm610_vm11, %v5755_v38  ;;  %v12200_v38 = vsel %vm12102_vm7, %v7276_v25, %v6275_v8  ;;  %v7385_v25 = vpop.f32.mrb[7].mxu0  ;;  %v7280_v8 = vrot.slane %v11629_v28, 11  ;;  %v12219_v29 = vadd.f32 %v7435_v32, %v11877_v17  ;;  %v7282_v28 = vrot.slane %v11644_v24, 11 }
 0x14a   :  { %8688 = vmatpush3.bf16.msra.mxu1 %v8687_v46  ;;  %v7246_v46 = vld [vmem:[%s13215_s5 + $0x3d8] sm:$0xff]  ;;  %6405 = vmatprep.mubr.f32.mxu1 %v6318_v39  ;;  %v12228_v59 = vadd.f32 %v7385_v25, %v7384_v61  ;;  %v6299_v17 = vrot.slane %v13419_v47, 7  ;;  %v7438_v4 = vadd.f32 %v7437_v57, %v7436_v20  ;;  %v8719_v39 = vpack.c.bf16 %v7308_v53, %v7307_v21  ;;  %v7309_v47 = vld [vmem:[%s13215_s5 + $0x550] sm:$0xff]  ;;  %v7247_v53 = vld [vmem:[%s13215_s5 + $0x3e0] sm:$0xff] }
 0x14b   :  { %8194 = vmatmul.mubr.msk.f32.gmra.mrb[60].mxu0 %vm610_vm11, %v6035_v19  ;;  %8690 = vmatprep.subr.bf16.mxu1 %v8689_v6  ;;  %v8721_v19 = vpack.c.bf16 %v12209_v36, %v12196_v9  ;;  %v7387_v6 = vpop.f32.mrb[8].mxu0  ;;  %v6319_v34 = vcombine.low %v12200_v38, %v12204_v26  ;;  %v8695_v24 = vpack.c.bf16 %v7246_v46, %v7245_v2  ;;  %v7439_v55 = vpop.f32.mrb[14].mxu1  ;;  %v12258_v21 = vld [vmem:[%s13215_s5 + $0x4d8] sm:$0xff]  ;;  %v7248_v9 = vld [vmem:[%s13215_s5 + $0x3e8] sm:$0xff]  ;;  %v7265_v26 = vld [vmem:[%s13215_s5 + $0x470] sm:$0xff]  ;;  %v6307_v46 = vrot.slane %v13424_v12, 7 }
 0x14c   :  { %8714 = vmatpush3.bf16.msra.mxu0 %v8713_v5  ;;  %8196 = vmatprep.mubr.msk.f32.mxu0 %vm8965_vm1, %v13425_v43  ;;  %v8697_v5 = vpack.c.bf16 %v7264_v7, %v7263_v27  ;;  %v7388_v32 = vpop.f32.mrb[9].mxu0  ;;  %v7440_v61 = vpop.f32.mrb[15].mxu1  ;;  %v7266_v36 = vld [vmem:[%s13215_s5 + $0x478] sm:$0xff]  ;;  %v7286_v20 = vrot.slane %v11682_v62, 11  ;;  %v8723_v25 = vpack.c.bf16 %v7310_v48, %v7309_v47  ;;  %v12298_v27 = vld [vmem:[%s13215_s5 + $0x568] sm:$0xff]  ;;  %v12303_v12 = vld [vmem:[%s13215_s5 + $0x3f0] sm:$0xff]  ;;  %v8699_v7 = vpack.c.bf16 %v7248_v9, %v7247_v53 }
 0x14d   :  { %8715 = vmatprep.subr.bf16.mxu0 %v13412_v63  ;;  %v12266_v38 = vadd.f32 %v7388_v32, %v7387_v6  ;;  %v7441_v2 = vadd.f32 %v7440_v61, %v7439_v55  ;;  %v12310_v57 = vld [vmem:[%s13215_s5 + $0x3f8] sm:$0xff]  ;;  %v12329_v6 = vld [vmem:[%s13215_s5 + $0x4e0] sm:$0xff]  ;;  %v7279_v47 = vrot.slane %v13420_v18, 11  ;;  %v6287_v55 = vrot.slane %v13421_v14, 7  ;;  %v12367_v14 = vld [vmem:[%s13215_s5 + $0x4f0] sm:$0xff] }
 0x14e   :  { %8692 = vmatpush3.bf16.msra.mxu1 %v8691_v37  ;;  %v12252_v37 = vadd.f32 %v7438_v4, %v12086_v42  ;;  %v12270_v42 = vsel %vm12102_vm7, %v7280_v8, %v6291_v16  ;;  %v12293_v8 = vld [vmem:[%s13215_s5 + $0x560] sm:$0xff]  ;;  %v12349_v18 = vld [vmem:[%s13215_s5 + $0x578] sm:$0xff]  ;;  %v8703_v53 = vpack.c.bf16 %v12310_v57, %v12303_v12 }
 0x14f   :  { %8197 = vmatmul.mubr.msk.f32.gmra.mrb[62].mxu0 %vm610_vm11, %v6038_v50  ;;  %8694 = vmatprep.subr.bf16.mxu1 %v8693_v3  ;;  %v12274_v50 = vsel %vm12102_vm7, %v7282_v28, %v6299_v17  ;;  %v7284_v3 = vrot.slane %v11669_v40, 11  ;;  %v6315_v40 = vrot.slane %v13426_v44, 7  ;;  %v7491_v62 = vpop.f32.mrb[10].mxu0  ;;  %v8725_v44 = vpack.c.bf16 %v12258_v21, %v12249_v52  ;;  %v12315_v16 = vld [vmem:[%s13215_s5 + $0x480] sm:$0xff]  ;;  %v12320_v28 = vld [vmem:[%s13215_s5 + $0x488] sm:$0xff]  ;;  %v7442_v17 = vpop.f32.mrb[16].mxu1 }
 0x150   :  { %8718 = vmatpush3.bf16.msk.msra.mxu0 %vm9064_vm8, %v8716_v54  ;;  %8211 = vmatprep.mubr.msk.f32.mxu0 %vm8965_vm1, %v13425_v43  ;;  %v7492_v54 = vpop.f32.mrb[11].mxu0  ;;  %v12323_v4 = vadd.f32 %v7441_v2, %v12168_v10  ;;  %v6322_v48 = vcombine.low %v12270_v42, %v12274_v50  ;;  %v12339_v10 = vld [vmem:[%s13215_s5 + $0x4e8] sm:$0xff]  ;;  %v8727_v21 = vpack.c.bf16 %v12298_v27, %v12293_v8  ;;  %v12372_v61 = vld [vmem:[%s13215_s5 + $0x4f8] sm:$0xff]  ;;  %v12377_v42 = vld [vmem:[%s13215_s5 + $0x400] sm:$0xff]  ;;  %v7281_v50 = vrot.slane %v13422_v60, 11 }
 0x151   :  { %8720 = vmatprep.subr.bf16.mxu0 %v8719_v39  ;;  %v8701_v39 = vpack.c.bf16 %v7266_v36, %v7265_v26  ;;  %v12334_v52 = vadd.f32 %v7492_v54, %v7491_v62  ;;  %v6316_v32 = vsel %vm12102_vm7, %v7286_v20, %v6315_v40  ;;  %v8705_v9 = vpack.c.bf16 %v12320_v28, %v12315_v16  ;;  %v12383_v26 = vld [vmem:[%s13215_s5 + $0x408] sm:$0xff]  ;;  %v12394_v60 = vld [vmem:[%s13215_s5 + $0x580] sm:$0xff]  ;;  %v12441_v54 = vld [vmem:[%s13215_s5 + $0x510] sm:$0xff] }
 0x152   :  { %8696 = vmatpush3.bf16.msra.mxu1 %v8695_v24  ;;  %v7443_v24 = vpop.f32.mrb[17].mxu1  ;;  %v6295_v36 = vrot.slane %v13423_v45, 7  ;;  %v6303_v20 = vrot.slane %v13428_v23, 7  ;;  %v12399_v8 = vld [vmem:[%s13215_s5 + $0x588] sm:$0xff]  ;;  %v6311_v23 = vrot.slane %v13430_v0, 7  ;;  %v8729_v12 = vpack.c.bf16 %v12339_v10, %v12329_v6  ;;  %v12411_v62 = vld [vmem:[%s13215_s5 + $0x500] sm:$0xff] }
 0x153   :  { %8212 = vmatmul.mubr.msk.f32.vlgmr.msra.gmra.mrb[64].mxu0 %vm610_vm11, %v6319_v34  ;;  %8698 = vmatprep.subr.bf16.mxu1 %v8697_v5  ;;  %v12344_v34 = vld [vmem:[%s13215_s5 + $0x570] sm:$0xff]  ;;  %v7444_v5 = vadd.f32 %v7443_v24, %v7442_v17  ;;  %v7445_v2 = vpop.f32.mrb[18].mxu1  ;;  %v8733_v16 = vpack.c.bf16 %v12372_v61, %v12367_v14  ;;  %v8707_v28 = vpack.c.bf16 %v12383_v26, %v12377_v42  ;;  %v12436_v17 = vld [vmem:[%s13215_s5 + $0x598] sm:$0xff]  ;;  %v7323_v10 = vld [vmem:[%s13215_s5 + $0x5c0] sm:$0xff] }
 0x154   :  { %8722 = vmatpush3.bf16.msra.mxu0 %v8721_v19  ;;  %8214 = vmatprep.mubr.msk.f32.mxu0 %vm8965_vm1, %v13425_v43  ;;  %v6308_v19 = vsel %vm12102_vm7, %v7284_v3, %v6307_v46  ;;  %v7494_v3 = vpop.f32.mrb[12].mxu0  ;;  %v7283_v46 = vrot.slane %v13427_v1, 11  ;;  %v7446_v45 = vpop.f32.mrb[19].mxu1  ;;  %v7285_v1 = vrot.slane %v13429_v11, 11  ;;  %v12416_v11 = vld [vmem:[%s13215_s5 + $0x508] sm:$0xff]  ;;  %v12421_v0 = vld [vmem:[%s13215_s5 + $0x590] sm:$0xff]  ;;  %v8731_v57 = vpack.c.bf16 %v12349_v18, %v12344_v34 }
 0x155   :  { %8724 = vmatprep.subr.bf16.mxu0 %v8723_v25  ;;  %v7495_v40 = vpop.f32.mrb[13].mxu0  ;;  %v12389_v25 = vadd.f32 %v7444_v5, %v12228_v59  ;;  %v6325_v59 = vcombine.low %v6308_v19, %v6316_v32  ;;  %v12454_v6 = vsel %vm12102_vm7, %v7281_v50, %v6295_v36  ;;  %v12481_v19 = vld [vmem:[%s13215_s5 + $0x5a8] sm:$0xff]  ;;  %v12486_v32 = vld [vmem:[%s13215_s5 + $0x520] sm:$0xff]  ;;  %v8735_v14 = vpack.c.bf16 %v12399_v8, %v12394_v60  ;;  %v12506_v42 = vld [vmem:[%s13215_s5 + $0x5b0] sm:$0xff] }
 0x156   :  { %8700 = vmatpush3.bf16.msra.mxu1 %v8699_v7  ;;  %v12404_v27 = vadd.f32 %v7495_v40, %v7494_v3  ;;  %v7447_v7 = vadd.f32 %v7446_v45, %v7445_v2  ;;  %v12458_v24 = vsel %vm12102_vm7, %v7283_v46, %v6303_v20  ;;  %v8737_v61 = vpack.c.bf16 %v12416_v11, %v12411_v62  ;;  %v12529_v36 = vld [vmem:[%s13215_s5 + $0x5b8] sm:$0xff]  ;;  %v12534_v2 = vld [vmem:[%s13215_s5 + $0x530] sm:$0xff] }
 0x157   :  { %8702 = vmatprep.subr.bf16.mxu1 %v8701_v39  ;;  %8215 = vmatmul.mubr.msk.f32.gmra.mrb[66].mxu0 %vm610_vm11, %v6322_v48  ;;  %v12450_v39 = vsel %vm12102_vm7, %v7279_v47, %v6287_v55  ;;  %v12463_v48 = vld [vmem:[%s13215_s5 + $0x5a0] sm:$0xff]  ;;  %v7324_v47 = vld [vmem:[%s13215_s5 + $0x5c8] sm:$0xff]  ;;  %v1141_v34 = vpop.f32.mrb[0].mxu1  ;;  %v12476_v55 = vsel %vm12102_vm7, %v7285_v1, %v6311_v23  ;;  %v8739_v50 = vpack.c.bf16 %v12436_v17, %v12421_v0  ;;  %v12539_v46 = vld [vmem:[%s13215_s5 + $0x538] sm:$0xff] }
 0x158   :  { %8726 = vmatpush3.bf16.msra.mxu0 %v8725_v44  ;;  %8217 = vmatprep.mubr.msk.f32.mxu0 %vm8965_vm1, %v13425_v43  ;;  %v7330_v44 = vcombine.high %v11774_v56, %v11776_v49  ;;  %v12446_v56 = vld [vmem:[%s13215_s5 + $0x518] sm:$0xff]  ;;  %v7497_v49 = vpop.f32.mrb[14].mxu0  ;;  %v12472_v5 = vadd.f32 %v7447_v7, %v12266_v38  ;;  %v12491_v38 = vld [vmem:[%s13215_s5 + $0x528] sm:$0xff]  ;;  %v8024_v41 = vpop.f32.mrb[1].mxu1  ;;  %v6320_v3 = vcombine.low %v12450_v39, %v12454_v6  ;;  %v12550_v23 = vld [vmem:[%s13215_s5 + $0x5e0] sm:$0xff] }
 0x159   :  { %8728 = vmatprep.subr.bf16.mxu0 %v8727_v21  ;;  %v7498_v18 = vpop.f32.mrb[15].mxu0  ;;  %v8762_v21 = vadd.f32 %v12219_v29, %v1141_v34  ;;  %v12511_v29 = vld [vmem:[%s13215_s5 + $0x5d0] sm:$0xff]  ;;  %v8741_v26 = vpack.c.bf16 %v12446_v56, %v12441_v54  ;;  %v6324_v40 = vcombine.high %v12458_v24, %v12476_v55  ;;  %v8743_v60 = vpack.c.bf16 %v12481_v19, %v12463_v48 }
 0x15a   :  { %8704 = vmatpush3.bf16.msra.mxu1 %v8703_v53  ;;  %v12495_v53 = vadd.f32 %v7498_v18, %v7497_v49  ;;  %v8752_v8 = vpack.c.bf16 %v7324_v47, %v7323_v10  ;;  %v6323_v45 = vcombine.low %v12458_v24, %v12476_v55  ;;  %v8745_v62 = vpack.c.bf16 %v12491_v38, %v12486_v32  ;;  %v12580_v10 = vld [vmem:[#allocation2 + $0x28] sm:$0xff] }
 0x15b   :  { %8706 = vmatprep.subr.bf16.mxu1 %v8705_v9  ;;  %8218 = vmatmul.mubr.msk.f32.gmra.mrb[68].mxu0 %vm610_vm11, %v6325_v59  ;;  %v6317_v9 = vcombine.low %v12109_v33, %v12113_v13  ;;  %v12516_v33 = vld [vmem:[%s13215_s5 + $0x5d8] sm:$0xff]  ;;  %v6321_v13 = vcombine.high %v12450_v39, %v12454_v6  ;;  %v7500_v20 = vpop.f32.mrb[16].mxu0  ;;  %v12555_v59 = vld [vmem:[%s13215_s5 + $0x5e8] sm:$0xf]  ;;  %v1170_v11 = vcombine.high %v8762_v21, %v8762_v21  ;;  %v12578_v6 = vld [vmem:[#allocation2 + $0x10] sm:$0xff] }
 0x15c   :  { %8730 = vmatpush3.bf16.msra.mxu0 %v8729_v12  ;;  %6643 = vmatprep.mubr.f32.mxu0 %v7330_v44  ;;  %v1146_v1 = vpop.f32.mrb[2].mxu1  ;;  %v7501_v12 = vpop.f32.mrb[17].mxu0  ;;  %v8755_v17 = vpack.c.bf16 %v12516_v33, %v12511_v29  ;;  %v8758_v39 = vpack.c.bf16 %v12555_v59, %v12550_v23  ;;  %v13439_v18 = vld [vmem:[#allocation11_spill] sm:$0xff]  ;;  %v13444_v32 = vcombine.high %v12578_v6, %v12580_v10 }
 0x15d   :  { %8732 = vmatprep.subr.bf16.mxu0 %v8731_v57  ;;  %v8764_v0 = vadd.f32 %v12252_v37, %v1146_v1  ;;  %v8027_v7 = vpop.f32.mrb[3].mxu1  ;;  %v12561_v44 = vadd.f32 %v7501_v12, %v7500_v20  ;;  %v6968_v57 = vld [vmem:[%s13212_s2] ss:$0 sm:$0xff]  ;;  %v12585_v41 = vrot.slane %v8762_v21, %v13439_v18  ;;  %v12591_v20 = vrot.slane %v1170_v11, %v13439_v18 }
 0x15e   :  { %8708 = vmatpush3.bf16.msra.mxu1 %v8707_v28  ;;  %v8747_v28 = vpack.c.bf16 %v12529_v36, %v12506_v42  ;;  %v1786_v29 = vcombine.high %v6968_v57, %v6968_v57  ;;  %v12588_v33 = vrot.slane %v6968_v57, %v13439_v18  ;;  %v13440_v12 = vld [vmem:[#allocation29_spill] sm:$0xff] }
 0x15f   :  { %8751 = vmatprep.subr.bf16.mxu1 %v13412_v63  ;;  %v7503_v34 = vpop.f32.mrb[18].mxu0  ;;  %v1187_v1 = vcombine.high %v8764_v0, %v8764_v0  ;;  %v12598_v21 = vrot.slane %v8764_v0, %v13439_v18  ;;  %v13441_v7 = vld [vmem:[#allocation37_spill] sm:$0xff]  ;;  %v1186_v57 = vcombine.high %v12591_v20, %v12591_v20 }
 0x160   :  { %8734 = vmatpush3.bf16.msra.mxu0 %v8733_v16  ;;  %v12604_v11 = vld [vmem:[#allocation2 + $0x40] sm:$0xff]  ;;  %v12606_v16 = vld [vmem:[#allocation2 + $0x58] sm:$0xff] }
 0x161   :  { %8736 = vmatprep.subr.bf16.mxu0 %v8735_v14  ;;  %6406 = vmatmul.mubr.f32.vlgmr.msra.gmra.mrb[60].mxu1 %v6317_v9  ;;  %v1151_v9 = vpop.f32.mrb[4].mxu1  ;;  %v7504_v14 = vpop.f32.mrb[19].mxu0 }
 0x162   :  { %6410 = vmatprep.mubr.f32.mxu1 %v6321_v13  ;;  %8753 = vmatpush3.bf16.msra.mxu1 %v8752_v8  ;;  %v8766_v23 = vadd.f32 %v12323_v4, %v1151_v9  ;;  %v8030_v59 = vpop.f32.mrb[5].mxu1  ;;  %v12595_v13 = vadd.f32 %v7504_v14, %v7503_v34  ;;  %v13443_v9 = vld [vmem:[#allocation24_spill] sm:$0xff]  ;;  %v1185_v4 = vcombine.high %v12585_v41, %v12585_v41 }
 0x163   :  { %8754 = vmatprep.subr.bf16.mxu1 %v13412_v63  ;;  %v12612_v14 = vld [vmem:[#allocation2 + $0x70] sm:$0xff]  ;;  %v12614_v59 = vld [vmem:[#allocation2 + $0x88] sm:$0xff]  ;;  %v1639_v8 = vpop.f32.mrb[20].mxu0 }
 0x164   :  { %8738 = vmatpush3.bf16.msra.mxu0 %v8737_v61  ;;  %v1204_v34 = vcombine.high %v8766_v23, %v8766_v23  ;;  %v13442_v61 = vld [vmem:[#allocation35_spill] sm:$0xff]  ;;  %v1156_v37 = vpop.f32.mrb[6].mxu1  ;;  %v1640_v49 = vadd.f32 %v12334_v52, %v1639_v8  ;;  %v8051_v0 = vpop.f32.mrb[21].mxu0  ;;  %v12641_v8 = vrot.slane %v8766_v23, %v13439_v18 }
 0x165   :  { %8740 = vmatprep.subr.bf16.mxu0 %v8739_v50  ;;  %6411 = vmatmul.mubr.f32.gmra.mrb[62].mxu1 %v6320_v3  ;;  %v12620_v50 = vrot.slane %v1786_v29, %v13439_v18  ;;  %v12624_v3 = vcombine.high %v12588_v33, %v12588_v33  ;;  %v8768_v52 = vadd.f32 %v12389_v25, %v1156_v37 }
 0x166   :  { %6415 = vmatprep.mubr.f32.mxu1 %v6324_v40  ;;  %8756 = vmatpush3.bf16.msra.mxu1 %v8755_v17  ;;  %v12631_v40 = vrot.slane %v1187_v1, %v13439_v18  ;;  %v8033_v17 = vpop.f32.mrb[7].mxu1  ;;  %v1202_v29 = vcombine.high %v12598_v21, %v12598_v21  ;;  %v1668_v0 = vcombine.high %v1640_v49, %v1640_v49 }
 0x167   :  { %8757 = vmatprep.subr.bf16.mxu1 %v13412_v63  ;;  %v1675_v47 = vrot.slane %v1640_v49, %v13439_v18  ;;  %v12651_v63 = vrot.slane %v1204_v34, %v13439_v18  ;;  %v1221_v25 = vcombine.high %v8768_v52, %v8768_v52  ;;  %v12654_v54 = vrot.slane %v8768_v52, %v13439_v18  ;;  %v1644_v56 = vpop.f32.mrb[22].mxu0 }
 0x168   :  { %8742 = vmatpush3.bf16.msra.mxu0 %v8741_v26  ;;  %v1161_v48 = vpop.f32.mrb[8].mxu1  ;;  %v1682_v19 = vrot.slane %v1668_v0, %v13439_v18  ;;  %v8054_v55 = vpop.f32.mrb[23].mxu0  ;;  %v1645_v37 = vadd.f32 %v12404_v27, %v1644_v56  ;;  %v13445_v52 = vpack.c.bf16 %v12539_v46, %v12534_v2  ;;  %v13446_v56 = vcombine.high %v12604_v11, %v12606_v16 }
 0x169   :  { %8744 = vmatprep.subr.bf16.mxu0 %v8743_v60  ;;  %6416 = vmatmul.mubr.f32.gmra.mrb[64].mxu1 %v6323_v45  ;;  %v1683_v26 = vcombine.high %v1675_v47, %v1675_v47  ;;  %v1762_v24 = vadd.f32 %v1675_v47, %v12585_v41  ;;  %v1203_v60 = vcombine.high %v12631_v40, %v12631_v40  ;;  %v8036_v15 = vpop.f32.mrb[9].mxu1 }
 0x16a   :  { %8760 = vmatpush3.bf16.msk.msra.mxu1 %vm9064_vm8, %v8758_v39  ;;  %8232 = vmatprep.mubr.msk.f32.mxu1 %vm8965_vm1, %v13425_v43  ;;  %v12665_v45 = vrot.slane %v1221_v25, %v13439_v18  ;;  %v12668_v49 = vadd.f32 %v12472_v5, %v1161_v48  ;;  %v1684_v39 = vcombine.high %v1682_v19, %v1682_v19  ;;  %vm2013_vm8 = vcmask 1043459  }
 0x16b   :  { %v1763_v1 = vadd.f32 %v1683_v26, %v1185_v4  ;;  %v1764_v47 = vadd.f32 %v1682_v19, %v12591_v20  ;;  %v1805_v41 = vadd.f32 %v12588_v33, %v1762_v24  ;;  %v1219_v5 = vcombine.high %v12641_v8, %v12641_v8 }
 0x16c   :  { %8746 = vmatpush3.bf16.msra.mxu0 %v8745_v62  ;;  %v1220_v27 = vcombine.high %v12651_v63, %v12651_v63  ;;  %v1685_v38 = vcombine.high %v1645_v37, %v1645_v37  ;;  %v1649_v62 = vpop.f32.mrb[24].mxu0  ;;  %v1236_v42 = vcombine.high %v12654_v54, %v12654_v54  ;;  %v1765_v36 = vadd.f32 %v1684_v39, %v1186_v57 }
 0x16d   :  { %8748 = vmatprep.subr.bf16.mxu0 %v8747_v28  ;;  %8233 = vmatmul.mubr.msk.f32.vlgmr.msra.gmra.mrb[66].mxu1 %vm610_vm11, %v13444_v32  ;;  %v1806_v28 = vadd.f32 %v12624_v3, %v1763_v1  ;;  %v1807_v20 = vadd.f32 %v12620_v50, %v1764_v47  ;;  %v8057_v23 = vpop.f32.mrb[25].mxu0  ;;  %v1237_v6 = vcombine.high %v12665_v45, %v12665_v45  ;;  %v1823_v17 = vmax.f32 %v1805_v41, 0.0 }
 0x16e   :  { %8235 = vmatprep.mubr.msk.f32.mxu1 %vm8965_vm1, %v13425_v43  ;;  %v1692_v10 = vrot.slane %v1645_v37, %v13439_v18  ;;  %v1699_v4 = vrot.slane %v1685_v38, %v13439_v18  ;;  %v1650_v34 = vadd.f32 %v12495_v53, %v1649_v62  ;;  %v1808_v57 = vadd.f32 %v12588_v33, %v1765_v36 }
 0x16f   :  { %v1824_v0 = vmax.f32 %v1806_v28, 0.0  ;;  %v1825_v25 = vmax.f32 %v1807_v20, 0.0  ;;  %v1654_v24 = vpop.f32.mrb[26].mxu0  ;;  %v13447_v16 = vcombine.high %v11923_v58, %v11925_v31  ;;  %v13448_v1 = vcombine.high %v11937_v30, %v11939_v51 }
 0x170   :  { %8750 = vmatpush3.bf16.msra.mxu0 %v13445_v52  ;;  %v1700_v48 = vcombine.high %v1692_v10, %v1692_v10  ;;  %v1701_v19 = vcombine.high %v1699_v4, %v1699_v4  ;;  %v1766_v26 = vadd.f32 %v1692_v10, %v12598_v21  ;;  %v1768_v53 = vadd.f32 %v1699_v4, %v12631_v40  ;;  %v8060_v37 = vpop.f32.mrb[27].mxu0 }
 0x171   :  { %8236 = vmatmul.mubr.msk.f32.gmra.mrb[68].mxu1 %vm610_vm11, %v13446_v56  ;;  %v1859_v2 = vcombine.low %v1823_v17, %v1824_v0  ;;  %v1873_v46 = vrot.slane %v1825_v25, %v13439_v18  ;;  %v1826_v55 = vmax.f32 %v1808_v57, 0.0  ;;  %v1702_v15 = vcombine.high %v1650_v34, %v1650_v34 }
 0x172   :  { %8238 = vmatprep.mubr.msk.f32.mxu1 %vm8965_vm1, %v13425_v43  ;;  %v1767_v11 = vadd.f32 %v1700_v48, %v1202_v29  ;;  %v1769_v39 = vadd.f32 %v1701_v19, %v1203_v60  ;;  %v1809_v21 = vadd.f32 %v12624_v3, %v1766_v26  ;;  %v1811_v40 = vadd.f32 %v12588_v33, %v1768_v53 }
 0x173   :  { %6644 = vmatmul.mubr.f32.vlgmr.msra.gmra.mrb[70].mxu0 %v13447_v16  ;;  %v1866_v43 = vrot.slane %v1859_v2, %v13439_v18  ;;  %v1709_v47 = vrot.slane %v1650_v34, %v13439_v18  ;;  %v1716_v41 = vrot.slane %v1702_v15, %v13439_v18  ;;  %v1655_v32 = vadd.f32 %v12561_v44, %v1654_v24  ;;  %v12729_v51 = vpop.f32.mrb[28].mxu0 }
 0x174   :  { %6648 = vmatprep.mubr.f32.mxu0 %v13448_v1  ;;  %v13449_v58 = vcombine.high %v12612_v14, %v12614_v59  ;;  %v1810_v31 = vadd.f32 %v12620_v50, %v1767_v11  ;;  %v1812_v29 = vadd.f32 %v12624_v3, %v1769_v39  ;;  %v1827_v60 = vmax.f32 %v1809_v21, 0.0  ;;  %v8063_v20 = vpop.f32.mrb[29].mxu0 }
 0x175   :  { %v1829_v30 = vmax.f32 %v1811_v40, 0.0  ;;  %v1874_v38 = vcombine.low %v1866_v43, %v1873_v46  ;;  %v1717_v62 = vcombine.high %v1709_v47, %v1709_v47  ;;  %v1718_v36 = vcombine.high %v1716_v41, %v1716_v41 }
 0x176   :  { %8239 = vmatmul.mubr.msk.f32.gmra.mrb[70].mxu1 %vm610_vm11, %v13449_v58  ;;  %v1770_v28 = vadd.f32 %v1709_v47, %v12641_v8  ;;  %v13450_v44 = vcombine.high %v11953_v22, %v11955_v35  ;;  %v1828_v14 = vmax.f32 %v1810_v31, 0.0  ;;  %v1830_v59 = vmax.f32 %v1812_v29, 0.0 }
 0x177   :  { %v1875_v23 = vcombine.low %v1826_v55, %v1827_v60  ;;  %v1772_v10 = vadd.f32 %v1716_v41, %v12651_v63  ;;  %v13451_v4 = vcombine.high %v13441_v7, %v13440_v12  ;;  %v1962_v34 = vsel %vm1961_vm0, %v1874_v38, -inf }
 0x178   :  { %6649 = vmatmul.mubr.f32.gmra.mrb[72].mxu0 %v13450_v44  ;;  %v1771_v52 = vadd.f32 %v1717_v62, %v1219_v5  ;;  %v1773_v57 = vadd.f32 %v1718_v36, %v1220_v27  ;;  %v1813_v8 = vadd.f32 %v12620_v50, %v1770_v28  ;;  %v1963_v17 = vrot.slane %v1962_v34, 4 }
 0x179   :  { %6653 = vmatprep.mubr.f32.mxu0 %v13451_v4  ;;  %v1882_v0 = vrot.slane %v1875_v23, %v13439_v18  ;;  %v1889_v22 = vrot.slane %v1828_v14, %v13439_v18  ;;  %v1891_v35 = vcombine.low %v1829_v30, %v1830_v59  ;;  %v1815_v63 = vadd.f32 %v12624_v3, %v1772_v10  ;;  %v7549_v7 = vpop.f32.mrb[20].mxu1 }
 0x17a   :  { %v1814_v25 = vadd.f32 %v12588_v33, %v1771_v52  ;;  %v1816_v56 = vadd.f32 %v12620_v50, %v1773_v57  ;;  %v1831_v12 = vmax.f32 %v1813_v8, 0.0  ;;  %v13452_v5 = vcombine.high %v13443_v9, %v13442_v61  ;;  %v7550_v53 = vpop.f32.mrb[21].mxu1 }
 0x17b   :  { %v1964_v27 = vmax.f32 %v1962_v34, %v1963_v17  ;;  %v1890_v48 = vcombine.low %v1882_v0, %v1889_v22  ;;  %v1898_v19 = vrot.slane %v1891_v35, %v13439_v18  ;;  %v1719_v26 = vcombine.high %v1655_v32, %v1655_v32 }
 0x17c   :  { %6654 = vmatmul.mubr.f32.gmra.mrb[74].mxu0 %v13452_v5  ;;  %v1832_v24 = vmax.f32 %v1814_v25, 0.0  ;;  %v1833_v2 = vmax.f32 %v1815_v63, 0.0  ;;  %v1834_v46 = vmax.f32 %v1816_v56, 0.0  ;;  %v1905_v55 = vrot.slane %v1831_v12, %v13439_v18 }
 0x17d   :  { %v1965_v15 = vrot.slane %v1964_v27, 2  ;;  %v1969_v37 = vsel %vm1961_vm0, %v1890_v48, -inf  ;;  %v1726_v16 = vrot.slane %v1655_v32, %v13439_v18  ;;  %v1733_v11 = vrot.slane %v1719_v26, %v13439_v18 }
 0x17e   :  { %v1970_v61 = vrot.slane %v1969_v37, 4  ;;  %v1906_v9 = vcombine.low %v1898_v19, %v1905_v55  ;;  %v1907_v39 = vcombine.low %v1832_v24, %v1833_v2  ;;  %v1921_v21 = vrot.slane %v1834_v46, %v13439_v18 }
 0x17f   :  { %v1966_v40 = vmax.f32 %v1964_v27, %v1965_v15  ;;  %v1734_v1 = vcombine.high %v1726_v16, %v1726_v16  ;;  %v1735_v43 = vcombine.high %v1733_v11, %v1733_v11  ;;  %v1774_v47 = vadd.f32 %v1726_v16, %v12654_v54 }
 0x180   :  { %v1971_v41 = vmax.f32 %v1969_v37, %v1970_v61  ;;  %v1914_v58 = vrot.slane %v1907_v39, %v13439_v18  ;;  %v1976_v31 = vsel %vm1961_vm0, %v1906_v9, -inf  ;;  %v1776_v29 = vadd.f32 %v1733_v11, %v12665_v45 }
 0x181   :  { %v1977_v32 = vrot.slane %v1976_v31, 4  ;;  %v1775_v60 = vadd.f32 %v1734_v1, %v1236_v42  ;;  %v1777_v30 = vadd.f32 %v1735_v43, %v1237_v6  ;;  %v1817_v36 = vadd.f32 %v12588_v33, %v1774_v47 }
 0x182   :  { %v1972_v38 = vrot.slane %v1971_v41, 2  ;;  %v1922_v62 = vcombine.low %v1914_v58, %v1921_v21  ;;  %v1819_v28 = vadd.f32 %v12620_v50, %v1776_v29  ;;  %v1244_v20 = vrot.slane %v12668_v49, %v13439_v18 }
 0x183   :  { %v1967_v44 = vrot.slane %v1966_v40, 1  ;;  %v1978_v14 = vmax.f32 %v1976_v31, %v1977_v32  ;;  %v1818_v59 = vadd.f32 %v12624_v3, %v1775_v60  ;;  %v1835_v42 = vmax.f32 %v1817_v36, 0.0 }
 0x184   :  { %v1973_v23 = vmax.f32 %v1971_v41, %v1972_v38  ;;  %v1983_v54 = vsel %vm1961_vm0, %v1922_v62, -inf  ;;  %v1837_v10 = vmax.f32 %v1819_v28, 0.0  ;;  %v1660_v34 = vadd.f32 %v12595_v13, %v12729_v51 }
 0x185   :  { %v1979_v45 = vrot.slane %v1978_v14, 2  ;;  %v1984_v6 = vrot.slane %v1983_v54, 4  ;;  %v1836_v4 = vmax.f32 %v1818_v59, 0.0  ;;  %v1820_v57 = vadd.f32 %v12588_v33, %v1777_v30 }
 0x186   :  { %v1974_v52 = vrot.slane %v1973_v23, 1  ;;  %v12774_v8 = vadd.f32 %v7550_v53, %v7549_v7  ;;  %vm2010_vm1 = vcmask 1041409   ;;  %v1742_v22 = vrot.slane %v1660_v34, %v13439_v18 }
 0x187   :  { %v1980_v49 = vmax.f32 %v1978_v14, %v1979_v45  ;;  %v1985_v17 = vmax.f32 %v1983_v54, %v1984_v6  ;;  %v1923_v0 = vcombine.low %v1835_v42, %v1836_v4  ;;  %v1245_v35 = vcombine.high %v1244_v20, %v1244_v20 }
 0x188   :  { %v1968_v25 = vmax.f32 %v1966_v40, %v1967_v44  ;;  %v1975_v63 = vmax.f32 %v1973_v23, %v1974_v52  ;;  %v1937_v56 = vrot.slane %v1837_v10, %v13439_v18  ;;  %v1743_v13 = vcombine.high %v1742_v22, %v1742_v22 }
 0x189   :  { %v1981_v12 = vrot.slane %v1980_v49, 1  ;;  %v1930_v5 = vrot.slane %v1923_v0, %v13439_v18  ;;  %v1778_v51 = vadd.f32 %v1742_v22, %v1244_v20  ;;  %v1838_v27 = vmax.f32 %v1820_v57, 0.0 }
 0x18a   :  { %v1986_v33 = vrot.slane %v1985_v17, 2  ;;  %v2011_v7 = vsel %vm2010_vm1, %v1975_v63, %v1968_v25  ;;  %v1779_v19 = vadd.f32 %v1743_v13, %v1245_v35 }
 0x18b   :  { %v1938_v48 = vcombine.low %v1930_v5, %v1937_v56  ;;  %v1821_v26 = vadd.f32 %v12624_v3, %v1778_v51  ;;  %v1982_v53 = vmax.f32 %v1980_v49, %v1981_v12  ;;  %v13453_v5 = vld [vmem:[#allocation12_spill] sm:$0xff] }
 0x18c   :  { %v1987_v24 = vmax.f32 %v1985_v17, %v1986_v33  ;;  %v1822_v46 = vadd.f32 %v12620_v50, %v1779_v19 }
 0x18d   :  { %v1990_v2 = vsel %vm1961_vm0, %v1938_v48, -inf  ;;  %v1839_v55 = vmax.f32 %v1821_v26, 0.0  ;;  %v2012_v15 = vsel %vm377_vm2, %v1982_v53, %v2011_v7 }
 0x18e   :  { %v1991_v37 = vrot.slane %v1990_v2, 4  ;;  %v1988_v16 = vrot.slane %v1987_v24, 1  ;;  %v1840_v11 = vmax.f32 %v1822_v46, 0.0 }
 0x18f   :  { %v1939_v61 = vcombine.low %v1838_v27, %v1839_v55 }
 0x190   :  { %v1992_v9 = vmax.f32 %v1990_v2, %v1991_v37  ;;  %v1989_v39 = vmax.f32 %v1987_v24, %v1988_v16  ;;  %v1953_v3 = vrot.slane %v1840_v11, %v13439_v18 }
 0x191   :  { %v1946_v21 = vrot.slane %v1939_v61, %v13439_v18  ;;  %v12801_v61 = vld [vmem:[%s13214_s4] ss:$0 sm:$0xff]  ;;  %s8970_s4 = smov [#allocation7]  }
 0x192   :  { %v1993_v40 = vrot.slane %v1992_v9, 2  ;;  %v2014_v1 = vsel %vm2013_vm8, %v1989_v39, %v2012_v15  ;;  %s6834_s6 = sshll.u32 %s8970_s4, 4  ;;  %s6835_s6 = int_to_ptr.vmem [resolvable:$true] %s6834_s6 }
 0x193   :  { %v1954_v43 = vcombine.low %v1946_v21, %v1953_v3  ;;  %s8932_s27 = scalar_lea.vmem %s6835_s6, 384  ;;  %p8937_p3 = scmp.lt.s32.totalorder %s6835_s6, %s6835_s6 }
 0x194   :  { %v1994_v47 = vmax.f32 %v1992_v9, %v1993_v40  ;;  %p8933_p2 = scmp.ne.s32.totalorder %s6835_s6, %s8932_s27  ;;  %p8938_p4 = scmp.lt.s32.totalorder %s8932_s27, %s8932_s27 }
 0x195   :  { %v1997_v50 = vsel %vm1961_vm0, %v1954_v43, -inf }
 0x196   :  { %v1998_v41 = vrot.slane %v1997_v50, 4  ;;  %v1995_v58 = vrot.slane %v1994_v47, 1  ;;  %p8939_p5 = por %p8938_p4, %p8937_p3 }
 0x197   :  { %v8096_v31 = vpop.f32.mrb[30].mxu0  ;;  %v7552_v29 = vpop.f32.mrb[22].mxu1 }
 0x198   :  { %v3346_v32 = vpop.f32.mrb[31].mxu0  ;;  %v7553_v60 = vpop.f32.mrb[23].mxu1  ;;  %v1996_v30 = vmax.f32 %v1994_v47, %v1995_v58  ;;  %v1999_v38 = vmax.f32 %v1997_v50, %v1998_v41  ;;  %p8940_p6 = pnand %p8939_p5, %p8933_p2 }
 0x199   :  { %v7554_v62 = vadd.f32 %v7553_v60, %v7552_v29 }
 0x19a   :  { %v2000_v36 = vrot.slane %v1999_v38, 2  ;;  %v2015_v28 = vsel %vm379_vm4, %v1996_v30, %v2014_v1 }
 0x19c   :  { %v2001_v18 = vmax.f32 %v1999_v38, %v2000_v36 }
 0x19e   :  { %v2002_v20 = vrot.slane %v2001_v18, 1 }
 0x1a0   :  { %v7555_v44 = vpop.f32.mrb[24].mxu1  ;;  %v2003_v14 = vmax.f32 %v2001_v18, %v2002_v20  ;;  %v8099_v59 = vpop.f32.mrb[32].mxu0 }
 0x1a1   :  { %v7556_v23 = vpop.f32.mrb[25].mxu1  ;;  %v3356_v54 = vpop.f32.mrb[33].mxu0 }
 0x1a2   :  { %v7557_v42 = vadd.f32 %v7556_v23, %v7555_v44  ;;  %v2017_v10 = vsel %vm2016_vm9, %v2003_v14, %v2015_v28 }
 0x1a3   :  { %2019 = vst [vmem:[#allocation7] sm:$0x3f] %v2017_v10 }
 0x1a4   :  { %v7558_v45 = vpop.f32.mrb[26].mxu1 }
 0x1a5   :  { %v7559_v6 = vpop.f32.mrb[27].mxu1 }
 0x1a6   :  { %v7560_v4 = vadd.f32 %v7559_v6, %v7558_v45 }
 0x1a8   :  { %v7603_v34 = vpop.f32.mrb[28].mxu1 }
 0x1a9   :  { %v7604_v52 = vpop.f32.mrb[29].mxu1 }
 0x1aa   :  { %v7605_v57 = vadd.f32 %v7604_v52, %v7603_v34 }
 0x1ac   :  { %v8773_v49 = vadd.f32 %v7605_v57, %v12774_v8  ;;  %v7606_v17 = vpop.f32.mrb[30].mxu1 }
 0x1ad   :  { %v7607_v0 = vpop.f32.mrb[31].mxu1 }
 0x1ae   :  { %v8774_v22 = vadd.f32 %v8773_v49, %v3346_v32  ;;  %v7608_v35 = vadd.f32 %v7607_v0, %v7606_v17  ;;  %v12819_v32 = vrot.slane %v12801_v61, %v13453_v5 }
 0x1b0   :  { %v3369_v25 = vcombine.high %v8774_v22, %v8774_v22  ;;  %v8771_v63 = vadd.f32 %v7608_v35, %v7554_v62  ;;  %v7609_v56 = vpop.f32.mrb[32].mxu1  ;;  %v3376_v13 = vrot.slane %v8774_v22, %v13453_v5 }
 0x1b1   :  { %v7610_v12 = vpop.f32.mrb[33].mxu1 }
 0x1b2   :  { %v3383_v51 = vrot.slane %v3369_v25, %v13453_v5  ;;  %v8772_v27 = vadd.f32 %v8771_v63, %v8096_v31  ;;  %v7611_v33 = vadd.f32 %v7610_v12, %v7609_v56  ;;  %v3384_v53 = vcombine.high %v3376_v13, %v3376_v13 }
 0x1b3   :  { %v12796_v11 = vrot.slane %v3376_v13, %v13453_v5 }
 0x1b4   :  { %v3418_v7 = vcombine.high %v8772_v27, %v8772_v27  ;;  %v3425_v48 = vrot.slane %v8772_v27, %v13453_v5  ;;  %v8777_v19 = vadd.f32 %v7611_v33, %v7557_v42  ;;  %v7612_v26 = vpop.f32.mrb[34].mxu1  ;;  %v3385_v24 = vcombine.high %v3383_v51, %v3383_v51 }
 0x1b5   :  { %v7613_v8 = vpop.f32.mrb[35].mxu1  ;;  %v12808_v47 = vrot.slane %v3383_v51, %v13453_v5  ;;  %v12811_v50 = vrot.slane %v3384_v53, %v13453_v5  ;;  %v3414_v62 = vcombine.high %v12796_v11, %v12796_v11 }
 0x1b6   :  { %v3432_v2 = vrot.slane %v3418_v7, %v13453_v5  ;;  %v8778_v46 = vadd.f32 %v8777_v19, %v3356_v54  ;;  %v7614_v55 = vadd.f32 %v7613_v8, %v7612_v26  ;;  %v3433_v15 = vcombine.high %v3425_v48, %v3425_v48 }
 0x1b7   :  { %v12805_v1 = vrot.slane %v3425_v48, %v13453_v5  ;;  %v12814_v41 = vrot.slane %v3385_v24, %v13453_v5  ;;  %v3416_v23 = vcombine.high %v12811_v50, %v12811_v50 }
 0x1b8   :  { %v3434_v37 = vcombine.high %v3432_v2, %v3432_v2  ;;  %v8114_v16 = vpop.f32.mrb[36].mxu1  ;;  %v3467_v9 = vcombine.high %v8778_v46, %v8778_v46  ;;  %v3474_v39 = vrot.slane %v8778_v46, %v13453_v5  ;;  %v8775_v21 = vadd.f32 %v7614_v55, %v7560_v4 }
 0x1b9   :  { %v7657_v3 = vpop.f32.mrb[34].mxu0  ;;  %v4019_v40 = vpop.f32.mrb[37].mxu1  ;;  %v12822_v60 = vrot.slane %v3432_v2, %v13453_v5  ;;  %v12825_v30 = vrot.slane %v3433_v15, %v13453_v5  ;;  %v3463_v14 = vcombine.high %v12805_v1, %v12805_v1  ;;  %v3417_v54 = vcombine.high %v12814_v41, %v12814_v41 }
 0x1ba   :  { %v7658_v43 = vpop.f32.mrb[35].mxu0  ;;  %v3481_v58 = vrot.slane %v3467_v9, %v13453_v5  ;;  %v8776_v31 = vadd.f32 %v8775_v21, %v8099_v59  ;;  %v12828_v38 = vrot.slane %v3434_v37, %v13453_v5  ;;  %v3482_v36 = vcombine.high %v3474_v39, %v3474_v39 }
 0x1bb   :  { %v7659_v29 = vadd.f32 %v7658_v43, %v7657_v3  ;;  %v12833_v44 = vrot.slane %v3474_v39, %v13453_v5  ;;  %v3415_v59 = vcombine.high %v12808_v47, %v12808_v47  ;;  %v3464_v34 = vcombine.high %v12822_v60, %v12822_v60 }
 0x1bc   :  { %v3516_v28 = vcombine.high %v8776_v31, %v8776_v31  ;;  %v3483_v10 = vcombine.high %v3481_v58, %v3481_v58  ;;  %v12844_v45 = vrot.slane %v8776_v31, %v13453_v5  ;;  %v12847_v4 = vrot.slane %v3481_v58, %v13453_v5 }
 0x1bd   :  { %v4020_v18 = vadd.f32 %v7659_v29, %v4019_v40  ;;  %v7660_v20 = vpop.f32.mrb[36].mxu0  ;;  %v3465_v52 = vcombine.high %v12825_v30, %v12825_v30  ;;  %v3466_v17 = vcombine.high %v12828_v38, %v12828_v38  ;;  %v12860_v22 = vrot.slane %v3482_v36, %v13453_v5 }
 0x1be   :  { %v7661_v42 = vpop.f32.mrb[37].mxu0  ;;  %v12857_v0 = vrot.slane %v3516_v28, %v13453_v5  ;;  %v3512_v35 = vcombine.high %v12833_v44, %v12833_v44  ;;  %v3531_v51 = vcombine.high %v12844_v45, %v12844_v45  ;;  %v12870_v27 = vrot.slane %v12844_v45, %v13453_v5 }
 0x1bf   :  { %v4042_v6 = vcombine.high %v4020_v18, %v4020_v18  ;;  %v4049_v57 = vrot.slane %v4020_v18, %v13453_v5  ;;  %v7662_v49 = vadd.f32 %v7661_v42, %v7660_v20  ;;  %v12873_v48 = vrot.slane %v3483_v10, %v13453_v5 }
 0x1c0   :  { %v3513_v19 = vcombine.high %v12847_v4, %v12847_v4  ;;  %v3532_v42 = vcombine.high %v12857_v0, %v12857_v0 }
 0x1c1   :  { %v4056_v25 = vrot.slane %v4042_v6, %v13453_v5  ;;  %v4057_v63 = vcombine.high %v4049_v57, %v4049_v57  ;;  %v4065_v56 = vrot.slane %v4049_v57, %v13453_v5  ;;  %v4025_v12 = vadd.f32 %v8114_v16, %v7662_v49  ;;  %v7663_v13 = vpop.f32.mrb[38].mxu0 }
 0x1c2   :  { %v7664_v33 = vpop.f32.mrb[39].mxu0 }
 0x1c3   :  { %v8117_v7 = vpop.f32.mrb[38].mxu1  ;;  %v4058_v26 = vcombine.high %v4056_v25, %v4056_v25  ;;  %v4072_v8 = vrot.slane %v4056_v25, %v13453_v5  ;;  %v4079_v53 = vrot.slane %v4057_v63, %v13453_v5  ;;  %v4087_v24 = vcombine.high %v4065_v56, %v4065_v56 }
 0x1c4   :  { %v4029_v2 = vpop.f32.mrb[39].mxu1  ;;  %v12880_v46 = vadd.f32 %v4065_v56, %v12796_v11  ;;  %v4091_v55 = vcombine.high %v4025_v12, %v4025_v12  ;;  %v4098_v15 = vrot.slane %v4025_v12, %v13453_v5  ;;  %v7665_v37 = vadd.f32 %v7664_v33, %v7663_v13 }
 0x1c5   :  { %v4086_v16 = vrot.slane %v4058_v26, %v13453_v5  ;;  %v4088_v9 = vcombine.high %v4072_v8, %v4072_v8  ;;  %v4089_v39 = vcombine.high %v4079_v53, %v4079_v53  ;;  %v12885_v21 = vadd.f32 %v4079_v53, %v12811_v50  ;;  %v7666_v3 = vpop.f32.mrb[40].mxu0 }
 0x1c6   :  { %v12887_v40 = vadd.f32 %v4087_v24, %v3414_v62  ;;  %v12890_v43 = vadd.f32 %v4072_v8, %v12808_v47  ;;  %v4105_v11 = vrot.slane %v4091_v55, %v13453_v5  ;;  %v4106_v58 = vcombine.high %v4098_v15, %v4098_v15  ;;  %v7667_v31 = vpop.f32.mrb[41].mxu0 }
 0x1c7   :  { %v4090_v29 = vcombine.high %v4086_v16, %v4086_v16  ;;  %v12893_v36 = vadd.f32 %v4089_v39, %v3416_v23  ;;  %v12896_v28 = vadd.f32 %v4086_v16, %v12814_v41  ;;  %v12898_v18 = vadd.f32 %v4088_v9, %v3415_v59 }
 0x1c8   :  { %v4107_v50 = vcombine.high %v4105_v11, %v4105_v11  ;;  %v4114_v20 = vrot.slane %v4098_v15, %v13453_v5  ;;  %v4121_v62 = vrot.slane %v4105_v11, %v13453_v5  ;;  %v4128_v47 = vrot.slane %v4106_v58, %v13453_v5 }
 0x1c9   :  { %v12905_v10 = vadd.f32 %v4090_v29, %v3417_v54  ;;  %v4030_v45 = vadd.f32 %v7665_v37, %v4029_v2  ;;  %v7668_v23 = vadd.f32 %v7667_v31, %v7666_v3  ;;  %v3546_v24 = vrot.slane %v12857_v0, %v13453_v5 }
 0x1ca   :  { %v4135_v6 = vrot.slane %v4107_v50, %v13453_v5  ;;  %v4136_v41 = vcombine.high %v4114_v20, %v4114_v20  ;;  %v4137_v57 = vcombine.high %v4121_v62, %v4121_v62  ;;  %v4138_v59 = vcombine.high %v4128_v47, %v4128_v47 }
 0x1cb   :  { %v12909_v49 = vadd.f32 %v4114_v20, %v12805_v1  ;;  %v12912_v25 = vadd.f32 %v4128_v47, %v12825_v30  ;;  %v12915_v63 = vadd.f32 %v4121_v62, %v12822_v60  ;;  %v4140_v56 = vcombine.high %v4030_v45, %v4030_v45 }
 0x1cc   :  { %v4139_v12 = vcombine.high %v4135_v6, %v4135_v6  ;;  %v12920_v54 = vadd.f32 %v4136_v41, %v3463_v14  ;;  %v12922_v13 = vadd.f32 %v4138_v59, %v3465_v52  ;;  %v12925_v33 = vadd.f32 %v4135_v6, %v12828_v38 }
 0x1cd   :  { %v12927_v26 = vadd.f32 %v4137_v57, %v3464_v34  ;;  %v4147_v30 = vrot.slane %v4030_v45, %v13453_v5  ;;  %v4154_v8 = vrot.slane %v4140_v56, %v13453_v5  ;;  %v4035_v60 = vadd.f32 %v8117_v7, %v7668_v23  ;;  %v8132_v53 = vpop.f32.mrb[42].mxu0 }
 0x1ce   :  { %v3553_v1 = vrot.slane %v3531_v51, %v13453_v5  ;;  %v3561_v14 = vcombine.high %v12870_v27, %v12870_v27  ;;  %v12939_v52 = vadd.f32 %v4139_v12, %v3466_v17  ;;  %v4722_v34 = vpop.f32.mrb[43].mxu0  ;;  %v3514_v0 = vcombine.high %v12860_v22, %v12860_v22 }
 0x1cf   :  { %v4155_v2 = vcombine.high %v4147_v30, %v4147_v30  ;;  %v4156_v55 = vcombine.high %v4154_v8, %v4154_v8  ;;  %v4163_v15 = vrot.slane %v4147_v30, %v13453_v5  ;;  %v4170_v7 = vrot.slane %v4154_v8, %v13453_v5 }
 0x1d0   :  { %v3515_v51 = vcombine.high %v12873_v48, %v12873_v48  ;;  %v4189_v37 = vcombine.high %v4035_v60, %v4035_v60  ;;  %v4196_v16 = vrot.slane %v4035_v60, %v13453_v5 }
 0x1d1   :  { %v4177_v38 = vrot.slane %v4155_v2, %v13453_v5  ;;  %v4184_v17 = vrot.slane %v4156_v55, %v13453_v5  ;;  %v4185_v9 = vcombine.high %v4163_v15, %v4163_v15  ;;  %v4186_v39 = vcombine.high %v4170_v7, %v4170_v7 }
 0x1d2   :  { %v12951_v3 = vadd.f32 %v4163_v15, %v12833_v44  ;;  %v12954_v11 = vadd.f32 %v4170_v7, %v12847_v4  ;;  %v4203_v58 = vrot.slane %v4189_v37, %v13453_v5  ;;  %v4204_v31 = vcombine.high %v4196_v16, %v4196_v16 }
 0x1d3   :  { %v4187_v29 = vcombine.high %v4177_v38, %v4177_v38  ;;  %v4188_v50 = vcombine.high %v4184_v17, %v4184_v17  ;;  %v12958_v20 = vadd.f32 %v4177_v38, %v12860_v22  ;;  %v12963_v62 = vadd.f32 %v4185_v9, %v3512_v35 }
 0x1d4   :  { %v12966_v47 = vadd.f32 %v4184_v17, %v12873_v48  ;;  %v12971_v45 = vadd.f32 %v4186_v39, %v3513_v19  ;;  %v4205_v23 = vcombine.high %v4203_v58, %v4203_v58  ;;  %v4212_v6 = vrot.slane %v4196_v16, %v13453_v5 }
 0x1d5   :  { %v12974_v41 = vadd.f32 %v4187_v29, %v3514_v0  ;;  %v12976_v22 = vadd.f32 %v4188_v50, %v3515_v51  ;;  %v4219_v57 = vrot.slane %v4203_v58, %v13453_v5  ;;  %v4226_v44 = vrot.slane %v4204_v31, %v13453_v5 }
 0x1d6   :  { %v3560_v35 = vrot.slane %v3532_v42, %v13453_v5  ;;  %v4233_v48 = vrot.slane %v4205_v23, %v13453_v5  ;;  %v4234_v59 = vcombine.high %v4212_v6, %v4212_v6  ;;  %v12983_v4 = vadd.f32 %v4212_v6, %v12870_v27 }
 0x1d7   :  { %v3562_v19 = vcombine.high %v3553_v1, %v3553_v1  ;;  %v4235_v56 = vcombine.high %v4226_v44, %v4226_v44  ;;  %v12985_v12 = vadd.f32 %v4226_v44, %v3553_v1  ;;  %v12987_v30 = vadd.f32 %v4219_v57, %v3546_v24 }
 0x1d8   :  { %v7711_v8 = vpop.f32.mrb[40].mxu1  ;;  %v12989_v60 = vadd.f32 %v4234_v59, %v3561_v14  ;;  %v12991_v2 = vadd.f32 %v4233_v48, %v3560_v35  ;;  %v5005_v42 = vcombine.high %v12801_v61, %v12801_v61  ;;  %v5020_v15 = vcombine.high %v12819_v32, %v12819_v32 }
 0x1d9   :  { %v7712_v55 = vpop.f32.mrb[41].mxu1  ;;  %v12997_v27 = vadd.f32 %v4235_v56, %v3562_v19  ;;  %v13002_v14 = vrot.slane %v12819_v32, %v13453_v5 }
 0x1da   :  { %v7713_v7 = vadd.f32 %v7712_v55, %v7711_v8  ;;  %v5019_v24 = vrot.slane %v5005_v42, %v13453_v5  ;;  %v13005_v51 = vrot.slane %v5020_v15, %v13453_v5 }
 0x1db   :  { %v13015_v32 = vcombine.high %v13002_v14, %v13002_v14 }
 0x1dc   :  { %v4723_v0 = vadd.f32 %v7713_v7, %v4722_v34  ;;  %v7714_v1 = vpop.f32.mrb[42].mxu1  ;;  %v13011_v31 = vrot.slane %v5019_v24, %v13453_v5  ;;  %v13019_v29 = vcombine.high %v13005_v51, %v13005_v51  ;;  %v13021_v23 = vpop.f32.mrb[44].mxu0 }
 0x1dd   :  { %v7715_v37 = vpop.f32.mrb[43].mxu1  ;;  %v13025_v35 = vpop.f32.mrb[45].mxu0 }
 0x1de   :  { %v4745_v16 = vcombine.high %v4723_v0, %v4723_v0  ;;  %v4752_v61 = vrot.slane %v4723_v0, %v13453_v5  ;;  %v7716_v38 = vadd.f32 %v7715_v37, %v7714_v1 }
 0x1e0   :  { %v4759_v17 = vrot.slane %v4745_v16, %v13453_v5  ;;  %v4760_v9 = vcombine.high %v4752_v61, %v4752_v61  ;;  %v4768_v34 = vrot.slane %v4752_v61, %v13453_v5  ;;  %v4728_v39 = vadd.f32 %v8132_v53, %v7716_v38  ;;  %v7717_v58 = vpop.f32.mrb[44].mxu1 }
 0x1e1   :  { %v7718_v50 = vpop.f32.mrb[45].mxu1 }
 0x1e2   :  { %v4761_v6 = vcombine.high %v4759_v17, %v4759_v17  ;;  %v4775_v57 = vrot.slane %v4759_v17, %v13453_v5  ;;  %v4782_v53 = vrot.slane %v4760_v9, %v13453_v5  ;;  %v4790_v44 = vcombine.high %v4768_v34, %v4768_v34 }
 0x1e3   :  { %v4969_v48 = vadd.f32 %v4768_v34, %v12880_v46  ;;  %v4794_v59 = vcombine.high %v4728_v39, %v4728_v39  ;;  %v4801_v19 = vrot.slane %v4728_v39, %v13453_v5  ;;  %v13029_v56 = vadd.f32 %v7718_v50, %v7717_v58 }
 0x1e4   :  { %v4789_v8 = vrot.slane %v4761_v6, %v13453_v5  ;;  %v4791_v55 = vcombine.high %v4775_v57, %v4775_v57  ;;  %v4792_v42 = vcombine.high %v4782_v53, %v4782_v53  ;;  %v4970_v15 = vadd.f32 %v4782_v53, %v12885_v21  ;;  %v13033_v7 = vpop.f32.mrb[46].mxu1 }
 0x1e5   :  { %v4971_v0 = vadd.f32 %v4790_v44, %v12887_v40  ;;  %v4973_v1 = vadd.f32 %v4775_v57, %v12890_v43  ;;  %v5049_v24 = vadd.f32 %v13002_v14, %v4969_v48  ;;  %v4808_v46 = vrot.slane %v4794_v59, %v13453_v5  ;;  %v13039_v37 = vpop.f32.mrb[47].mxu1 }
 0x1e6   :  { %v4793_v16 = vcombine.high %v4789_v8, %v4789_v8  ;;  %v4972_v61 = vadd.f32 %v4792_v42, %v12893_v36  ;;  %v4974_v38 = vadd.f32 %v4789_v8, %v12896_v28  ;;  %v4975_v17 = vadd.f32 %v4791_v55, %v12898_v18 }
 0x1e7   :  { %v5050_v21 = vadd.f32 %v13005_v51, %v4970_v15  ;;  %v5051_v9 = vadd.f32 %v13015_v32, %v4971_v0  ;;  %v5053_v40 = vadd.f32 %v13011_v31, %v4973_v1  ;;  %v5079_v43 = vmax.f32 %v5049_v24, 0.0 }
 0x1e8   :  { %v4976_v34 = vadd.f32 %v4793_v16, %v12905_v10  ;;  %v5052_v39 = vadd.f32 %v13019_v29, %v4972_v61  ;;  %v5054_v58 = vadd.f32 %v13002_v14, %v4974_v38  ;;  %v5055_v50 = vadd.f32 %v13005_v51, %v4975_v17 }
 0x1e9   :  { %v5080_v36 = vmax.f32 %v5050_v21, 0.0  ;;  %v5081_v6 = vmax.f32 %v5051_v9, 0.0  ;;  %v5083_v28 = vmax.f32 %v5053_v40, 0.0  ;;  %v4809_v57 = vcombine.high %v4801_v19, %v4801_v19 }
 0x1ea   :  { %v5082_v18 = vmax.f32 %v5052_v39, 0.0  ;;  %v5084_v53 = vmax.f32 %v5054_v58, 0.0  ;;  %v5085_v44 = vmax.f32 %v5055_v50, 0.0  ;;  %v4810_v48 = vcombine.high %v4808_v46, %v4808_v46 }
 0x1eb   :  { %v5139_v59 = vcombine.low %v5079_v43, %v5080_v36  ;;  %v5161_v8 = vrot.slane %v5083_v28, %v13453_v5  ;;  %v4817_v10 = vrot.slane %v4801_v19, %v13453_v5  ;;  %v4824_v55 = vrot.slane %v4808_v46, %v13453_v5 }
 0x1ec   :  { %v5140_v42 = vcombine.low %v5081_v6, %v5082_v18  ;;  %v5178_v15 = vcombine.low %v5084_v53, %v5085_v44  ;;  %v4831_v0 = vrot.slane %v4809_v57, %v13453_v5  ;;  %v4838_v1 = vrot.slane %v4810_v48, %v13453_v5 }
 0x1ed   :  { %v5147_v24 = vrot.slane %v5139_v59, %v13453_v5  ;;  %v5176_v16 = vrot.slane %v5161_v8, %v13453_v5  ;;  %v4839_v61 = vcombine.high %v4817_v10, %v4817_v10  ;;  %v4840_v38 = vcombine.high %v4824_v55, %v4824_v55 }
 0x1ee   :  { %v5154_v17 = vrot.slane %v5140_v42, %v13453_v5  ;;  %v4841_v21 = vcombine.high %v4831_v0, %v4831_v0  ;;  %v4842_v9 = vcombine.high %v4838_v1, %v4838_v1  ;;  %v4977_v19 = vadd.f32 %v4817_v10, %v12909_v49  ;;  %v13060_v40 = vpop.f32.mrb[46].mxu0 }
 0x1ef   :  { %v4978_v46 = vadd.f32 %v4831_v0, %v12912_v25  ;;  %v4979_v43 = vadd.f32 %v4839_v61, %v12920_v54  ;;  %v4981_v39 = vadd.f32 %v4824_v55, %v12915_v63  ;;  %v4982_v58 = vadd.f32 %v4838_v1, %v12925_v33  ;;  %v13066_v50 = vpop.f32.mrb[47].mxu0 }
 0x1f0   :  { %v5162_v36 = vcombine.low %v5147_v24, %v5154_v17  ;;  %v4980_v6 = vadd.f32 %v4841_v21, %v12922_v13  ;;  %v4983_v28 = vadd.f32 %v4840_v38, %v12927_v26  ;;  %v4984_v57 = vadd.f32 %v4842_v9, %v12939_v52 }
 0x1f1   :  { %v5056_v49 = vadd.f32 %v13015_v32, %v4976_v34  ;;  %v5057_v18 = vadd.f32 %v13019_v29, %v4977_v19  ;;  %v5058_v25 = vadd.f32 %v13011_v31, %v4978_v46  ;;  %v5059_v54 = vadd.f32 %v13002_v14, %v4979_v43 }
 0x1f2   :  { %v5169_v63 = vrot.slane %v5162_v36, %v13453_v5  ;;  %v5060_v33 = vadd.f32 %v13005_v51, %v4980_v6  ;;  %v5061_v53 = vadd.f32 %v13015_v32, %v4981_v39  ;;  %v5062_v13 = vadd.f32 %v13019_v29, %v4982_v58  ;;  %v13079_v44 = vpop.f32.mrb[48].mxu0 }
 0x1f3   :  { %v5063_v26 = vadd.f32 %v13011_v31, %v4983_v28  ;;  %v5086_v52 = vmax.f32 %v5056_v49, 0.0  ;;  %v5087_v34 = vmax.f32 %v5057_v18, 0.0  ;;  %v5088_v48 = vmax.f32 %v5058_v25, 0.0  ;;  %v13082_v59 = vpop.f32.mrb[49].mxu0 }
 0x1f4   :  { %v5177_v8 = vcombine.low %v5169_v63, %v5176_v16  ;;  %v5089_v10 = vmax.f32 %v5059_v54, 0.0  ;;  %v5090_v55 = vmax.f32 %v5060_v33, 0.0  ;;  %v5091_v42 = vmax.f32 %v5061_v53, 0.0 }
 0x1f5   :  { %v5092_v0 = vmax.f32 %v5062_v13, 0.0  ;;  %v5093_v1 = vmax.f32 %v5063_v26, 0.0  ;;  %v5179_v24 = vcombine.low %v5086_v52, %v5087_v34  ;;  %v5186_v61 = vrot.slane %v5178_v15, %v13453_v5 }
 0x1f6   :  { %v5380_v38 = vsel %vm5379_vm10, %v5177_v8, -inf  ;;  %v5200_v17 = vrot.slane %v5088_v48, %v13453_v5  ;;  %v5217_v21 = vcombine.low %v5089_v10, %v5090_v55  ;;  %v4733_v9 = vadd.f32 %v13029_v56, %v13025_v35  ;;  %v13089_v19 = vpop.f32.mrb[50].mxu0 }
 0x1f7   :  { %v5381_v46 = vrot.slane %v5380_v38, 4  ;;  %v5193_v16 = vrot.slane %v5179_v24, %v13453_v5  ;;  %v5218_v43 = vcombine.low %v5091_v42, %v5092_v0  ;;  %v5239_v39 = vrot.slane %v5093_v1, %v13453_v5  ;;  %v13093_v58 = vpop.f32.mrb[51].mxu0 }
 0x1f8   :  { %v5225_v15 = vrot.slane %v5217_v21, %v13453_v5  ;;  %v4843_v36 = vcombine.high %v4733_v9, %v4733_v9  ;;  %v4850_v6 = vrot.slane %v4733_v9, %v13453_v5  ;;  %v5215_v35 = vrot.slane %v5200_v17, %v13453_v5 }
 0x1f9   :  { %v13097_v28 = vmax.f32 %v5380_v38, %v5381_v46  ;;  %v5201_v49 = vcombine.low %v5186_v61, %v5193_v16  ;;  %v5232_v56 = vrot.slane %v5218_v43, %v13453_v5  ;;  %v5064_v63 = vadd.f32 %v13002_v14, %v4984_v57 }
 0x1fa   :  { %v4857_v18 = vrot.slane %v4843_v36, %v13453_v5  ;;  %v4858_v25 = vcombine.high %v4850_v6, %v4850_v6  ;;  %v4866_v54 = vrot.slane %v4850_v6, %v13453_v5  ;;  %v5254_v13 = vrot.slane %v5239_v39, %v13453_v5 }
 0x1fb   :  { %v5208_v33 = vrot.slane %v5201_v49, %v13453_v5  ;;  %v5240_v53 = vcombine.low %v5225_v15, %v5232_v56  ;;  %v7722_v26 = vadd.f32 %v13039_v37, %v13033_v7  ;;  %v5094_v57 = vmax.f32 %v5064_v63, 0.0 }
 0x1fc   :  { %v4859_v52 = vcombine.high %v4857_v18, %v4857_v18  ;;  %v4873_v34 = vrot.slane %v4857_v18, %v13453_v5  ;;  %v4880_v48 = vrot.slane %v4858_v25, %v13453_v5  ;;  %v4888_v8 = vcombine.high %v4866_v54, %v4866_v54 }
 0x1fd   :  { %v5216_v10 = vcombine.low %v5208_v33, %v5215_v35  ;;  %v5247_v55 = vrot.slane %v5240_v53, %v13453_v5  ;;  %v4985_v42 = vadd.f32 %v4866_v54, %v12951_v3  ;;  %v5383_v15 = vrot.slane %v13097_v28, 2 }
 0x1fe   :  { %v4887_v0 = vrot.slane %v4859_v52, %v13453_v5  ;;  %v4889_v1 = vcombine.high %v4873_v34, %v4873_v34  ;;  %v4890_v24 = vcombine.high %v4880_v48, %v4880_v48  ;;  %v4986_v61 = vadd.f32 %v4880_v48, %v12958_v20 }
 0x1ff   :  { %v13114_v38 = vcombine.low %v5247_v55, %v5254_v13  ;;  %v5387_v7 = vsel %vm5379_vm10, %v5216_v10, -inf  ;;  %v4987_v37 = vadd.f32 %v4888_v8, %v12963_v62  ;;  %v4989_v17 = vadd.f32 %v4873_v34, %v12954_v11 }
 0x200   :  { %v5388_v21 = vrot.slane %v5387_v7, 4  ;;  %v4891_v9 = vcombine.high %v4887_v0, %v4887_v0  ;;  %v4988_v46 = vadd.f32 %v4890_v24, %v12974_v41  ;;  %v4990_v3 = vadd.f32 %v4887_v0, %v12966_v47 }
 0x201   :  { %v4991_v16 = vadd.f32 %v4889_v1, %v12971_v45  ;;  %v5065_v43 = vadd.f32 %v13005_v51, %v4985_v42  ;;  %v5066_v20 = vadd.f32 %v13015_v32, %v4986_v61  ;;  %v5067_v39 = vadd.f32 %v13019_v29, %v4987_v37 }
 0x202   :  { %v4992_v62 = vadd.f32 %v4891_v9, %v12976_v22  ;;  %v5068_v11 = vadd.f32 %v13011_v31, %v4988_v46  ;;  %v5069_v36 = vadd.f32 %v13002_v14, %v4989_v17  ;;  %v5070_v41 = vadd.f32 %v13005_v51, %v4990_v3 }
 0x203   :  { %v5071_v47 = vadd.f32 %v13015_v32, %v4991_v16  ;;  %v5095_v6 = vmax.f32 %v5065_v43, 0.0  ;;  %v5096_v45 = vmax.f32 %v5066_v20, 0.0  ;;  %v5389_v49 = vmax.f32 %v5387_v7, %v5388_v21 }
 0x204   :  { %v5072_v35 = vadd.f32 %v13019_v29, %v4992_v62  ;;  %v5097_v56 = vmax.f32 %v5067_v39, 0.0  ;;  %v5098_v18 = vmax.f32 %v5068_v11, 0.0  ;;  %v5099_v25 = vmax.f32 %v5069_v36, 0.0 }
 0x205   :  { %v5100_v54 = vmax.f32 %v5070_v41, 0.0  ;;  %v5101_v63 = vmax.f32 %v5071_v47, 0.0  ;;  %v5256_v33 = vcombine.low %v5094_v57, %v5095_v6  ;;  %v4738_v52 = vadd.f32 %v13021_v23, %v7722_v26 }
 0x206   :  { %v5102_v22 = vmax.f32 %v5072_v35, 0.0  ;;  %v5257_v53 = vcombine.low %v5096_v45, %v5097_v56  ;;  %v5278_v13 = vrot.slane %v5098_v18, %v13453_v5  ;;  %v7767_v8 = vadd.f32 %v13066_v50, %v13060_v40 }
 0x207   :  { %v5264_v34 = vrot.slane %v5256_v33, %v13453_v5  ;;  %v5295_v48 = vcombine.low %v5099_v25, %v5100_v54  ;;  %v7770_v10 = vadd.f32 %v13082_v59, %v13079_v44  ;;  %v5390_v55 = vrot.slane %v5389_v49, 2 }
 0x208   :  { %v5271_v42 = vrot.slane %v5257_v53, %v13453_v5  ;;  %v5296_v0 = vcombine.low %v5101_v63, %v5102_v22  ;;  %v4892_v57 = vcombine.high %v4738_v52, %v4738_v52  ;;  %v7815_v1 = vpop.f32.mrb[54].mxu1  ;;  %v4899_v61 = vrot.slane %v4738_v52, %v13453_v5 }
 0x209   :  { %v5303_v24 = vrot.slane %v5295_v48, %v13453_v5  ;;  %v7773_v23 = vadd.f32 %v13093_v58, %v13089_v19  ;;  %v7816_v26 = vpop.f32.mrb[55].mxu1  ;;  %v13145_v7 = vmax.f32 %v13097_v28, %v5383_v15  ;;  %v5293_v37 = vrot.slane %v5278_v13, %v13453_v5 }
 0x20a   :  { %v5279_v40 = vcombine.low %v5264_v34, %v5271_v42  ;;  %v5310_v50 = vrot.slane %v5296_v0, %v13453_v5  ;;  %v4906_v44 = vrot.slane %v4892_v57, %v13453_v5  ;;  %v7817_v59 = vadd.f32 %v7816_v26, %v7815_v1 }
 0x20b   :  { %v4907_v17 = vcombine.high %v4899_v61, %v4899_v61  ;;  %v4915_v21 = vrot.slane %v4899_v61, %v13453_v5  ;;  %v5385_v9 = vrot.slane %v13145_v7, 1  ;;  %v5391_v47 = vmax.f32 %v5389_v49, %v5390_v55 }
 0x20c   :  { %v5286_v46 = vrot.slane %v5279_v40, %v13453_v5  ;;  %v5318_v19 = vcombine.low %v5303_v24, %v5310_v50  ;;  %v4908_v58 = vcombine.high %v4906_v44, %v4906_v44  ;;  %v4922_v28 = vrot.slane %v4906_v44, %v13453_v5  ;;  %v7818_v3 = vpop.f32.mrb[56].mxu1 }
 0x20d   :  { %v4929_v16 = vrot.slane %v4907_v17, %v13453_v5  ;;  %v4937_v43 = vcombine.high %v4915_v21, %v4915_v21  ;;  %v4993_v20 = vadd.f32 %v4915_v21, %v12983_v4  ;;  %v7819_v39 = vpop.f32.mrb[57].mxu1  ;;  %v8779_v15 = vadd.f32 %v7817_v59, %v7767_v8 }
 0x20e   :  { %v5294_v62 = vcombine.low %v5286_v46, %v5293_v37  ;;  %v4936_v11 = vrot.slane %v4908_v58, %v13453_v5  ;;  %v4997_v36 = vadd.f32 %v4922_v28, %v12987_v30  ;;  %v7865_v41 = vpop.f32.mrb[52].mxu0  ;;  %v7820_v54 = vadd.f32 %v7819_v39, %v7818_v3 }
 0x20f   :  { %v4938_v6 = vcombine.high %v4929_v16, %v4929_v16  ;;  %v4994_v45 = vadd.f32 %v4929_v16, %v12985_v12  ;;  %v4995_v35 = vadd.f32 %v4937_v43, %v12989_v60  ;;  %v5073_v56 = vadd.f32 %v13011_v31, %v4993_v20  ;;  %v7866_v18 = vpop.f32.mrb[53].mxu0 }
 0x210   :  { %v4998_v25 = vadd.f32 %v4936_v11, %v12991_v2  ;;  %v5077_v4 = vadd.f32 %v13019_v29, %v4997_v36  ;;  %v7867_v63 = vadd.f32 %v7866_v18, %v7865_v41  ;;  %v7821_v33 = vpop.f32.mrb[58].mxu1  ;;  %v5325_v13 = vrot.slane %v5318_v19, %v13453_v5 }
 0x211   :  { %v4996_v22 = vadd.f32 %v4938_v6, %v12997_v27  ;;  %v5074_v30 = vadd.f32 %v13002_v14, %v4994_v45  ;;  %v5075_v49 = vadd.f32 %v13005_v51, %v4995_v35  ;;  %v5103_v53 = vmax.f32 %v5073_v56, 0.0  ;;  %v7822_v12 = vpop.f32.mrb[59].mxu1 }
 0x212   :  { %v5078_v60 = vadd.f32 %v13011_v31, %v4998_v25  ;;  %v7868_v52 = vpop.f32.mrb[54].mxu0  ;;  %v7823_v34 = vadd.f32 %v7822_v12, %v7821_v33  ;;  %v8781_v2 = vadd.f32 %v7820_v54, %v7770_v10  ;;  %v5107_v42 = vmax.f32 %v5077_v4, 0.0 }
 0x213   :  { %v5076_v29 = vadd.f32 %v13015_v32, %v4996_v22  ;;  %v5104_v48 = vmax.f32 %v5074_v30, 0.0  ;;  %v5105_v8 = vmax.f32 %v5075_v49, 0.0  ;;  %v5317_v55 = vrot.slane %v5103_v53, %v13453_v5  ;;  %v7869_v27 = vpop.f32.mrb[55].mxu0 }
 0x214   :  { %v5108_v14 = vmax.f32 %v5078_v60, 0.0  ;;  %v7870_v0 = vadd.f32 %v7869_v27, %v7868_v52  ;;  %v5917_v51 = vpop.f32.mrb[48].mxu1  ;;  %v8783_v57 = vadd.f32 %v7823_v34, %v7773_v23  ;;  %v5392_v10 = vrot.slane %v5391_v47, 1 }
 0x215   :  { %v5106_v1 = vmax.f32 %v5076_v29, 0.0  ;;  %v5332_v31 = vrot.slane %v5317_v55, %v13453_v5  ;;  %v5334_v24 = vcombine.low %v5104_v48, %v5105_v8  ;;  %v8780_v61 = vadd.f32 %v8779_v15, %v5917_v51  ;;  %v8171_v26 = vpop.f32.mrb[49].mxu1 }
 0x216   :  { %v7871_v40 = vpop.f32.mrb[56].mxu0  ;;  %v5394_v32 = vsel %vm5379_vm10, %v13114_v38, -inf  ;;  %v5401_v50 = vsel %vm5379_vm10, %v5294_v62, -inf  ;;  %v5356_v37 = vrot.slane %v5108_v14, %v13453_v5  ;;  %v5386_v23 = vmax.f32 %v13145_v7, %v5385_v9 }
 0x217   :  { %v5333_v44 = vcombine.low %v5325_v13, %v5332_v31  ;;  %v5335_v59 = vcombine.low %v5106_v1, %v5107_v42  ;;  %v7872_v17 = vpop.f32.mrb[57].mxu0  ;;  %v5342_v21 = vrot.slane %v5334_v24, %v13453_v5  ;;  %v5393_v58 = vmax.f32 %v5391_v47, %v5392_v10 }
 0x218   :  { %v7873_v46 = vadd.f32 %v7872_v17, %v7871_v40  ;;  %v5922_v19 = vpop.f32.mrb[50].mxu1  ;;  %v5395_v28 = vrot.slane %v5394_v32, 4  ;;  %v5402_v38 = vrot.slane %v5401_v50, 4  ;;  %v5371_v6 = vrot.slane %v5356_v37, %v13453_v5 }
 0x219   :  { %v5349_v3 = vrot.slane %v5335_v59, %v13453_v5  ;;  %v8782_v16 = vadd.f32 %v8781_v2, %v5922_v19  ;;  %v8174_v43 = vpop.f32.mrb[51].mxu1  ;;  %v5408_v20 = vsel %vm5379_vm10, %v5333_v44, -inf  ;;  %v5428_v11 = vsel %vm2010_vm1, %v5393_v58, %v5386_v23 }
 0x21a   :  { %v6200_v39 = vpop.f32.mrb[58].mxu0  ;;  %v5396_v15 = vmax.f32 %v5394_v32, %v5395_v28  ;;  %v5409_v62 = vrot.slane %v5408_v20, 4  ;;  %v5403_v41 = vmax.f32 %v5401_v50, %v5402_v38  ;;  %v5934_v47 = vcombine.high %v8780_v61, %v8780_v61 }
 0x21b   :  { %v5357_v36 = vcombine.low %v5342_v21, %v5349_v3  ;;  %v6201_v7 = vadd.f32 %v7867_v63, %v6200_v39  ;;  %v8192_v9 = vpop.f32.mrb[59].mxu0  ;;  %v5935_v29 = vcombine.high %v8782_v16, %v8782_v16 }
 0x21c   :  { %v5927_v45 = vpop.f32.mrb[52].mxu1  ;;  %v5397_v35 = vrot.slane %v5396_v15, 2  ;;  %v5410_v56 = vmax.f32 %v5408_v20, %v5409_v62  ;;  %v5404_v49 = vrot.slane %v5403_v41, 2 }
 0x21d   :  { %v6217_v18 = vcombine.high %v6201_v7, %v6201_v7  ;;  %v6223_v25 = vadd.f32 %v8780_v61, %v6201_v7  ;;  %v8784_v4 = vadd.f32 %v8783_v57, %v5927_v45  ;;  %v8177_v54 = vpop.f32.mrb[53].mxu1  ;;  %v5364_v33 = vrot.slane %v5357_v36, %v13453_v5 }
 0x21e   :  { %v6205_v22 = vpop.f32.mrb[60].mxu0  ;;  %v5398_v30 = vmax.f32 %v5396_v15, %v5397_v35  ;;  %v5411_v53 = vrot.slane %v5410_v56, 2  ;;  %v5405_v34 = vmax.f32 %v5403_v41, %v5404_v49 }
 0x21f   :  { %v6224_v12 = vadd.f32 %v6217_v18, %v5934_v47  ;;  %v6206_v63 = vadd.f32 %v7870_v0, %v6205_v22  ;;  %v8195_v60 = vpop.f32.mrb[61].mxu0  ;;  %v5372_v13 = vcombine.low %v5364_v33, %v5371_v6  ;;  %v5936_v40 = vcombine.high %v8784_v4, %v8784_v4 }
 0x220   :  { %v5399_v52 = vrot.slane %v5398_v30, 1  ;;  %v5412_v2 = vmax.f32 %v5410_v56, %v5411_v53  ;;  %v5406_v14 = vrot.slane %v5405_v34, 1 }
 0x221   :  { %v6218_v48 = vcombine.high %v6206_v63, %v6206_v63  ;;  %v6225_v8 = vadd.f32 %v8782_v16, %v6206_v63  ;;  %v5415_v55 = vsel %vm5379_vm10, %v5372_v13, -inf }
 0x222   :  { %v6210_v27 = vpop.f32.mrb[62].mxu0  ;;  %v5400_v42 = vmax.f32 %v5398_v30, %v5399_v52  ;;  %v5413_v5 = vrot.slane %v5412_v2, 1  ;;  %v5416_v51 = vrot.slane %v5415_v55, 4  ;;  %v5407_v24 = vmax.f32 %v5405_v34, %v5406_v14 }
 0x223   :  { %v6226_v57 = vadd.f32 %v6218_v48, %v5935_v29  ;;  %v6211_v1 = vadd.f32 %v7873_v46, %v6210_v27  ;;  %v8198_v31 = vpop.f32.mrb[63].mxu0  ;;  %v7342_v48 = vld [vmem:[#allocation5] ss:$0 sm:$0xff] }
 0x224   :  { %v5414_v0 = vmax.f32 %v5412_v2, %v5413_v5  ;;  %v5417_v61 = vmax.f32 %v5415_v55, %v5416_v51  ;;  %v5429_v26 = vsel %vm377_vm2, %v5400_v42, %v5428_v11 }
 0x225   :  { %v6219_v10 = vcombine.high %v6211_v1, %v6211_v1  ;;  %v6227_v32 = vadd.f32 %v8784_v4, %v6211_v1  ;;  %v5430_v59 = vsel %vm2013_vm8, %v5407_v24, %v5429_v26 }
 0x226   :  { %v6487_v50 = vpop.f32.mrb[64].mxu0  ;;  %v5418_v44 = vrot.slane %v5417_v61, 2  ;;  %v5431_v23 = vsel %vm379_vm4, %v5414_v0, %v5430_v59 }
 0x227   :  { %v6228_v37 = vadd.f32 %v6219_v10, %v5936_v40  ;;  %v8213_v17 = vpop.f32.mrb[65].mxu0 }
 0x228   :  { %v5419_v21 = vmax.f32 %v5417_v61, %v5418_v44 }
 0x22a   :  { %v6492_v19 = vpop.f32.mrb[66].mxu0  ;;  %v5420_v46 = vrot.slane %v5419_v21, 1 }
 0x22b   :  { %v8216_v58 = vpop.f32.mrb[67].mxu0 }
 0x22c   :  { %v5421_v28 = vmax.f32 %v5419_v21, %v5420_v46 }
 0x22e   :  { %v6497_v3 = vpop.f32.mrb[68].mxu0  ;;  %v5432_v16 = vsel %vm2016_vm9, %v5421_v28, %v5431_v23 }
 0x22f   :  { %v8219_v43 = vpop.f32.mrb[69].mxu0  ;;  %5434 = vst [vmem:[#allocation7 + $0x8] sm:$0x3f] %v5432_v16 }
 0x234   :  { %v7915_v38 = vpop.f32.mrb[60].mxu1 }
 0x235   :  { %v7916_v20 = vpop.f32.mrb[61].mxu1 }
 0x236   :  { %v7917_v39 = vadd.f32 %v7916_v20, %v7915_v38 }
 0x238   :  { %v6488_v15 = vadd.f32 %v7917_v39, %v6487_v50  ;;  %v7918_v62 = vpop.f32.mrb[62].mxu1 }
 0x239   :  { %v7919_v11 = vpop.f32.mrb[63].mxu1 }
 0x23a   :  { %v6504_v36 = vcombine.high %v6488_v15, %v6488_v15  ;;  %v7920_v7 = vadd.f32 %v7919_v11, %v7918_v62  ;;  %v6510_v9 = vadd.f32 %v6488_v15, %v6223_v25 }
 0x23c   :  { %v6493_v41 = vadd.f32 %v7920_v7, %v6492_v19  ;;  %v7921_v6 = vpop.f32.mrb[64].mxu1  ;;  %v6511_v47 = vadd.f32 %v6504_v36, %v6224_v12 }
 0x23d   :  { %v7922_v45 = vpop.f32.mrb[65].mxu1 }
 0x23e   :  { %v6505_v35 = vcombine.high %v6493_v41, %v6493_v41  ;;  %v6512_v56 = vadd.f32 %v6493_v41, %v6225_v8  ;;  %v7923_v18 = vadd.f32 %v7922_v45, %v7921_v6 }
 0x240   :  { %v6513_v4 = vadd.f32 %v6505_v35, %v6226_v57  ;;  %v6498_v54 = vadd.f32 %v7923_v18, %v6497_v3  ;;  %v6725_v33 = vpop.f32.mrb[66].mxu1 }
 0x241   :  { %v8234_v22 = vpop.f32.mrb[67].mxu1 }
 0x242   :  { %v6506_v30 = vcombine.high %v6498_v54, %v6498_v54  ;;  %v6514_v49 = vadd.f32 %v6498_v54, %v6227_v32 }
 0x244   :  { %v6515_v53 = vadd.f32 %v6506_v30, %v6228_v37  ;;  %v6730_v63 = vpop.f32.mrb[68].mxu1 }
 0x245   :  { %v8237_v60 = vpop.f32.mrb[69].mxu1 }
 0x246   :  { %v7965_v13 = vpop.f32.mrb[70].mxu0 }
 0x247   :  { %v7966_v52 = vpop.f32.mrb[71].mxu0 }
 0x248   :  { %v7967_v34 = vadd.f32 %v7966_v52, %v7965_v13 }
 0x249   :  { %v6735_v25 = vpop.f32.mrb[70].mxu1 }
 0x24a   :  { %v8240_v2 = vpop.f32.mrb[71].mxu1  ;;  %v6726_v29 = vadd.f32 %v7967_v34, %v6725_v33 }
 0x24b   :  { %v7968_v12 = vpop.f32.mrb[72].mxu0 }
 0x24c   :  { %v7969_v55 = vpop.f32.mrb[73].mxu0  ;;  %v6742_v8 = vcombine.high %v6726_v29, %v6726_v29  ;;  %v6748_v27 = vadd.f32 %v6726_v29, %v6510_v9 }
 0x24d   :  { %v7970_v42 = vadd.f32 %v7969_v55, %v7968_v12 }
 0x24e   :  { %v6749_v14 = vadd.f32 %v6742_v8, %v6511_v47  ;;  %v6761_v5 = vadd.f32 %v7342_v48, %v6748_v27 }
 0x24f   :  { %v6731_v51 = vadd.f32 %v7970_v42, %v6730_v63  ;;  %v7971_v57 = vpop.f32.mrb[74].mxu0 }
 0x250   :  { %v7972_v1 = vpop.f32.mrb[75].mxu0  ;;  %v6762_v31 = vadd.f32 %v7342_v48, %v6749_v14  ;;  %v6767_v24 = vmax.f32 %v6761_v5, 0.0 }
 0x251   :  { %v6743_v0 = vcombine.high %v6731_v51, %v6731_v51  ;;  %v6750_v61 = vadd.f32 %v6731_v51, %v6512_v56  ;;  %v7973_v26 = vadd.f32 %v7972_v1, %v7971_v57 }
 0x252   :  { %v6768_v40 = vmax.f32 %v6762_v31, 0.0  ;;  %v6773_v10 = vsel %vm621_vm5, %v6767_v24, -inf }
 0x253   :  { %v6751_v32 = vadd.f32 %v6743_v0, %v6513_v4  ;;  %v6763_v50 = vadd.f32 %v7342_v48, %v6750_v61  ;;  %v6774_v44 = vrot.slane %v6773_v10, 4  ;;  %v6736_v59 = vadd.f32 %v7973_v26, %v6735_v25 }
 0x254   :  { %v6780_v37 = vsel %vm621_vm5, %v6768_v40, -inf }
 0x255   :  { %v6764_v17 = vadd.f32 %v7342_v48, %v6751_v32  ;;  %v6769_v23 = vmax.f32 %v6763_v50, 0.0  ;;  %v6775_v21 = vmax.f32 %v6773_v10, %v6774_v44  ;;  %v6781_v19 = vrot.slane %v6780_v37, 4 }
 0x256   :  { %v6744_v46 = vcombine.high %v6736_v59, %v6736_v59  ;;  %v6752_v58 = vadd.f32 %v6736_v59, %v6514_v49 }
 0x257   :  { %v6770_v28 = vmax.f32 %v6764_v17, 0.0  ;;  %v6787_v3 = vsel %vm621_vm5, %v6769_v23, -inf  ;;  %v6776_v16 = vrot.slane %v6775_v21, 2  ;;  %v6782_v43 = vmax.f32 %v6780_v37, %v6781_v19 }
 0x258   :  { %v6788_v38 = vrot.slane %v6787_v3, 4  ;;  %v6753_v20 = vadd.f32 %v6744_v46, %v6515_v53  ;;  %v6765_v15 = vadd.f32 %v7342_v48, %v6752_v58 }
 0x259   :  { %v6794_v39 = vsel %vm621_vm5, %v6770_v28, -inf  ;;  %v6777_v62 = vmax.f32 %v6775_v21, %v6776_v16  ;;  %v6783_v11 = vrot.slane %v6782_v43, 2 }
 0x25a   :  { %v6789_v36 = vmax.f32 %v6787_v3, %v6788_v38  ;;  %v6795_v7 = vrot.slane %v6794_v39, 4  ;;  %v6766_v9 = vadd.f32 %v7342_v48, %v6753_v20  ;;  %v6771_v41 = vmax.f32 %v6765_v15, 0.0 }
 0x25b   :  { %v6778_v6 = vrot.slane %v6777_v62, 1  ;;  %v6784_v47 = vmax.f32 %v6782_v43, %v6783_v11 }
 0x25c   :  { %v6790_v45 = vrot.slane %v6789_v36, 2  ;;  %v6796_v35 = vmax.f32 %v6794_v39, %v6795_v7  ;;  %v6772_v56 = vmax.f32 %v6766_v9, 0.0  ;;  %v6801_v18 = vsel %vm621_vm5, %v6771_v41, -inf }
 0x25d   :  { %v6785_v4 = vrot.slane %v6784_v47, 1  ;;  %v6779_v22 = vmax.f32 %v6777_v62, %v6778_v6  ;;  %v6802_v30 = vrot.slane %v6801_v18, 4 }
 0x25e   :  { %v6791_v54 = vmax.f32 %v6789_v36, %v6790_v45  ;;  %v6797_v33 = vrot.slane %v6796_v35, 2  ;;  %v6808_v49 = vsel %vm621_vm5, %v6772_v56, -inf }
 0x25f   :  { %v6786_v53 = vmax.f32 %v6784_v47, %v6785_v4  ;;  %v6809_v13 = vrot.slane %v6808_v49, 4  ;;  %v6803_v52 = vmax.f32 %v6801_v18, %v6802_v30 }
 0x260   :  { %v6792_v63 = vrot.slane %v6791_v54, 1  ;;  %v6798_v60 = vmax.f32 %v6796_v35, %v6797_v33 }
 0x261   :  { %v6810_v2 = vmax.f32 %v6808_v49, %v6809_v13  ;;  %v6821_v29 = vsel %vm2010_vm1, %v6786_v53, %v6779_v22  ;;  %v6804_v12 = vrot.slane %v6803_v52, 2 }
 0x262   :  { %v6793_v34 = vmax.f32 %v6791_v54, %v6792_v63  ;;  %v6799_v25 = vrot.slane %v6798_v60, 1 }
 0x263   :  { %v6811_v55 = vrot.slane %v6810_v2, 2  ;;  %v6805_v27 = vmax.f32 %v6803_v52, %v6804_v12 }
 0x264   :  { %v6800_v48 = vmax.f32 %v6798_v60, %v6799_v25  ;;  %v6822_v8 = vsel %vm377_vm2, %v6793_v34, %v6821_v29 }
 0x265   :  { %v6812_v42 = vmax.f32 %v6810_v2, %v6811_v55  ;;  %v6806_v5 = vrot.slane %v6805_v27, 1 }
 0x266   :  { %v6823_v14 = vsel %vm2013_vm8, %v6800_v48, %v6822_v8 }
 0x267   :  { %v6813_v51 = vrot.slane %v6812_v42, 1  ;;  %v6807_v57 = vmax.f32 %v6805_v27, %v6806_v5 }
 0x269   :  { %v6814_v1 = vmax.f32 %v6812_v42, %v6813_v51  ;;  %v6824_v31 = vsel %vm379_vm4, %v6807_v57, %v6823_v14 }
 0x26b   :  { %v6825_v24 = vsel %vm2016_vm9, %v6814_v1, %v6824_v31 }
 0x26c   :  { %6827 = vst [vmem:[#allocation7 + $0x10] sm:$0x3f] %v6825_v24 }
 0x26d   :  { %8943 = shalt.err (!%p8940_p6)
}
 0x26e   :  { %s8944_s30 = scalar_lea.hbm %s13217_s7, 384 }
 0x26f   :  { %p8945_p7 = scmp.ne.s32.totalorder %s13217_s7, %s8944_s30  ;;  %p8948_p8 = scmp.lt.u32.totalorder %s8944_s30, %s13217_s7 }
 0x271   :  { %p8950_p9 = pnand %p8948_p8, %p8945_p7 }
 0x273   :  { %8953 = shalt.err (!%p8950_p9)
}
 0x274   :  { %6837 = dma.vmem_to_hbm [thread:$0]  %s6835_s6, 384, %s13217_s7, [#allocation4]  }
 0x275   :  { %8958 = dma.done.wait [#allocation4], 384  }
 0x276   :  { %8959 = vsyncadd [#allocation4], 4294966912 }
 0x277   :  { %6841 = vsyncpa [#allocation3], 1 }
 0x278   :  { %6842 = vsyncpa [#allocation6], 1 }
 0x279   :  { %6843 = vsyncpa [#allocation4], 1 }

</bundles_post_ra>
